<compile_context>
chip_gen: v6e
topology: v6e:2x2x1
jax: 0.10.0
libtpu: 0.0.40
codegen_flags: <defaults>
</compile_context>

<pallas_src>
import jax
import jax.numpy as jnp
from jax.experimental import pallas as pl
from jax.experimental.pallas import tpu as pltpu

EMBED_DIM = 256
BN_EPS = 1e-5
NORM_EPS = 1e-12
K = 7   # conv kernel size
S = 3   # conv stride


# ----------------------------- kernel 1: conv stack ---------------------------

def _conv_stack_kernel(
    pe_ref, po_ref,                    # (B, K, LP1) conv1 taps, even / odd pool windows
    w1_ref, s1_ref, b1_ref,            # conv1 weight (C1, K), BN scale/shift (C1, 1)
    w2_ref, s2_ref, b2_ref,            # conv2 im2col weight (K*C1, C2) bf16, BN (1, C2)
    w3_ref, s3_ref, b3_ref,            # conv3 im2col weight (K*C2, C3) bf16, BN (1, C3)
    h_ref,                             # out: (B, T3, C3) pooled conv3 features
    p1_s, c2_s, p2_s, c3_s,            # VMEM scratch
):
    B = pe_ref.shape[0]
    C1, Kk = w1_ref.shape
    LP1 = pe_ref.shape[2]
    TP2, C2 = p2_s.shape
    T3, C3 = h_ref.shape[1], h_ref.shape[2]

    # Hoist the small weight / BN reads out of the batch loop.
    w1 = w1_ref[...]
    s1, b1 = s1_ref[...], b1_ref[...]
    w2 = w2_ref[...]
    s2, b2 = s2_ref[...], b2_ref[...]
    w3 = w3_ref[...]
    s3, b3 = s3_ref[...], b3_ref[...]

    for b in range(B):
        # ---- Conv block 1 (C_in=1): channel-major, lane-dense VPU broadcast FMAs ----
        pe = pe_ref[b]                                   # (K, LP1)
        po = po_ref[b]
        ze = jnp.zeros((C1, LP1), jnp.float32)
        zo = jnp.zeros((C1, LP1), jnp.float32)
        for k in range(Kk):
            wk = w1[:, k:k + 1]                          # (C1, 1)
            ze = ze + wk * pe[k:k + 1, :]
            zo = zo + wk * po[k:k + 1, :]
        ae = jnp.maximum(ze * s1 + b1, 0.0)
        ao = jnp.maximum(zo * s1 + b1, 0.0)
        # MaxPool(2) = max(even, odd); single small transpose to position-major.
        p1_s[...] = jnp.transpose(jnp.maximum(ae, ao))   # (LP1, C1)

        # ---- Conv block 2: strided true-stride im2col gather + ONE bf16 MXU matmul ----
        # im2col rows ordered [even outputs | odd outputs] so MaxPool(2) is contiguous.
        for k in range(Kk):
            c2_s[0:TP2, C1 * k:C1 * (k + 1)] = p1_s[pl.ds(k, TP2, stride=6), :]
            c2_s[TP2:2 * TP2, C1 * k:C1 * (k + 1)] = p1_s[pl.ds(k + 3, TP2, stride=6), :]
        a2 = jnp.dot(c2_s[...].astype(jnp.bfloat16), w2,
                     preferred_element_type=jnp.float32)
        a2 = jnp.maximum(a2 * s2 + b2, 0.0)
        p2_s[...] = jnp.maximum(a2[0:TP2], a2[TP2:2 * TP2])          # (TP2, C2)

        # ---- Conv block 3: strided true-stride im2col gather + ONE bf16 MXU matmul ----
        for k in range(Kk):
            c3_s[0:T3, C2 * k:C2 * (k + 1)] = p2_s[pl.ds(k, T3, stride=6), :]
            c3_s[T3:2 * T3, C2 * k:C2 * (k + 1)] = p2_s[pl.ds(k + 3, T3, stride=6), :]
        a3 = jnp.dot(c3_s[...].astype(jnp.bfloat16), w3,
                     preferred_element_type=jnp.float32)
        a3 = jnp.maximum(a3 * s3 + b3, 0.0)
        # MaxPool(2) + one full-block store; the (t, c)-major flatten is free in HBM.
        h_ref[b] = jnp.maximum(a3[0:T3], a3[T3:2 * T3])              # (T3, C3)


# ----------------------------- kernel 2: head ---------------------------------

def _head_kernel(h_ref, f1w_ref, f1b_ref, g1w_ref, gs_ref, gb_ref,
                 g2w_ref, g2b_ref, lat_ref, out_ref):
    # TODO(synk): head activations kept in f32 (bf16 weights upcast in-kernel) to
    # preserve the 1e-3 atol margin vs the HIGHEST-precision reference; flip the
    # activations to bf16 too if the consumer's tolerance allows.
    h = h_ref[...]
    feat = jnp.dot(h, f1w_ref[...].astype(jnp.float32),
                   preferred_element_type=jnp.float32) + f1b_ref[...]
    z = jnp.dot(feat, g1w_ref[...].astype(jnp.float32),
                preferred_element_type=jnp.float32)
    z = jnp.maximum(z * gs_ref[...] + gb_ref[...], 0.0)
    out = jnp.dot(z, g2w_ref[...].astype(jnp.float32),
                  preferred_element_type=jnp.float32) + g2b_ref[...]

    def l2norm(v):
        ss = jnp.sum(v * v, axis=-1, keepdims=True)
        inv = jnp.minimum(jax.lax.rsqrt(ss), 1.0 / NORM_EPS)   # == 1 / max(||v||, eps)
        return v * inv

    lat_ref[...] = l2norm(feat)
    out_ref[...] = l2norm(out)


# ----------------------------- wrapper ---------------------------------------

def _fold_bn(gamma, beta, mean, var, conv_bias=None):
    scale = gamma / jnp.sqrt(var + BN_EPS)
    shift = beta - mean * scale
    if conv_bias is not None:
        shift = shift + conv_bias * scale
    return scale, shift


@jax.jit
def cnn_forward(params, x):
    """x: (B, 1, L, nviews) -> (latent_embeddings, outs), each (B, EMBED_DIM, nviews)."""
    B, _, L, nviews = x.shape
    L1 = (L - K) // S + 1
    LP1 = L1 // 2                      # pooled conv1 length
    T2 = (LP1 - K) // S + 1
    TP2 = T2 // 2                      # pooled conv2 length
    T3 = ((TP2 - K) // S + 1) // 2     # pooled conv3 length

    c1, c2, c3 = params['conv1'], params['conv2'], params['conv3']
    C1, C2, C3 = c1['w'].shape[0], c2['w'].shape[0], c3['w'].shape[0]
    E = params['f1_w'].shape[0]
    assert T3 * C3 == params['f1_w'].shape[1], \
        "signal length incompatible with the f1 input size"

    # conv1 taps for the even / odd MaxPool windows, lane-dense: (nviews*B, K, LP1).
    xt = jnp.transpose(x[:, 0, :, :], (2, 0, 1))                      # (nviews, B, L)

    def taps(off):
        cols = [xt[:, :, off + k: off + k + 6 * (LP1 - 1) + 1: 6] for k in range(K)]
        return jnp.stack(cols, axis=2).reshape(nviews * B, K, LP1)

    pe, po = taps(0), taps(3)

    # Fold BN running stats / conv biases; pack weights (bf16 for every MXU matmul).
    w1 = c1['w'].reshape(C1, K)                                       # C_in == 1
    s1, b1 = _fold_bn(c1['gamma'], c1['beta'], c1['mean'], c1['var'], c1['b'])
    s1, b1 = s1[:, None], b1[:, None]                                 # (C1, 1) channel-major
    w2 = jnp.transpose(c2['w'], (2, 1, 0)).reshape(K * C1, C2).astype(jnp.bfloat16)
    s2, b2 = _fold_bn(c2['gamma'], c2['beta'], c2['mean'], c2['var'], c2['b'])
    s2, b2 = s2[None, :], b2[None, :]                                 # (1, C2)
    w3 = jnp.transpose(c3['w'], (2, 1, 0)).reshape(K * C2, C3).astype(jnp.bfloat16)
    s3, b3 = _fold_bn(c3['gamma'], c3['beta'], c3['mean'], c3['var'], c3['b'])
    s3, b3 = s3[None, :], b3[None, :]                                 # (1, C3)

    # f1 rows permuted to the kernel's (t, c)-major flatten order.
    f1w = jnp.transpose(params['f1_w'].reshape(E, C3, T3), (2, 1, 0)) \
             .reshape(T3 * C3, E).astype(jnp.bfloat16)
    f1b = params['f1_b'][None, :]
    g1w = params['g1_w'].T.astype(jnp.bfloat16)                       # (E, 512)
    gs, gb = _fold_bn(params['g_bn_gamma'], params['g_bn_beta'],
                      params['g_bn_mean'], params['g_bn_var'])
    gs, gb = gs[None, :], gb[None, :]
    g2w = params['g2_w'].T.astype(jnp.bfloat16)                       # (512, E)
    g2b = params['g2_b'][None, :]

    weights = (w1, s1, b1, w2, s2, b2, w3, s3, b3)
    view_spec = pl.BlockSpec((B, K, LP1), lambda v: (v, 0, 0))

    def full_spec(a):
        return pl.BlockSpec(a.shape, lambda v, _nd=a.ndim: (0,) * _nd)

    # ---- kernel 1: conv stack, one grid step per view (parallel across TCs) ----
    h = pl.pallas_call(
        _conv_stack_kernel,
        grid_spec=pltpu.PrefetchScalarGridSpec(
            num_scalar_prefetch=0,
            grid=(nviews,),
            in_specs=[view_spec, view_spec] + [full_spec(a) for a in weights],
            out_specs=pl.BlockSpec((B, T3, C3), lambda v: (v, 0, 0)),
            scratch_shapes=[
                pltpu.VMEM((LP1, C1), jnp.float32),          # pooled conv1, position-major
                pltpu.VMEM((2 * TP2, K * C1), jnp.float32),  # conv2 im2col [even | odd]
                pltpu.VMEM((TP2, C2), jnp.float32),          # pooled conv2
                pltpu.VMEM((2 * T3, K * C2), jnp.float32),   # conv3 im2col [even | odd]
            ],
        ),
        out_shape=jax.ShapeDtypeStruct((nviews * B, T3, C3), jnp.float32),
        compiler_params=pltpu.CompilerParams(dimension_semantics=("parallel",)),
    )(pe, po, *weights)

    # Free (t, c)-major flatten in HBM: (nviews*B, T3, C3) -> (nviews*B, 512).
    hflat = h.reshape(nviews * B, T3 * C3)

    # ---- kernel 2: head, batched over all nviews*B rows (single issue per matmul) ----
    lat, out = pl.pallas_call(
        _head_kernel,
        out_shape=(jax.ShapeDtypeStruct((nviews * B, E), jnp.float32),
                   jax.ShapeDtypeStruct((nviews * B, E), jnp.float32)),
    )(hflat, f1w, f1b, g1w, gs, gb, g2w, g2b)

    # Match the PyTorch output layout (B, E, nviews).  Consumers that can take
    # (nviews, B, E) should skip this transpose and keep E lane-dense.
    latent_embeddings = jnp.transpose(lat.reshape(nviews, B, E), (1, 2, 0))
    outs = jnp.transpose(out.reshape(nviews, B, E), (1, 2, 0))
    return latent_embeddings, outs


# ----------------------------- pure-JAX reference ----------------------------

def _ref_forward(params, x):
    HI = jax.lax.Precision.HIGHEST
    B, _, _, nviews = x.shape

    def conv_block(h, p):
        Bc, Cin, Lc = h.shape
        Lo = (Lc - K) // S + 1
        idx = S * jnp.arange(Lo)[:, None] + jnp.arange(K)[None, :]
        patches = h[:, :, idx]                                        # (B, Cin, Lo, K)
        y = jnp.einsum('bclk,ock->bol', patches, p['w'], precision=HI)
        y = y + p['b'][None, :, None]
        scale = p['gamma'] / jnp.sqrt(p['var'] + BN_EPS)
        y = (y - p['mean'][None, :, None]) * scale[None, :, None] + p['beta'][None, :, None]
        y = jnp.maximum(y, 0.0)
        Lp = Lo // 2
        return y[:, :, :2 * Lp].reshape(Bc, -1, Lp, 2).max(axis=-1)

    def normalize(v):
        n = jnp.sqrt(jnp.sum(v * v, axis=-1, keepdims=True))
        return v / jnp.maximum(n, NORM_EPS)

    lats, outs = [], []
    for n in range(nviews):
        h = x[:, :, :, n]
        h = conv_block(h, params['conv1'])
        h = conv_block(h, params['conv2'])
        h = conv_block(h, params['conv3'])
        h = h.reshape(B, -1)
        feat = jnp.dot(h, params['f1_w'].T, precision=HI) + params['f1_b']
        z = jnp.dot(feat, params['g1_w'].T, precision=HI)
        gsc = params['g_bn_gamma'] / jnp.sqrt(params['g_bn_var'] + BN_EPS)
        z = jnp.maximum((z - params['g_bn_mean']) * gsc + params['g_bn_beta'], 0.0)
        out = jnp.dot(z, params['g2_w'].T, precision=HI) + params['g2_b']
        lats.append(normalize(feat))
        outs.append(normalize(out))
    return jnp.stack(lats, axis=-1), jnp.stack(outs, axis=-1)


# ----------------------------- deterministic params --------------------------

def init_params(key):
    ks = iter(jax.random.split(key, 32))

    def nrm(shape, s=0.05):
        return jax.random.normal(next(ks), shape, jnp.float32) * s

    def unif(shape, lo, hi):
        return jax.random.uniform(next(ks), shape, jnp.float32, lo, hi)

    def conv_block_params(c_in, c_out):
        return dict(w=nrm((c_out, c_in, K)), b=nrm((c_out,)),
                    gamma=unif((c_out,), 0.8, 1.2), beta=nrm((c_out,)),
                    mean=nrm((c_out,)), var=unif((c_out,), 0.5, 1.5))

    return dict(
        conv1=conv_block_params(1, 4),
        conv2=conv_block_params(4, 16),
        conv3=conv_block_params(16, 64),
        f1_w=nrm((EMBED_DIM, 8 * 64)), f1_b=nrm((EMBED_DIM,)),
        g1_w=nrm((512, EMBED_DIM)),                      # Linear(256, 512, bias=False)
        g_bn_gamma=unif((512,), 0.8, 1.2), g_bn_beta=nrm((512,)),
        g_bn_mean=nrm((512,)), g_bn_var=unif((512,), 0.5, 1.5),
        g2_w=nrm((EMBED_DIM, 512)), g2_b=nrm((EMBED_DIM,)),
    )


if __name__ == "__main__":
    key = jax.random.PRNGKey(0)
    kx, kp = jax.random.split(key)
    # Three (conv k=7 s=3 -> pool 2) stages must end at length 8 so 8*64 == f1 in-dim.
    B, L, NVIEWS = 2, 1900, 2
    x = jax.random.normal(kx, (B, 1, L, NVIEWS), jnp.float32)
    params = init_params(kp)

    latent, outs = cnn_forward(params, x)
    jax.block_until_ready((latent, outs))

    assert latent.shape == (B, EMBED_DIM, NVIEWS)
    assert outs.shape == (B, EMBED_DIM, NVIEWS)
    assert bool(jnp.all(jnp.isfinite(latent))) and bool(jnp.all(jnp.isfinite(outs)))

    ref_lat, ref_out = _ref_forward(params, x)
    assert bool(jnp.allclose(latent, ref_lat, rtol=1e-2, atol=1e-3))
    assert bool(jnp.allclose(outs, ref_out, rtol=1e-2, atol=1e-3))

    print("KERNEL_OK")
</pallas_src>

<mosaic_0001>
module attributes {stable_mosaic.version = 11 : i64} {
  func.func @_conv_stack_kernel(%arg0: i32, %arg1: memref<2x7x316xf32, #tpu.memory_space<vmem>>, %arg2: memref<2x7x316xf32, #tpu.memory_space<vmem>>, %arg3: memref<4x7xf32, #tpu.memory_space<vmem>>, %arg4: memref<4x1xf32, #tpu.memory_space<vmem>>, %arg5: memref<4x1xf32, #tpu.memory_space<vmem>>, %arg6: memref<28x16xbf16, #tpu.memory_space<vmem>>, %arg7: memref<1x16xf32, #tpu.memory_space<vmem>>, %arg8: memref<1x16xf32, #tpu.memory_space<vmem>>, %arg9: memref<112x64xbf16, #tpu.memory_space<vmem>>, %arg10: memref<1x64xf32, #tpu.memory_space<vmem>>, %arg11: memref<1x64xf32, #tpu.memory_space<vmem>>, %arg12: memref<2x8x64xf32, #tpu.memory_space<vmem>>, %arg13: memref<316x4xf32, #tpu.memory_space<vmem>>, %arg14: memref<104x28xf32, #tpu.memory_space<vmem>>, %arg15: memref<52x16xf32, #tpu.memory_space<vmem>>, %arg16: memref<16x112xf32, #tpu.memory_space<vmem>>) attributes {dimension_semantics = [#tpu.dimension_semantics<parallel>], iteration_bounds = array<i64: 2>, scalar_prefetch = 0 : i64, scratch_operands = 4 : i64, tpu.core_type = #tpu.core_type<tc>, window_params = [{transform_indices = @transform_0, window_bounds = array<i64: 2, 7, 316>}, {transform_indices = @transform_1, window_bounds = array<i64: 2, 7, 316>}, {pipeline_mode = #tpu.pipeline_mode<synchronous>, transform_indices = @transform_2, window_bounds = array<i64: 4, 7>}, {pipeline_mode = #tpu.pipeline_mode<synchronous>, transform_indices = @transform_3, window_bounds = array<i64: 4, 1>}, {pipeline_mode = #tpu.pipeline_mode<synchronous>, transform_indices = @transform_4, window_bounds = array<i64: 4, 1>}, {pipeline_mode = #tpu.pipeline_mode<synchronous>, transform_indices = @transform_5, window_bounds = array<i64: 28, 16>}, {pipeline_mode = #tpu.pipeline_mode<synchronous>, transform_indices = @transform_6, window_bounds = array<i64: 1, 16>}, {pipeline_mode = #tpu.pipeline_mode<synchronous>, transform_indices = @transform_7, window_bounds = array<i64: 1, 16>}, {pipeline_mode = #tpu.pipeline_mode<synchronous>, transform_indices = @transform_8, window_bounds = array<i64: 112, 64>}, {pipeline_mode = #tpu.pipeline_mode<synchronous>, transform_indices = @transform_9, window_bounds = array<i64: 1, 64>}, {pipeline_mode = #tpu.pipeline_mode<synchronous>, transform_indices = @transform_10, window_bounds = array<i64: 1, 64>}, {transform_indices = @transform_11, window_bounds = array<i64: 2, 8, 64>}]} {
    %c0 = arith.constant 0 : index
    %c0_0 = arith.constant 0 : index
    %0 = vector.load %arg3[%c0, %c0_0] : memref<4x7xf32, #tpu.memory_space<vmem>>, vector<4x7xf32>
    %c0_1 = arith.constant 0 : index
    %c0_2 = arith.constant 0 : index
    %1 = vector.load %arg4[%c0_1, %c0_2] : memref<4x1xf32, #tpu.memory_space<vmem>>, vector<4x1xf32>
    %c0_3 = arith.constant 0 : index
    %c0_4 = arith.constant 0 : index
    %2 = vector.load %arg5[%c0_3, %c0_4] : memref<4x1xf32, #tpu.memory_space<vmem>>, vector<4x1xf32>
    %c0_5 = arith.constant 0 : index
    %c0_6 = arith.constant 0 : index
    %3 = vector.load %arg6[%c0_5, %c0_6] : memref<28x16xbf16, #tpu.memory_space<vmem>>, vector<28x16xbf16>
    %c0_7 = arith.constant 0 : index
    %c0_8 = arith.constant 0 : index
    %4 = vector.load %arg7[%c0_7, %c0_8] : memref<1x16xf32, #tpu.memory_space<vmem>>, vector<1x16xf32>
    %c0_9 = arith.constant 0 : index
    %c0_10 = arith.constant 0 : index
    %5 = vector.load %arg8[%c0_9, %c0_10] : memref<1x16xf32, #tpu.memory_space<vmem>>, vector<1x16xf32>
    %c0_11 = arith.constant 0 : index
    %c0_12 = arith.constant 0 : index
    %6 = vector.load %arg9[%c0_11, %c0_12] : memref<112x64xbf16, #tpu.memory_space<vmem>>, vector<112x64xbf16>
    %c0_13 = arith.constant 0 : index
    %c0_14 = arith.constant 0 : index
    %7 = vector.load %arg10[%c0_13, %c0_14] : memref<1x64xf32, #tpu.memory_space<vmem>>, vector<1x64xf32>
    %c0_15 = arith.constant 0 : index
    %c0_16 = arith.constant 0 : index
    %8 = vector.load %arg11[%c0_15, %c0_16] : memref<1x64xf32, #tpu.memory_space<vmem>>, vector<1x64xf32>
    %c0_17 = arith.constant 0 : index
    %c0_18 = arith.constant 0 : index
    %c0_19 = arith.constant 0 : index
    %9 = vector.load %arg1[%c0_17, %c0_18, %c0_19] : memref<2x7x316xf32, #tpu.memory_space<vmem>>, vector<1x7x316xf32>
    %10 = vector.shape_cast %9 : vector<1x7x316xf32> to vector<7x316xf32>
    %c0_20 = arith.constant 0 : index
    %c0_21 = arith.constant 0 : index
    %c0_22 = arith.constant 0 : index
    %11 = vector.load %arg2[%c0_20, %c0_21, %c0_22] : memref<2x7x316xf32, #tpu.memory_space<vmem>>, vector<1x7x316xf32>
    %12 = vector.shape_cast %11 : vector<1x7x316xf32> to vector<7x316xf32>
    %cst = arith.constant 0.000000e+00 : f32
    %13 = vector.broadcast %cst : f32 to vector<4x316xf32>
    %cst_23 = arith.constant 0.000000e+00 : f32
    %14 = vector.broadcast %cst_23 : f32 to vector<4x316xf32>
    %15 = vector.extract_strided_slice %0 {offsets = [0, 0], sizes = [4, 1], strides = [1, 1]} : vector<4x7xf32> to vector<4x1xf32>
    %16 = vector.extract_strided_slice %10 {offsets = [0, 0], sizes = [1, 316], strides = [1, 1]} : vector<7x316xf32> to vector<1x316xf32>
    %17 = vector.broadcast %15 : vector<4x1xf32> to vector<4x316xf32>
    %18 = vector.broadcast %16 : vector<1x316xf32> to vector<4x316xf32>
    %19 = arith.mulf %17, %18 : vector<4x316xf32>
    %20 = arith.addf %13, %19 : vector<4x316xf32>
    %21 = vector.extract_strided_slice %12 {offsets = [0, 0], sizes = [1, 316], strides = [1, 1]} : vector<7x316xf32> to vector<1x316xf32>
    %22 = vector.broadcast %15 : vector<4x1xf32> to vector<4x316xf32>
    %23 = vector.broadcast %21 : vector<1x316xf32> to vector<4x316xf32>
    %24 = arith.mulf %22, %23 : vector<4x316xf32>
    %25 = arith.addf %14, %24 : vector<4x316xf32>
    %26 = vector.extract_strided_slice %0 {offsets = [0, 1], sizes = [4, 1], strides = [1, 1]} : vector<4x7xf32> to vector<4x1xf32>
    %27 = vector.extract_strided_slice %10 {offsets = [1, 0], sizes = [1, 316], strides = [1, 1]} : vector<7x316xf32> to vector<1x316xf32>
    %28 = vector.broadcast %26 : vector<4x1xf32> to vector<4x316xf32>
    %29 = vector.broadcast %27 : vector<1x316xf32> to vector<4x316xf32>
    %30 = arith.mulf %28, %29 : vector<4x316xf32>
    %31 = arith.addf %20, %30 : vector<4x316xf32>
    %32 = vector.extract_strided_slice %12 {offsets = [1, 0], sizes = [1, 316], strides = [1, 1]} : vector<7x316xf32> to vector<1x316xf32>
    %33 = vector.broadcast %26 : vector<4x1xf32> to vector<4x316xf32>
    %34 = vector.broadcast %32 : vector<1x316xf32> to vector<4x316xf32>
    %35 = arith.mulf %33, %34 : vector<4x316xf32>
    %36 = arith.addf %25, %35 : vector<4x316xf32>
    %37 = vector.extract_strided_slice %0 {offsets = [0, 2], sizes = [4, 1], strides = [1, 1]} : vector<4x7xf32> to vector<4x1xf32>
    %38 = vector.extract_strided_slice %10 {offsets = [2, 0], sizes = [1, 316], strides = [1, 1]} : vector<7x316xf32> to vector<1x316xf32>
    %39 = vector.broadcast %37 : vector<4x1xf32> to vector<4x316xf32>
    %40 = vector.broadcast %38 : vector<1x316xf32> to vector<4x316xf32>
    %41 = arith.mulf %39, %40 : vector<4x316xf32>
    %42 = arith.addf %31, %41 : vector<4x316xf32>
    %43 = vector.extract_strided_slice %12 {offsets = [2, 0], sizes = [1, 316], strides = [1, 1]} : vector<7x316xf32> to vector<1x316xf32>
    %44 = vector.broadcast %37 : vector<4x1xf32> to vector<4x316xf32>
    %45 = vector.broadcast %43 : vector<1x316xf32> to vector<4x316xf32>
    %46 = arith.mulf %44, %45 : vector<4x316xf32>
    %47 = arith.addf %36, %46 : vector<4x316xf32>
    %48 = vector.extract_strided_slice %0 {offsets = [0, 3], sizes = [4, 1], strides = [1, 1]} : vector<4x7xf32> to vector<4x1xf32>
    %49 = vector.extract_strided_slice %10 {offsets = [3, 0], sizes = [1, 316], strides = [1, 1]} : vector<7x316xf32> to vector<1x316xf32>
    %50 = vector.broadcast %48 : vector<4x1xf32> to vector<4x316xf32>
    %51 = vector.broadcast %49 : vector<1x316xf32> to vector<4x316xf32>
    %52 = arith.mulf %50, %51 : vector<4x316xf32>
    %53 = arith.addf %42, %52 : vector<4x316xf32>
    %54 = vector.extract_strided_slice %12 {offsets = [3, 0], sizes = [1, 316], strides = [1, 1]} : vector<7x316xf32> to vector<1x316xf32>
    %55 = vector.broadcast %48 : vector<4x1xf32> to vector<4x316xf32>
    %56 = vector.broadcast %54 : vector<1x316xf32> to vector<4x316xf32>
    %57 = arith.mulf %55, %56 : vector<4x316xf32>
    %58 = arith.addf %47, %57 : vector<4x316xf32>
    %59 = vector.extract_strided_slice %0 {offsets = [0, 4], sizes = [4, 1], strides = [1, 1]} : vector<4x7xf32> to vector<4x1xf32>
    %60 = vector.extract_strided_slice %10 {offsets = [4, 0], sizes = [1, 316], strides = [1, 1]} : vector<7x316xf32> to vector<1x316xf32>
    %61 = vector.broadcast %59 : vector<4x1xf32> to vector<4x316xf32>
    %62 = vector.broadcast %60 : vector<1x316xf32> to vector<4x316xf32>
    %63 = arith.mulf %61, %62 : vector<4x316xf32>
    %64 = arith.addf %53, %63 : vector<4x316xf32>
    %65 = vector.extract_strided_slice %12 {offsets = [4, 0], sizes = [1, 316], strides = [1, 1]} : vector<7x316xf32> to vector<1x316xf32>
    %66 = vector.broadcast %59 : vector<4x1xf32> to vector<4x316xf32>
    %67 = vector.broadcast %65 : vector<1x316xf32> to vector<4x316xf32>
    %68 = arith.mulf %66, %67 : vector<4x316xf32>
    %69 = arith.addf %58, %68 : vector<4x316xf32>
    %70 = vector.extract_strided_slice %0 {offsets = [0, 5], sizes = [4, 1], strides = [1, 1]} : vector<4x7xf32> to vector<4x1xf32>
    %71 = vector.extract_strided_slice %10 {offsets = [5, 0], sizes = [1, 316], strides = [1, 1]} : vector<7x316xf32> to vector<1x316xf32>
    %72 = vector.broadcast %70 : vector<4x1xf32> to vector<4x316xf32>
    %73 = vector.broadcast %71 : vector<1x316xf32> to vector<4x316xf32>
    %74 = arith.mulf %72, %73 : vector<4x316xf32>
    %75 = arith.addf %64, %74 : vector<4x316xf32>
    %76 = vector.extract_strided_slice %12 {offsets = [5, 0], sizes = [1, 316], strides = [1, 1]} : vector<7x316xf32> to vector<1x316xf32>
    %77 = vector.broadcast %70 : vector<4x1xf32> to vector<4x316xf32>
    %78 = vector.broadcast %76 : vector<1x316xf32> to vector<4x316xf32>
    %79 = arith.mulf %77, %78 : vector<4x316xf32>
    %80 = arith.addf %69, %79 : vector<4x316xf32>
    %81 = vector.extract_strided_slice %0 {offsets = [0, 6], sizes = [4, 1], strides = [1, 1]} : vector<4x7xf32> to vector<4x1xf32>
    %82 = vector.extract_strided_slice %10 {offsets = [6, 0], sizes = [1, 316], strides = [1, 1]} : vector<7x316xf32> to vector<1x316xf32>
    %83 = vector.broadcast %81 : vector<4x1xf32> to vector<4x316xf32>
    %84 = vector.broadcast %82 : vector<1x316xf32> to vector<4x316xf32>
    %85 = arith.mulf %83, %84 : vector<4x316xf32>
    %86 = arith.addf %75, %85 : vector<4x316xf32>
    %87 = vector.extract_strided_slice %12 {offsets = [6, 0], sizes = [1, 316], strides = [1, 1]} : vector<7x316xf32> to vector<1x316xf32>
    %88 = vector.broadcast %81 : vector<4x1xf32> to vector<4x316xf32>
    %89 = vector.broadcast %87 : vector<1x316xf32> to vector<4x316xf32>
    %90 = arith.mulf %88, %89 : vector<4x316xf32>
    %91 = arith.addf %80, %90 : vector<4x316xf32>
    %92 = vector.broadcast %1 : vector<4x1xf32> to vector<4x316xf32>
    %93 = arith.mulf %86, %92 : vector<4x316xf32>
    %94 = vector.broadcast %2 : vector<4x1xf32> to vector<4x316xf32>
    %95 = arith.addf %93, %94 : vector<4x316xf32>
    %cst_24 = arith.constant 0.000000e+00 : f32
    %96 = vector.broadcast %cst_24 : f32 to vector<4x316xf32>
    %97 = arith.maximumf %95, %96 : vector<4x316xf32>
    %98 = vector.broadcast %1 : vector<4x1xf32> to vector<4x316xf32>
    %99 = arith.mulf %91, %98 : vector<4x316xf32>
    %100 = vector.broadcast %2 : vector<4x1xf32> to vector<4x316xf32>
    %101 = arith.addf %99, %100 : vector<4x316xf32>
    %cst_25 = arith.constant 0.000000e+00 : f32
    %102 = vector.broadcast %cst_25 : f32 to vector<4x316xf32>
    %103 = arith.maximumf %101, %102 : vector<4x316xf32>
    %104 = arith.maximumf %97, %103 : vector<4x316xf32>
    %105 = tpu.transpose %104, [1, 0] : vector<4x316xf32> -> vector<316x4xf32>
    %c0_26 = arith.constant 0 : index
    %c0_27 = arith.constant 0 : index
    %106 = vector.load %arg13[%c0_26, %c0_27] : memref<316x4xf32, #tpu.memory_space<vmem>>, vector<316x4xf32>
    tpu.vector_store %arg13[%c0_26, %c0_27], %105 {strides = array<i32>} : memref<316x4xf32, #tpu.memory_space<vmem>>, vector<316x4xf32>,
    %c0_28 = arith.constant 0 : index
    %c0_29 = arith.constant 0 : index
    %107 = tpu.strided_load %arg13[%c0_28, %c0_29] {strides = array<i32: 6, 1>} : memref<316x4xf32, #tpu.memory_space<vmem>>, vector<52x4xf32>
    %c0_30 = arith.constant 0 : index
    %c0_31 = arith.constant 0 : index
    %108 = vector.load %arg14[%c0_30, %c0_31] : memref<104x28xf32, #tpu.memory_space<vmem>>, vector<52x4xf32>
    tpu.vector_store %arg14[%c0_30, %c0_31], %107 {strides = array<i32>} : memref<104x28xf32, #tpu.memory_space<vmem>>, vector<52x4xf32>,
    %c3 = arith.constant 3 : index
    %c0_32 = arith.constant 0 : index
    %109 = tpu.strided_load %arg13[%c3, %c0_32] {strides = array<i32: 6, 1>} : memref<316x4xf32, #tpu.memory_space<vmem>>, vector<52x4xf32>
    %c52 = arith.constant 52 : index
    %c0_33 = arith.constant 0 : index
    %110 = vector.load %arg14[%c52, %c0_33] : memref<104x28xf32, #tpu.memory_space<vmem>>, vector<52x4xf32>
    tpu.vector_store %arg14[%c52, %c0_33], %109 {strides = array<i32>} : memref<104x28xf32, #tpu.memory_space<vmem>>, vector<52x4xf32>,
    %c1 = arith.constant 1 : index
    %c0_34 = arith.constant 0 : index
    %111 = tpu.strided_load %arg13[%c1, %c0_34] {strides = array<i32: 6, 1>} : memref<316x4xf32, #tpu.memory_space<vmem>>, vector<52x4xf32>
    %c0_35 = arith.constant 0 : index
    %c4 = arith.constant 4 : index
    %112 = vector.load %arg14[%c0_35, %c4] : memref<104x28xf32, #tpu.memory_space<vmem>>, vector<52x4xf32>
    tpu.vector_store %arg14[%c0_35, %c4], %111 {strides = array<i32>} : memref<104x28xf32, #tpu.memory_space<vmem>>, vector<52x4xf32>,
    %c4_36 = arith.constant 4 : index
    %c0_37 = arith.constant 0 : index
    %113 = tpu.strided_load %arg13[%c4_36, %c0_37] {strides = array<i32: 6, 1>} : memref<316x4xf32, #tpu.memory_space<vmem>>, vector<52x4xf32>
    %c52_38 = arith.constant 52 : index
    %c4_39 = arith.constant 4 : index
    %114 = vector.load %arg14[%c52_38, %c4_39] : memref<104x28xf32, #tpu.memory_space<vmem>>, vector<52x4xf32>
    tpu.vector_store %arg14[%c52_38, %c4_39], %113 {strides = array<i32>} : memref<104x28xf32, #tpu.memory_space<vmem>>, vector<52x4xf32>,
    %c2 = arith.constant 2 : index
    %c0_40 = arith.constant 0 : index
    %115 = tpu.strided_load %arg13[%c2, %c0_40] {strides = array<i32: 6, 1>} : memref<316x4xf32, #tpu.memory_space<vmem>>, vector<52x4xf32>
    %c0_41 = arith.constant 0 : index
    %c8 = arith.constant 8 : index
    %116 = vector.load %arg14[%c0_41, %c8] : memref<104x28xf32, #tpu.memory_space<vmem>>, vector<52x4xf32>
    tpu.vector_store %arg14[%c0_41, %c8], %115 {strides = array<i32>} : memref<104x28xf32, #tpu.memory_space<vmem>>, vector<52x4xf32>,
    %c5 = arith.constant 5 : index
    %c0_42 = arith.constant 0 : index
    %117 = tpu.strided_load %arg13[%c5, %c0_42] {strides = array<i32: 6, 1>} : memref<316x4xf32, #tpu.memory_space<vmem>>, vector<52x4xf32>
    %c52_43 = arith.constant 52 : index
    %c8_44 = arith.constant 8 : index
    %118 = vector.load %arg14[%c52_43, %c8_44] : memref<104x28xf32, #tpu.memory_space<vmem>>, vector<52x4xf32>
    tpu.vector_store %arg14[%c52_43, %c8_44], %117 {strides = array<i32>} : memref<104x28xf32, #tpu.memory_space<vmem>>, vector<52x4xf32>,
    %c3_45 = arith.constant 3 : index
    %c0_46 = arith.constant 0 : index
    %119 = tpu.strided_load %arg13[%c3_45, %c0_46] {strides = array<i32: 6, 1>} : memref<316x4xf32, #tpu.memory_space<vmem>>, vector<52x4xf32>
    %c0_47 = arith.constant 0 : index
    %c12 = arith.constant 12 : index
    %120 = vector.load %arg14[%c0_47, %c12] : memref<104x28xf32, #tpu.memory_space<vmem>>, vector<52x4xf32>
    tpu.vector_store %arg14[%c0_47, %c12], %119 {strides = array<i32>} : memref<104x28xf32, #tpu.memory_space<vmem>>, vector<52x4xf32>,
    %c6 = arith.constant 6 : index
    %c0_48 = arith.constant 0 : index
    %121 = tpu.strided_load %arg13[%c6, %c0_48] {strides = array<i32: 6, 1>} : memref<316x4xf32, #tpu.memory_space<vmem>>, vector<52x4xf32>
    %c52_49 = arith.constant 52 : index
    %c12_50 = arith.constant 12 : index
    %122 = vector.load %arg14[%c52_49, %c12_50] : memref<104x28xf32, #tpu.memory_space<vmem>>, vector<52x4xf32>
    tpu.vector_store %arg14[%c52_49, %c12_50], %121 {strides = array<i32>} : memref<104x28xf32, #tpu.memory_space<vmem>>, vector<52x4xf32>,
    %c4_51 = arith.constant 4 : index
    %c0_52 = arith.constant 0 : index
    %123 = tpu.strided_load %arg13[%c4_51, %c0_52] {strides = array<i32: 6, 1>} : memref<316x4xf32, #tpu.memory_space<vmem>>, vector<52x4xf32>
    %c0_53 = arith.constant 0 : index
    %c16 = arith.constant 16 : index
    %124 = vector.load %arg14[%c0_53, %c16] : memref<104x28xf32, #tpu.memory_space<vmem>>, vector<52x4xf32>
    tpu.vector_store %arg14[%c0_53, %c16], %123 {strides = array<i32>} : memref<104x28xf32, #tpu.memory_space<vmem>>, vector<52x4xf32>,
    %c7 = arith.constant 7 : index
    %c0_54 = arith.constant 0 : index
    %125 = tpu.strided_load %arg13[%c7, %c0_54] {strides = array<i32: 6, 1>} : memref<316x4xf32, #tpu.memory_space<vmem>>, vector<52x4xf32>
    %c52_55 = arith.constant 52 : index
    %c16_56 = arith.constant 16 : index
    %126 = vector.load %arg14[%c52_55, %c16_56] : memref<104x28xf32, #tpu.memory_space<vmem>>, vector<52x4xf32>
    tpu.vector_store %arg14[%c52_55, %c16_56], %125 {strides = array<i32>} : memref<104x28xf32, #tpu.memory_space<vmem>>, vector<52x4xf32>,
    %c5_57 = arith.constant 5 : index
    %c0_58 = arith.constant 0 : index
    %127 = tpu.strided_load %arg13[%c5_57, %c0_58] {strides = array<i32: 6, 1>} : memref<316x4xf32, #tpu.memory_space<vmem>>, vector<52x4xf32>
    %c0_59 = arith.constant 0 : index
    %c20 = arith.constant 20 : index
    %128 = vector.load %arg14[%c0_59, %c20] : memref<104x28xf32, #tpu.memory_space<vmem>>, vector<52x4xf32>
    tpu.vector_store %arg14[%c0_59, %c20], %127 {strides = array<i32>} : memref<104x28xf32, #tpu.memory_space<vmem>>, vector<52x4xf32>,
    %c8_60 = arith.constant 8 : index
    %c0_61 = arith.constant 0 : index
    %129 = tpu.strided_load %arg13[%c8_60, %c0_61] {strides = array<i32: 6, 1>} : memref<316x4xf32, #tpu.memory_space<vmem>>, vector<52x4xf32>
    %c52_62 = arith.constant 52 : index
    %c20_63 = arith.constant 20 : index
    %130 = vector.load %arg14[%c52_62, %c20_63] : memref<104x28xf32, #tpu.memory_space<vmem>>, vector<52x4xf32>
    tpu.vector_store %arg14[%c52_62, %c20_63], %129 {strides = array<i32>} : memref<104x28xf32, #tpu.memory_space<vmem>>, vector<52x4xf32>,
    %c6_64 = arith.constant 6 : index
    %c0_65 = arith.constant 0 : index
    %131 = tpu.strided_load %arg13[%c6_64, %c0_65] {strides = array<i32: 6, 1>} : memref<316x4xf32, #tpu.memory_space<vmem>>, vector<52x4xf32>
    %c0_66 = arith.constant 0 : index
    %c24 = arith.constant 24 : index
    %132 = vector.load %arg14[%c0_66, %c24] : memref<104x28xf32, #tpu.memory_space<vmem>>, vector<52x4xf32>
    tpu.vector_store %arg14[%c0_66, %c24], %131 {strides = array<i32>} : memref<104x28xf32, #tpu.memory_space<vmem>>, vector<52x4xf32>,
    %c9 = arith.constant 9 : index
    %c0_67 = arith.constant 0 : index
    %133 = tpu.strided_load %arg13[%c9, %c0_67] {strides = array<i32: 6, 1>} : memref<316x4xf32, #tpu.memory_space<vmem>>, vector<52x4xf32>
    %c52_68 = arith.constant 52 : index
    %c24_69 = arith.constant 24 : index
    %134 = vector.load %arg14[%c52_68, %c24_69] : memref<104x28xf32, #tpu.memory_space<vmem>>, vector<52x4xf32>
    tpu.vector_store %arg14[%c52_68, %c24_69], %133 {strides = array<i32>} : memref<104x28xf32, #tpu.memory_space<vmem>>, vector<52x4xf32>,
    %c0_70 = arith.constant 0 : index
    %c0_71 = arith.constant 0 : index
    %135 = vector.load %arg14[%c0_70, %c0_71] : memref<104x28xf32, #tpu.memory_space<vmem>>, vector<104x28xf32>
    %136 = arith.truncf %135 : vector<104x28xf32> to vector<104x28xbf16>
    %cst_72 = arith.constant dense<0.000000e+00> : vector<104x16xf32>
    %137 = tpu.matmul %136, %3, %cst_72 {dimension_numbers = #tpu.dot_dimension_numbers<[1], [0], [0], [1], [0, 0, 1, 1], [], []>} : vector<104x28xbf16>, vector<28x16xbf16>, vector<104x16xf32> -> vector<104x16xf32>
    %138 = vector.broadcast %4 : vector<1x16xf32> to vector<104x16xf32>
    %139 = arith.mulf %137, %138 : vector<104x16xf32>
    %140 = vector.broadcast %5 : vector<1x16xf32> to vector<104x16xf32>
    %141 = arith.addf %139, %140 : vector<104x16xf32>
    %cst_73 = arith.constant 0.000000e+00 : f32
    %142 = vector.broadcast %cst_73 : f32 to vector<104x16xf32>
    %143 = arith.maximumf %141, %142 : vector<104x16xf32>
    %144 = vector.extract_strided_slice %143 {offsets = [0, 0], sizes = [52, 16], strides = [1, 1]} : vector<104x16xf32> to vector<52x16xf32>
    %145 = vector.extract_strided_slice %143 {offsets = [52, 0], sizes = [52, 16], strides = [1, 1]} : vector<104x16xf32> to vector<52x16xf32>
    %146 = arith.maximumf %144, %145 : vector<52x16xf32>
    %c0_74 = arith.constant 0 : index
    %c0_75 = arith.constant 0 : index
    %147 = vector.load %arg15[%c0_74, %c0_75] : memref<52x16xf32, #tpu.memory_space<vmem>>, vector<52x16xf32>
    tpu.vector_store %arg15[%c0_74, %c0_75], %146 {strides = array<i32>} : memref<52x16xf32, #tpu.memory_space<vmem>>, vector<52x16xf32>,
    %c0_76 = arith.constant 0 : index
    %c0_77 = arith.constant 0 : index
    %148 = tpu.strided_load %arg15[%c0_76, %c0_77] {strides = array<i32: 6, 1>} : memref<52x16xf32, #tpu.memory_space<vmem>>, vector<8x16xf32>
    %c0_78 = arith.constant 0 : index
    %c0_79 = arith.constant 0 : index
    %149 = vector.load %arg16[%c0_78, %c0_79] : memref<16x112xf32, #tpu.memory_space<vmem>>, vector<8x16xf32>
    tpu.vector_store %arg16[%c0_78, %c0_79], %148 {strides = array<i32>} : memref<16x112xf32, #tpu.memory_space<vmem>>, vector<8x16xf32>,
    %c3_80 = arith.constant 3 : index
    %c0_81 = arith.constant 0 : index
    %150 = tpu.strided_load %arg15[%c3_80, %c0_81] {strides = array<i32: 6, 1>} : memref<52x16xf32, #tpu.memory_space<vmem>>, vector<8x16xf32>
    %c8_82 = arith.constant 8 : index
    %c0_83 = arith.constant 0 : index
    %151 = vector.load %arg16[%c8_82, %c0_83] : memref<16x112xf32, #tpu.memory_space<vmem>>, vector<8x16xf32>
    tpu.vector_store %arg16[%c8_82, %c0_83], %150 {strides = array<i32>} : memref<16x112xf32, #tpu.memory_space<vmem>>, vector<8x16xf32>,
    %c1_84 = arith.constant 1 : index
    %c0_85 = arith.constant 0 : index
    %152 = tpu.strided_load %arg15[%c1_84, %c0_85] {strides = array<i32: 6, 1>} : memref<52x16xf32, #tpu.memory_space<vmem>>, vector<8x16xf32>
    %c0_86 = arith.constant 0 : index
    %c16_87 = arith.constant 16 : index
    %153 = vector.load %arg16[%c0_86, %c16_87] : memref<16x112xf32, #tpu.memory_space<vmem>>, vector<8x16xf32>
    tpu.vector_store %arg16[%c0_86, %c16_87], %152 {strides = array<i32>} : memref<16x112xf32, #tpu.memory_space<vmem>>, vector<8x16xf32>,
    %c4_88 = arith.constant 4 : index
    %c0_89 = arith.constant 0 : index
    %154 = tpu.strided_load %arg15[%c4_88, %c0_89] {strides = array<i32: 6, 1>} : memref<52x16xf32, #tpu.memory_space<vmem>>, vector<8x16xf32>
    %c8_90 = arith.constant 8 : index
    %c16_91 = arith.constant 16 : index
    %155 = vector.load %arg16[%c8_90, %c16_91] : memref<16x112xf32, #tpu.memory_space<vmem>>, vector<8x16xf32>
    tpu.vector_store %arg16[%c8_90, %c16_91], %154 {strides = array<i32>} : memref<16x112xf32, #tpu.memory_space<vmem>>, vector<8x16xf32>,
    %c2_92 = arith.constant 2 : index
    %c0_93 = arith.constant 0 : index
    %156 = tpu.strided_load %arg15[%c2_92, %c0_93] {strides = array<i32: 6, 1>} : memref<52x16xf32, #tpu.memory_space<vmem>>, vector<8x16xf32>
    %c0_94 = arith.constant 0 : index
    %c32 = arith.constant 32 : index
    %157 = vector.load %arg16[%c0_94, %c32] : memref<16x112xf32, #tpu.memory_space<vmem>>, vector<8x16xf32>
    tpu.vector_store %arg16[%c0_94, %c32], %156 {strides = array<i32>} : memref<16x112xf32, #tpu.memory_space<vmem>>, vector<8x16xf32>,
    %c5_95 = arith.constant 5 : index
    %c0_96 = arith.constant 0 : index
    %158 = tpu.strided_load %arg15[%c5_95, %c0_96] {strides = array<i32: 6, 1>} : memref<52x16xf32, #tpu.memory_space<vmem>>, vector<8x16xf32>
    %c8_97 = arith.constant 8 : index
    %c32_98 = arith.constant 32 : index
    %159 = vector.load %arg16[%c8_97, %c32_98] : memref<16x112xf32, #tpu.memory_space<vmem>>, vector<8x16xf32>
    tpu.vector_store %arg16[%c8_97, %c32_98], %158 {strides = array<i32>} : memref<16x112xf32, #tpu.memory_space<vmem>>, vector<8x16xf32>,
    %c3_99 = arith.constant 3 : index
    %c0_100 = arith.constant 0 : index
    %160 = tpu.strided_load %arg15[%c3_99, %c0_100] {strides = array<i32: 6, 1>} : memref<52x16xf32, #tpu.memory_space<vmem>>, vector<8x16xf32>
    %c0_101 = arith.constant 0 : index
    %c48 = arith.constant 48 : index
    %161 = vector.load %arg16[%c0_101, %c48] : memref<16x112xf32, #tpu.memory_space<vmem>>, vector<8x16xf32>
    tpu.vector_store %arg16[%c0_101, %c48], %160 {strides = array<i32>} : memref<16x112xf32, #tpu.memory_space<vmem>>, vector<8x16xf32>,
    %c6_102 = arith.constant 6 : index
    %c0_103 = arith.constant 0 : index
    %162 = tpu.strided_load %arg15[%c6_102, %c0_103] {strides = array<i32: 6, 1>} : memref<52x16xf32, #tpu.memory_space<vmem>>, vector<8x16xf32>
    %c8_104 = arith.constant 8 : index
    %c48_105 = arith.constant 48 : index
    %163 = vector.load %arg16[%c8_104, %c48_105] : memref<16x112xf32, #tpu.memory_space<vmem>>, vector<8x16xf32>
    tpu.vector_store %arg16[%c8_104, %c48_105], %162 {strides = array<i32>} : memref<16x112xf32, #tpu.memory_space<vmem>>, vector<8x16xf32>,
    %c4_106 = arith.constant 4 : index
    %c0_107 = arith.constant 0 : index
    %164 = tpu.strided_load %arg15[%c4_106, %c0_107] {strides = array<i32: 6, 1>} : memref<52x16xf32, #tpu.memory_space<vmem>>, vector<8x16xf32>
    %c0_108 = arith.constant 0 : index
    %c64 = arith.constant 64 : index
    %165 = vector.load %arg16[%c0_108, %c64] : memref<16x112xf32, #tpu.memory_space<vmem>>, vector<8x16xf32>
    tpu.vector_store %arg16[%c0_108, %c64], %164 {strides = array<i32>} : memref<16x112xf32, #tpu.memory_space<vmem>>, vector<8x16xf32>,
    %c7_109 = arith.constant 7 : index
    %c0_110 = arith.constant 0 : index
    %166 = tpu.strided_load %arg15[%c7_109, %c0_110] {strides = array<i32: 6, 1>} : memref<52x16xf32, #tpu.memory_space<vmem>>, vector<8x16xf32>
    %c8_111 = arith.constant 8 : index
    %c64_112 = arith.constant 64 : index
    %167 = vector.load %arg16[%c8_111, %c64_112] : memref<16x112xf32, #tpu.memory_space<vmem>>, vector<8x16xf32>
    tpu.vector_store %arg16[%c8_111, %c64_112], %166 {strides = array<i32>} : memref<16x112xf32, #tpu.memory_space<vmem>>, vector<8x16xf32>,
    %c5_113 = arith.constant 5 : index
    %c0_114 = arith.constant 0 : index
    %168 = tpu.strided_load %arg15[%c5_113, %c0_114] {strides = array<i32: 6, 1>} : memref<52x16xf32, #tpu.memory_space<vmem>>, vector<8x16xf32>
    %c0_115 = arith.constant 0 : index
    %c80 = arith.constant 80 : index
    %169 = vector.load %arg16[%c0_115, %c80] : memref<16x112xf32, #tpu.memory_space<vmem>>, vector<8x16xf32>
    tpu.vector_store %arg16[%c0_115, %c80], %168 {strides = array<i32>} : memref<16x112xf32, #tpu.memory_space<vmem>>, vector<8x16xf32>,
    %c8_116 = arith.constant 8 : index
    %c0_117 = arith.constant 0 : index
    %170 = tpu.strided_load %arg15[%c8_116, %c0_117] {strides = array<i32: 6, 1>} : memref<52x16xf32, #tpu.memory_space<vmem>>, vector<8x16xf32>
    %c8_118 = arith.constant 8 : index
    %c80_119 = arith.constant 80 : index
    %171 = vector.load %arg16[%c8_118, %c80_119] : memref<16x112xf32, #tpu.memory_space<vmem>>, vector<8x16xf32>
    tpu.vector_store %arg16[%c8_118, %c80_119], %170 {strides = array<i32>} : memref<16x112xf32, #tpu.memory_space<vmem>>, vector<8x16xf32>,
    %c6_120 = arith.constant 6 : index
    %c0_121 = arith.constant 0 : index
    %172 = tpu.strided_load %arg15[%c6_120, %c0_121] {strides = array<i32: 6, 1>} : memref<52x16xf32, #tpu.memory_space<vmem>>, vector<8x16xf32>
    %c0_122 = arith.constant 0 : index
    %c96 = arith.constant 96 : index
    %173 = vector.load %arg16[%c0_122, %c96] : memref<16x112xf32, #tpu.memory_space<vmem>>, vector<8x16xf32>
    tpu.vector_store %arg16[%c0_122, %c96], %172 {strides = array<i32>} : memref<16x112xf32, #tpu.memory_space<vmem>>, vector<8x16xf32>,
    %c9_123 = arith.constant 9 : index
    %c0_124 = arith.constant 0 : index
    %174 = tpu.strided_load %arg15[%c9_123, %c0_124] {strides = array<i32: 6, 1>} : memref<52x16xf32, #tpu.memory_space<vmem>>, vector<8x16xf32>
    %c8_125 = arith.constant 8 : index
    %c96_126 = arith.constant 96 : index
    %175 = vector.load %arg16[%c8_125, %c96_126] : memref<16x112xf32, #tpu.memory_space<vmem>>, vector<8x16xf32>
    tpu.vector_store %arg16[%c8_125, %c96_126], %174 {strides = array<i32>} : memref<16x112xf32, #tpu.memory_space<vmem>>, vector<8x16xf32>,
    %c0_127 = arith.constant 0 : index
    %c0_128 = arith.constant 0 : index
    %176 = vector.load %arg16[%c0_127, %c0_128] : memref<16x112xf32, #tpu.memory_space<vmem>>, vector<16x112xf32>
    %177 = arith.truncf %176 : vector<16x112xf32> to vector<16x112xbf16>
    %cst_129 = arith.constant dense<0.000000e+00> : vector<16x64xf32>
    %178 = tpu.matmul %177, %6, %cst_129 {dimension_numbers = #tpu.dot_dimension_numbers<[1], [0], [0], [1], [0, 0, 1, 1], [], []>} : vector<16x112xbf16>, vector<112x64xbf16>, vector<16x64xf32> -> vector<16x64xf32>
    %179 = vector.broadcast %7 : vector<1x64xf32> to vector<16x64xf32>
    %180 = arith.mulf %178, %179 : vector<16x64xf32>
    %181 = vector.broadcast %8 : vector<1x64xf32> to vector<16x64xf32>
    %182 = arith.addf %180, %181 : vector<16x64xf32>
    %cst_130 = arith.constant 0.000000e+00 : f32
    %183 = vector.broadcast %cst_130 : f32 to vector<16x64xf32>
    %184 = arith.maximumf %182, %183 : vector<16x64xf32>
    %185 = vector.extract_strided_slice %184 {offsets = [0, 0], sizes = [8, 64], strides = [1, 1]} : vector<16x64xf32> to vector<8x64xf32>
    %186 = vector.extract_strided_slice %184 {offsets = [8, 0], sizes = [8, 64], strides = [1, 1]} : vector<16x64xf32> to vector<8x64xf32>
    %187 = arith.maximumf %185, %186 : vector<8x64xf32>
    %c0_131 = arith.constant 0 : index
    %c0_132 = arith.constant 0 : index
    %c0_133 = arith.constant 0 : index
    %188 = vector.load %arg12[%c0_131, %c0_132, %c0_133] : memref<2x8x64xf32, #tpu.memory_space<vmem>>, vector<1x8x64xf32>
    %189 = vector.shape_cast %188 : vector<1x8x64xf32> to vector<8x64xf32>
    %190 = vector.shape_cast %187 : vector<8x64xf32> to vector<1x8x64xf32>
    tpu.vector_store %arg12[%c0_131, %c0_132, %c0_133], %190 {strides = array<i32>} : memref<2x8x64xf32, #tpu.memory_space<vmem>>, vector<1x8x64xf32>,
    %c1_134 = arith.constant 1 : index
    %c0_135 = arith.constant 0 : index
    %c0_136 = arith.constant 0 : index
    %191 = vector.load %arg1[%c1_134, %c0_135, %c0_136] : memref<2x7x316xf32, #tpu.memory_space<vmem>>, vector<1x7x316xf32>
    %192 = vector.shape_cast %191 : vector<1x7x316xf32> to vector<7x316xf32>
    %c1_137 = arith.constant 1 : index
    %c0_138 = arith.constant 0 : index
    %c0_139 = arith.constant 0 : index
    %193 = vector.load %arg2[%c1_137, %c0_138, %c0_139] : memref<2x7x316xf32, #tpu.memory_space<vmem>>, vector<1x7x316xf32>
    %194 = vector.shape_cast %193 : vector<1x7x316xf32> to vector<7x316xf32>
    %cst_140 = arith.constant 0.000000e+00 : f32
    %195 = vector.broadcast %cst_140 : f32 to vector<4x316xf32>
    %cst_141 = arith.constant 0.000000e+00 : f32
    %196 = vector.broadcast %cst_141 : f32 to vector<4x316xf32>
    %197 = vector.extract_strided_slice %0 {offsets = [0, 0], sizes = [4, 1], strides = [1, 1]} : vector<4x7xf32> to vector<4x1xf32>
    %198 = vector.extract_strided_slice %192 {offsets = [0, 0], sizes = [1, 316], strides = [1, 1]} : vector<7x316xf32> to vector<1x316xf32>
    %199 = vector.broadcast %197 : vector<4x1xf32> to vector<4x316xf32>
    %200 = vector.broadcast %198 : vector<1x316xf32> to vector<4x316xf32>
    %201 = arith.mulf %199, %200 : vector<4x316xf32>
    %202 = arith.addf %195, %201 : vector<4x316xf32>
    %203 = vector.extract_strided_slice %194 {offsets = [0, 0], sizes = [1, 316], strides = [1, 1]} : vector<7x316xf32> to vector<1x316xf32>
    %204 = vector.broadcast %197 : vector<4x1xf32> to vector<4x316xf32>
    %205 = vector.broadcast %203 : vector<1x316xf32> to vector<4x316xf32>
    %206 = arith.mulf %204, %205 : vector<4x316xf32>
    %207 = arith.addf %196, %206 : vector<4x316xf32>
    %208 = vector.extract_strided_slice %0 {offsets = [0, 1], sizes = [4, 1], strides = [1, 1]} : vector<4x7xf32> to vector<4x1xf32>
    %209 = vector.extract_strided_slice %192 {offsets = [1, 0], sizes = [1, 316], strides = [1, 1]} : vector<7x316xf32> to vector<1x316xf32>
    %210 = vector.broadcast %208 : vector<4x1xf32> to vector<4x316xf32>
    %211 = vector.broadcast %209 : vector<1x316xf32> to vector<4x316xf32>
    %212 = arith.mulf %210, %211 : vector<4x316xf32>
    %213 = arith.addf %202, %212 : vector<4x316xf32>
    %214 = vector.extract_strided_slice %194 {offsets = [1, 0], sizes = [1, 316], strides = [1, 1]} : vector<7x316xf32> to vector<1x316xf32>
    %215 = vector.broadcast %208 : vector<4x1xf32> to vector<4x316xf32>
    %216 = vector.broadcast %214 : vector<1x316xf32> to vector<4x316xf32>
    %217 = arith.mulf %215, %216 : vector<4x316xf32>
    %218 = arith.addf %207, %217 : vector<4x316xf32>
    %219 = vector.extract_strided_slice %0 {offsets = [0, 2], sizes = [4, 1], strides = [1, 1]} : vector<4x7xf32> to vector<4x1xf32>
    %220 = vector.extract_strided_slice %192 {offsets = [2, 0], sizes = [1, 316], strides = [1, 1]} : vector<7x316xf32> to vector<1x316xf32>
    %221 = vector.broadcast %219 : vector<4x1xf32> to vector<4x316xf32>
    %222 = vector.broadcast %220 : vector<1x316xf32> to vector<4x316xf32>
    %223 = arith.mulf %221, %222 : vector<4x316xf32>
    %224 = arith.addf %213, %223 : vector<4x316xf32>
    %225 = vector.extract_strided_slice %194 {offsets = [2, 0], sizes = [1, 316], strides = [1, 1]} : vector<7x316xf32> to vector<1x316xf32>
    %226 = vector.broadcast %219 : vector<4x1xf32> to vector<4x316xf32>
    %227 = vector.broadcast %225 : vector<1x316xf32> to vector<4x316xf32>
    %228 = arith.mulf %226, %227 : vector<4x316xf32>
    %229 = arith.addf %218, %228 : vector<4x316xf32>
    %230 = vector.extract_strided_slice %0 {offsets = [0, 3], sizes = [4, 1], strides = [1, 1]} : vector<4x7xf32> to vector<4x1xf32>
    %231 = vector.extract_strided_slice %192 {offsets = [3, 0], sizes = [1, 316], strides = [1, 1]} : vector<7x316xf32> to vector<1x316xf32>
    %232 = vector.broadcast %230 : vector<4x1xf32> to vector<4x316xf32>
    %233 = vector.broadcast %231 : vector<1x316xf32> to vector<4x316xf32>
    %234 = arith.mulf %232, %233 : vector<4x316xf32>
    %235 = arith.addf %224, %234 : vector<4x316xf32>
    %236 = vector.extract_strided_slice %194 {offsets = [3, 0], sizes = [1, 316], strides = [1, 1]} : vector<7x316xf32> to vector<1x316xf32>
    %237 = vector.broadcast %230 : vector<4x1xf32> to vector<4x316xf32>
    %238 = vector.broadcast %236 : vector<1x316xf32> to vector<4x316xf32>
    %239 = arith.mulf %237, %238 : vector<4x316xf32>
    %240 = arith.addf %229, %239 : vector<4x316xf32>
    %241 = vector.extract_strided_slice %0 {offsets = [0, 4], sizes = [4, 1], strides = [1, 1]} : vector<4x7xf32> to vector<4x1xf32>
    %242 = vector.extract_strided_slice %192 {offsets = [4, 0], sizes = [1, 316], strides = [1, 1]} : vector<7x316xf32> to vector<1x316xf32>
    %243 = vector.broadcast %241 : vector<4x1xf32> to vector<4x316xf32>
    %244 = vector.broadcast %242 : vector<1x316xf32> to vector<4x316xf32>
    %245 = arith.mulf %243, %244 : vector<4x316xf32>
    %246 = arith.addf %235, %245 : vector<4x316xf32>
    %247 = vector.extract_strided_slice %194 {offsets = [4, 0], sizes = [1, 316], strides = [1, 1]} : vector<7x316xf32> to vector<1x316xf32>
    %248 = vector.broadcast %241 : vector<4x1xf32> to vector<4x316xf32>
    %249 = vector.broadcast %247 : vector<1x316xf32> to vector<4x316xf32>
    %250 = arith.mulf %248, %249 : vector<4x316xf32>
    %251 = arith.addf %240, %250 : vector<4x316xf32>
    %252 = vector.extract_strided_slice %0 {offsets = [0, 5], sizes = [4, 1], strides = [1, 1]} : vector<4x7xf32> to vector<4x1xf32>
    %253 = vector.extract_strided_slice %192 {offsets = [5, 0], sizes = [1, 316], strides = [1, 1]} : vector<7x316xf32> to vector<1x316xf32>
    %254 = vector.broadcast %252 : vector<4x1xf32> to vector<4x316xf32>
    %255 = vector.broadcast %253 : vector<1x316xf32> to vector<4x316xf32>
    %256 = arith.mulf %254, %255 : vector<4x316xf32>
    %257 = arith.addf %246, %256 : vector<4x316xf32>
    %258 = vector.extract_strided_slice %194 {offsets = [5, 0], sizes = [1, 316], strides = [1, 1]} : vector<7x316xf32> to vector<1x316xf32>
    %259 = vector.broadcast %252 : vector<4x1xf32> to vector<4x316xf32>
    %260 = vector.broadcast %258 : vector<1x316xf32> to vector<4x316xf32>
    %261 = arith.mulf %259, %260 : vector<4x316xf32>
    %262 = arith.addf %251, %261 : vector<4x316xf32>
    %263 = vector.extract_strided_slice %0 {offsets = [0, 6], sizes = [4, 1], strides = [1, 1]} : vector<4x7xf32> to vector<4x1xf32>
    %264 = vector.extract_strided_slice %192 {offsets = [6, 0], sizes = [1, 316], strides = [1, 1]} : vector<7x316xf32> to vector<1x316xf32>
    %265 = vector.broadcast %263 : vector<4x1xf32> to vector<4x316xf32>
    %266 = vector.broadcast %264 : vector<1x316xf32> to vector<4x316xf32>
    %267 = arith.mulf %265, %266 : vector<4x316xf32>
    %268 = arith.addf %257, %267 : vector<4x316xf32>
    %269 = vector.extract_strided_slice %194 {offsets = [6, 0], sizes = [1, 316], strides = [1, 1]} : vector<7x316xf32> to vector<1x316xf32>
    %270 = vector.broadcast %263 : vector<4x1xf32> to vector<4x316xf32>
    %271 = vector.broadcast %269 : vector<1x316xf32> to vector<4x316xf32>
    %272 = arith.mulf %270, %271 : vector<4x316xf32>
    %273 = arith.addf %262, %272 : vector<4x316xf32>
    %274 = vector.broadcast %1 : vector<4x1xf32> to vector<4x316xf32>
    %275 = arith.mulf %268, %274 : vector<4x316xf32>
    %276 = vector.broadcast %2 : vector<4x1xf32> to vector<4x316xf32>
    %277 = arith.addf %275, %276 : vector<4x316xf32>
    %cst_142 = arith.constant 0.000000e+00 : f32
    %278 = vector.broadcast %cst_142 : f32 to vector<4x316xf32>
    %279 = arith.maximumf %277, %278 : vector<4x316xf32>
    %280 = vector.broadcast %1 : vector<4x1xf32> to vector<4x316xf32>
    %281 = arith.mulf %273, %280 : vector<4x316xf32>
    %282 = vector.broadcast %2 : vector<4x1xf32> to vector<4x316xf32>
    %283 = arith.addf %281, %282 : vector<4x316xf32>
    %cst_143 = arith.constant 0.000000e+00 : f32
    %284 = vector.broadcast %cst_143 : f32 to vector<4x316xf32>
    %285 = arith.maximumf %283, %284 : vector<4x316xf32>
    %286 = arith.maximumf %279, %285 : vector<4x316xf32>
    %287 = tpu.transpose %286, [1, 0] : vector<4x316xf32> -> vector<316x4xf32>
    %c0_144 = arith.constant 0 : index
    %c0_145 = arith.constant 0 : index
    %288 = vector.load %arg13[%c0_144, %c0_145] : memref<316x4xf32, #tpu.memory_space<vmem>>, vector<316x4xf32>
    tpu.vector_store %arg13[%c0_144, %c0_145], %287 {strides = array<i32>} : memref<316x4xf32, #tpu.memory_space<vmem>>, vector<316x4xf32>,
    %c0_146 = arith.constant 0 : index
    %c0_147 = arith.constant 0 : index
    %289 = tpu.strided_load %arg13[%c0_146, %c0_147] {strides = array<i32: 6, 1>} : memref<316x4xf32, #tpu.memory_space<vmem>>, vector<52x4xf32>
    %c0_148 = arith.constant 0 : index
    %c0_149 = arith.constant 0 : index
    %290 = vector.load %arg14[%c0_148, %c0_149] : memref<104x28xf32, #tpu.memory_space<vmem>>, vector<52x4xf32>
    tpu.vector_store %arg14[%c0_148, %c0_149], %289 {strides = array<i32>} : memref<104x28xf32, #tpu.memory_space<vmem>>, vector<52x4xf32>,
    %c3_150 = arith.constant 3 : index
    %c0_151 = arith.constant 0 : index
    %291 = tpu.strided_load %arg13[%c3_150, %c0_151] {strides = array<i32: 6, 1>} : memref<316x4xf32, #tpu.memory_space<vmem>>, vector<52x4xf32>
    %c52_152 = arith.constant 52 : index
    %c0_153 = arith.constant 0 : index
    %292 = vector.load %arg14[%c52_152, %c0_153] : memref<104x28xf32, #tpu.memory_space<vmem>>, vector<52x4xf32>
    tpu.vector_store %arg14[%c52_152, %c0_153], %291 {strides = array<i32>} : memref<104x28xf32, #tpu.memory_space<vmem>>, vector<52x4xf32>,
    %c1_154 = arith.constant 1 : index
    %c0_155 = arith.constant 0 : index
    %293 = tpu.strided_load %arg13[%c1_154, %c0_155] {strides = array<i32: 6, 1>} : memref<316x4xf32, #tpu.memory_space<vmem>>, vector<52x4xf32>
    %c0_156 = arith.constant 0 : index
    %c4_157 = arith.constant 4 : index
    %294 = vector.load %arg14[%c0_156, %c4_157] : memref<104x28xf32, #tpu.memory_space<vmem>>, vector<52x4xf32>
    tpu.vector_store %arg14[%c0_156, %c4_157], %293 {strides = array<i32>} : memref<104x28xf32, #tpu.memory_space<vmem>>, vector<52x4xf32>,
    %c4_158 = arith.constant 4 : index
    %c0_159 = arith.constant 0 : index
    %295 = tpu.strided_load %arg13[%c4_158, %c0_159] {strides = array<i32: 6, 1>} : memref<316x4xf32, #tpu.memory_space<vmem>>, vector<52x4xf32>
    %c52_160 = arith.constant 52 : index
    %c4_161 = arith.constant 4 : index
    %296 = vector.load %arg14[%c52_160, %c4_161] : memref<104x28xf32, #tpu.memory_space<vmem>>, vector<52x4xf32>
    tpu.vector_store %arg14[%c52_160, %c4_161], %295 {strides = array<i32>} : memref<104x28xf32, #tpu.memory_space<vmem>>, vector<52x4xf32>,
    %c2_162 = arith.constant 2 : index
    %c0_163 = arith.constant 0 : index
    %297 = tpu.strided_load %arg13[%c2_162, %c0_163] {strides = array<i32: 6, 1>} : memref<316x4xf32, #tpu.memory_space<vmem>>, vector<52x4xf32>
    %c0_164 = arith.constant 0 : index
    %c8_165 = arith.constant 8 : index
    %298 = vector.load %arg14[%c0_164, %c8_165] : memref<104x28xf32, #tpu.memory_space<vmem>>, vector<52x4xf32>
    tpu.vector_store %arg14[%c0_164, %c8_165], %297 {strides = array<i32>} : memref<104x28xf32, #tpu.memory_space<vmem>>, vector<52x4xf32>,
    %c5_166 = arith.constant 5 : index
    %c0_167 = arith.constant 0 : index
    %299 = tpu.strided_load %arg13[%c5_166, %c0_167] {strides = array<i32: 6, 1>} : memref<316x4xf32, #tpu.memory_space<vmem>>, vector<52x4xf32>
    %c52_168 = arith.constant 52 : index
    %c8_169 = arith.constant 8 : index
    %300 = vector.load %arg14[%c52_168, %c8_169] : memref<104x28xf32, #tpu.memory_space<vmem>>, vector<52x4xf32>
    tpu.vector_store %arg14[%c52_168, %c8_169], %299 {strides = array<i32>} : memref<104x28xf32, #tpu.memory_space<vmem>>, vector<52x4xf32>,
    %c3_170 = arith.constant 3 : index
    %c0_171 = arith.constant 0 : index
    %301 = tpu.strided_load %arg13[%c3_170, %c0_171] {strides = array<i32: 6, 1>} : memref<316x4xf32, #tpu.memory_space<vmem>>, vector<52x4xf32>
    %c0_172 = arith.constant 0 : index
    %c12_173 = arith.constant 12 : index
    %302 = vector.load %arg14[%c0_172, %c12_173] : memref<104x28xf32, #tpu.memory_space<vmem>>, vector<52x4xf32>
    tpu.vector_store %arg14[%c0_172, %c12_173], %301 {strides = array<i32>} : memref<104x28xf32, #tpu.memory_space<vmem>>, vector<52x4xf32>,
    %c6_174 = arith.constant 6 : index
    %c0_175 = arith.constant 0 : index
    %303 = tpu.strided_load %arg13[%c6_174, %c0_175] {strides = array<i32: 6, 1>} : memref<316x4xf32, #tpu.memory_space<vmem>>, vector<52x4xf32>
    %c52_176 = arith.constant 52 : index
    %c12_177 = arith.constant 12 : index
    %304 = vector.load %arg14[%c52_176, %c12_177] : memref<104x28xf32, #tpu.memory_space<vmem>>, vector<52x4xf32>
    tpu.vector_store %arg14[%c52_176, %c12_177], %303 {strides = array<i32>} : memref<104x28xf32, #tpu.memory_space<vmem>>, vector<52x4xf32>,
    %c4_178 = arith.constant 4 : index
    %c0_179 = arith.constant 0 : index
    %305 = tpu.strided_load %arg13[%c4_178, %c0_179] {strides = array<i32: 6, 1>} : memref<316x4xf32, #tpu.memory_space<vmem>>, vector<52x4xf32>
    %c0_180 = arith.constant 0 : index
    %c16_181 = arith.constant 16 : index
    %306 = vector.load %arg14[%c0_180, %c16_181] : memref<104x28xf32, #tpu.memory_space<vmem>>, vector<52x4xf32>
    tpu.vector_store %arg14[%c0_180, %c16_181], %305 {strides = array<i32>} : memref<104x28xf32, #tpu.memory_space<vmem>>, vector<52x4xf32>,
    %c7_182 = arith.constant 7 : index
    %c0_183 = arith.constant 0 : index
    %307 = tpu.strided_load %arg13[%c7_182, %c0_183] {strides = array<i32: 6, 1>} : memref<316x4xf32, #tpu.memory_space<vmem>>, vector<52x4xf32>
    %c52_184 = arith.constant 52 : index
    %c16_185 = arith.constant 16 : index
    %308 = vector.load %arg14[%c52_184, %c16_185] : memref<104x28xf32, #tpu.memory_space<vmem>>, vector<52x4xf32>
    tpu.vector_store %arg14[%c52_184, %c16_185], %307 {strides = array<i32>} : memref<104x28xf32, #tpu.memory_space<vmem>>, vector<52x4xf32>,
    %c5_186 = arith.constant 5 : index
    %c0_187 = arith.constant 0 : index
    %309 = tpu.strided_load %arg13[%c5_186, %c0_187] {strides = array<i32: 6, 1>} : memref<316x4xf32, #tpu.memory_space<vmem>>, vector<52x4xf32>
    %c0_188 = arith.constant 0 : index
    %c20_189 = arith.constant 20 : index
    %310 = vector.load %arg14[%c0_188, %c20_189] : memref<104x28xf32, #tpu.memory_space<vmem>>, vector<52x4xf32>
    tpu.vector_store %arg14[%c0_188, %c20_189], %309 {strides = array<i32>} : memref<104x28xf32, #tpu.memory_space<vmem>>, vector<52x4xf32>,
    %c8_190 = arith.constant 8 : index
    %c0_191 = arith.constant 0 : index
    %311 = tpu.strided_load %arg13[%c8_190, %c0_191] {strides = array<i32: 6, 1>} : memref<316x4xf32, #tpu.memory_space<vmem>>, vector<52x4xf32>
    %c52_192 = arith.constant 52 : index
    %c20_193 = arith.constant 20 : index
    %312 = vector.load %arg14[%c52_192, %c20_193] : memref<104x28xf32, #tpu.memory_space<vmem>>, vector<52x4xf32>
    tpu.vector_store %arg14[%c52_192, %c20_193], %311 {strides = array<i32>} : memref<104x28xf32, #tpu.memory_space<vmem>>, vector<52x4xf32>,
    %c6_194 = arith.constant 6 : index
    %c0_195 = arith.constant 0 : index
    %313 = tpu.strided_load %arg13[%c6_194, %c0_195] {strides = array<i32: 6, 1>} : memref<316x4xf32, #tpu.memory_space<vmem>>, vector<52x4xf32>
    %c0_196 = arith.constant 0 : index
    %c24_197 = arith.constant 24 : index
    %314 = vector.load %arg14[%c0_196, %c24_197] : memref<104x28xf32, #tpu.memory_space<vmem>>, vector<52x4xf32>
    tpu.vector_store %arg14[%c0_196, %c24_197], %313 {strides = array<i32>} : memref<104x28xf32, #tpu.memory_space<vmem>>, vector<52x4xf32>,
    %c9_198 = arith.constant 9 : index
    %c0_199 = arith.constant 0 : index
    %315 = tpu.strided_load %arg13[%c9_198, %c0_199] {strides = array<i32: 6, 1>} : memref<316x4xf32, #tpu.memory_space<vmem>>, vector<52x4xf32>
    %c52_200 = arith.constant 52 : index
    %c24_201 = arith.constant 24 : index
    %316 = vector.load %arg14[%c52_200, %c24_201] : memref<104x28xf32, #tpu.memory_space<vmem>>, vector<52x4xf32>
    tpu.vector_store %arg14[%c52_200, %c24_201], %315 {strides = array<i32>} : memref<104x28xf32, #tpu.memory_space<vmem>>, vector<52x4xf32>,
    %c0_202 = arith.constant 0 : index
    %c0_203 = arith.constant 0 : index
    %317 = vector.load %arg14[%c0_202, %c0_203] : memref<104x28xf32, #tpu.memory_space<vmem>>, vector<104x28xf32>
    %318 = arith.truncf %317 : vector<104x28xf32> to vector<104x28xbf16>
    %cst_204 = arith.constant dense<0.000000e+00> : vector<104x16xf32>
    %319 = tpu.matmul %318, %3, %cst_204 {dimension_numbers = #tpu.dot_dimension_numbers<[1], [0], [0], [1], [0, 0, 1, 1], [], []>} : vector<104x28xbf16>, vector<28x16xbf16>, vector<104x16xf32> -> vector<104x16xf32>
    %320 = vector.broadcast %4 : vector<1x16xf32> to vector<104x16xf32>
    %321 = arith.mulf %319, %320 : vector<104x16xf32>
    %322 = vector.broadcast %5 : vector<1x16xf32> to vector<104x16xf32>
    %323 = arith.addf %321, %322 : vector<104x16xf32>
    %cst_205 = arith.constant 0.000000e+00 : f32
    %324 = vector.broadcast %cst_205 : f32 to vector<104x16xf32>
    %325 = arith.maximumf %323, %324 : vector<104x16xf32>
    %326 = vector.extract_strided_slice %325 {offsets = [0, 0], sizes = [52, 16], strides = [1, 1]} : vector<104x16xf32> to vector<52x16xf32>
    %327 = vector.extract_strided_slice %325 {offsets = [52, 0], sizes = [52, 16], strides = [1, 1]} : vector<104x16xf32> to vector<52x16xf32>
    %328 = arith.maximumf %326, %327 : vector<52x16xf32>
    %c0_206 = arith.constant 0 : index
    %c0_207 = arith.constant 0 : index
    %329 = vector.load %arg15[%c0_206, %c0_207] : memref<52x16xf32, #tpu.memory_space<vmem>>, vector<52x16xf32>
    tpu.vector_store %arg15[%c0_206, %c0_207], %328 {strides = array<i32>} : memref<52x16xf32, #tpu.memory_space<vmem>>, vector<52x16xf32>,
    %c0_208 = arith.constant 0 : index
    %c0_209 = arith.constant 0 : index
    %330 = tpu.strided_load %arg15[%c0_208, %c0_209] {strides = array<i32: 6, 1>} : memref<52x16xf32, #tpu.memory_space<vmem>>, vector<8x16xf32>
    %c0_210 = arith.constant 0 : index
    %c0_211 = arith.constant 0 : index
    %331 = vector.load %arg16[%c0_210, %c0_211] : memref<16x112xf32, #tpu.memory_space<vmem>>, vector<8x16xf32>
    tpu.vector_store %arg16[%c0_210, %c0_211], %330 {strides = array<i32>} : memref<16x112xf32, #tpu.memory_space<vmem>>, vector<8x16xf32>,
    %c3_212 = arith.constant 3 : index
    %c0_213 = arith.constant 0 : index
    %332 = tpu.strided_load %arg15[%c3_212, %c0_213] {strides = array<i32: 6, 1>} : memref<52x16xf32, #tpu.memory_space<vmem>>, vector<8x16xf32>
    %c8_214 = arith.constant 8 : index
    %c0_215 = arith.constant 0 : index
    %333 = vector.load %arg16[%c8_214, %c0_215] : memref<16x112xf32, #tpu.memory_space<vmem>>, vector<8x16xf32>
    tpu.vector_store %arg16[%c8_214, %c0_215], %332 {strides = array<i32>} : memref<16x112xf32, #tpu.memory_space<vmem>>, vector<8x16xf32>,
    %c1_216 = arith.constant 1 : index
    %c0_217 = arith.constant 0 : index
    %334 = tpu.strided_load %arg15[%c1_216, %c0_217] {strides = array<i32: 6, 1>} : memref<52x16xf32, #tpu.memory_space<vmem>>, vector<8x16xf32>
    %c0_218 = arith.constant 0 : index
    %c16_219 = arith.constant 16 : index
    %335 = vector.load %arg16[%c0_218, %c16_219] : memref<16x112xf32, #tpu.memory_space<vmem>>, vector<8x16xf32>
    tpu.vector_store %arg16[%c0_218, %c16_219], %334 {strides = array<i32>} : memref<16x112xf32, #tpu.memory_space<vmem>>, vector<8x16xf32>,
    %c4_220 = arith.constant 4 : index
    %c0_221 = arith.constant 0 : index
    %336 = tpu.strided_load %arg15[%c4_220, %c0_221] {strides = array<i32: 6, 1>} : memref<52x16xf32, #tpu.memory_space<vmem>>, vector<8x16xf32>
    %c8_222 = arith.constant 8 : index
    %c16_223 = arith.constant 16 : index
    %337 = vector.load %arg16[%c8_222, %c16_223] : memref<16x112xf32, #tpu.memory_space<vmem>>, vector<8x16xf32>
    tpu.vector_store %arg16[%c8_222, %c16_223], %336 {strides = array<i32>} : memref<16x112xf32, #tpu.memory_space<vmem>>, vector<8x16xf32>,
    %c2_224 = arith.constant 2 : index
    %c0_225 = arith.constant 0 : index
    %338 = tpu.strided_load %arg15[%c2_224, %c0_225] {strides = array<i32: 6, 1>} : memref<52x16xf32, #tpu.memory_space<vmem>>, vector<8x16xf32>
    %c0_226 = arith.constant 0 : index
    %c32_227 = arith.constant 32 : index
    %339 = vector.load %arg16[%c0_226, %c32_227] : memref<16x112xf32, #tpu.memory_space<vmem>>, vector<8x16xf32>
    tpu.vector_store %arg16[%c0_226, %c32_227], %338 {strides = array<i32>} : memref<16x112xf32, #tpu.memory_space<vmem>>, vector<8x16xf32>,
    %c5_228 = arith.constant 5 : index
    %c0_229 = arith.constant 0 : index
    %340 = tpu.strided_load %arg15[%c5_228, %c0_229] {strides = array<i32: 6, 1>} : memref<52x16xf32, #tpu.memory_space<vmem>>, vector<8x16xf32>
    %c8_230 = arith.constant 8 : index
    %c32_231 = arith.constant 32 : index
    %341 = vector.load %arg16[%c8_230, %c32_231] : memref<16x112xf32, #tpu.memory_space<vmem>>, vector<8x16xf32>
    tpu.vector_store %arg16[%c8_230, %c32_231], %340 {strides = array<i32>} : memref<16x112xf32, #tpu.memory_space<vmem>>, vector<8x16xf32>,
    %c3_232 = arith.constant 3 : index
    %c0_233 = arith.constant 0 : index
    %342 = tpu.strided_load %arg15[%c3_232, %c0_233] {strides = array<i32: 6, 1>} : memref<52x16xf32, #tpu.memory_space<vmem>>, vector<8x16xf32>
    %c0_234 = arith.constant 0 : index
    %c48_235 = arith.constant 48 : index
    %343 = vector.load %arg16[%c0_234, %c48_235] : memref<16x112xf32, #tpu.memory_space<vmem>>, vector<8x16xf32>
    tpu.vector_store %arg16[%c0_234, %c48_235], %342 {strides = array<i32>} : memref<16x112xf32, #tpu.memory_space<vmem>>, vector<8x16xf32>,
    %c6_236 = arith.constant 6 : index
    %c0_237 = arith.constant 0 : index
    %344 = tpu.strided_load %arg15[%c6_236, %c0_237] {strides = array<i32: 6, 1>} : memref<52x16xf32, #tpu.memory_space<vmem>>, vector<8x16xf32>
    %c8_238 = arith.constant 8 : index
    %c48_239 = arith.constant 48 : index
    %345 = vector.load %arg16[%c8_238, %c48_239] : memref<16x112xf32, #tpu.memory_space<vmem>>, vector<8x16xf32>
    tpu.vector_store %arg16[%c8_238, %c48_239], %344 {strides = array<i32>} : memref<16x112xf32, #tpu.memory_space<vmem>>, vector<8x16xf32>,
    %c4_240 = arith.constant 4 : index
    %c0_241 = arith.constant 0 : index
    %346 = tpu.strided_load %arg15[%c4_240, %c0_241] {strides = array<i32: 6, 1>} : memref<52x16xf32, #tpu.memory_space<vmem>>, vector<8x16xf32>
    %c0_242 = arith.constant 0 : index
    %c64_243 = arith.constant 64 : index
    %347 = vector.load %arg16[%c0_242, %c64_243] : memref<16x112xf32, #tpu.memory_space<vmem>>, vector<8x16xf32>
    tpu.vector_store %arg16[%c0_242, %c64_243], %346 {strides = array<i32>} : memref<16x112xf32, #tpu.memory_space<vmem>>, vector<8x16xf32>,
    %c7_244 = arith.constant 7 : index
    %c0_245 = arith.constant 0 : index
    %348 = tpu.strided_load %arg15[%c7_244, %c0_245] {strides = array<i32: 6, 1>} : memref<52x16xf32, #tpu.memory_space<vmem>>, vector<8x16xf32>
    %c8_246 = arith.constant 8 : index
    %c64_247 = arith.constant 64 : index
    %349 = vector.load %arg16[%c8_246, %c64_247] : memref<16x112xf32, #tpu.memory_space<vmem>>, vector<8x16xf32>
    tpu.vector_store %arg16[%c8_246, %c64_247], %348 {strides = array<i32>} : memref<16x112xf32, #tpu.memory_space<vmem>>, vector<8x16xf32>,
    %c5_248 = arith.constant 5 : index
    %c0_249 = arith.constant 0 : index
    %350 = tpu.strided_load %arg15[%c5_248, %c0_249] {strides = array<i32: 6, 1>} : memref<52x16xf32, #tpu.memory_space<vmem>>, vector<8x16xf32>
    %c0_250 = arith.constant 0 : index
    %c80_251 = arith.constant 80 : index
    %351 = vector.load %arg16[%c0_250, %c80_251] : memref<16x112xf32, #tpu.memory_space<vmem>>, vector<8x16xf32>
    tpu.vector_store %arg16[%c0_250, %c80_251], %350 {strides = array<i32>} : memref<16x112xf32, #tpu.memory_space<vmem>>, vector<8x16xf32>,
    %c8_252 = arith.constant 8 : index
    %c0_253 = arith.constant 0 : index
    %352 = tpu.strided_load %arg15[%c8_252, %c0_253] {strides = array<i32: 6, 1>} : memref<52x16xf32, #tpu.memory_space<vmem>>, vector<8x16xf32>
    %c8_254 = arith.constant 8 : index
    %c80_255 = arith.constant 80 : index
    %353 = vector.load %arg16[%c8_254, %c80_255] : memref<16x112xf32, #tpu.memory_space<vmem>>, vector<8x16xf32>
    tpu.vector_store %arg16[%c8_254, %c80_255], %352 {strides = array<i32>} : memref<16x112xf32, #tpu.memory_space<vmem>>, vector<8x16xf32>,
    %c6_256 = arith.constant 6 : index
    %c0_257 = arith.constant 0 : index
    %354 = tpu.strided_load %arg15[%c6_256, %c0_257] {strides = array<i32: 6, 1>} : memref<52x16xf32, #tpu.memory_space<vmem>>, vector<8x16xf32>
    %c0_258 = arith.constant 0 : index
    %c96_259 = arith.constant 96 : index
    %355 = vector.load %arg16[%c0_258, %c96_259] : memref<16x112xf32, #tpu.memory_space<vmem>>, vector<8x16xf32>
    tpu.vector_store %arg16[%c0_258, %c96_259], %354 {strides = array<i32>} : memref<16x112xf32, #tpu.memory_space<vmem>>, vector<8x16xf32>,
    %c9_260 = arith.constant 9 : index
    %c0_261 = arith.constant 0 : index
    %356 = tpu.strided_load %arg15[%c9_260, %c0_261] {strides = array<i32: 6, 1>} : memref<52x16xf32, #tpu.memory_space<vmem>>, vector<8x16xf32>
    %c8_262 = arith.constant 8 : index
    %c96_263 = arith.constant 96 : index
    %357 = vector.load %arg16[%c8_262, %c96_263] : memref<16x112xf32, #tpu.memory_space<vmem>>, vector<8x16xf32>
    tpu.vector_store %arg16[%c8_262, %c96_263], %356 {strides = array<i32>} : memref<16x112xf32, #tpu.memory_space<vmem>>, vector<8x16xf32>,
    %c0_264 = arith.constant 0 : index
    %c0_265 = arith.constant 0 : index
    %358 = vector.load %arg16[%c0_264, %c0_265] : memref<16x112xf32, #tpu.memory_space<vmem>>, vector<16x112xf32>
    %359 = arith.truncf %358 : vector<16x112xf32> to vector<16x112xbf16>
    %cst_266 = arith.constant dense<0.000000e+00> : vector<16x64xf32>
    %360 = tpu.matmul %359, %6, %cst_266 {dimension_numbers = #tpu.dot_dimension_numbers<[1], [0], [0], [1], [0, 0, 1, 1], [], []>} : vector<16x112xbf16>, vector<112x64xbf16>, vector<16x64xf32> -> vector<16x64xf32>
    %361 = vector.broadcast %7 : vector<1x64xf32> to vector<16x64xf32>
    %362 = arith.mulf %360, %361 : vector<16x64xf32>
    %363 = vector.broadcast %8 : vector<1x64xf32> to vector<16x64xf32>
    %364 = arith.addf %362, %363 : vector<16x64xf32>
    %cst_267 = arith.constant 0.000000e+00 : f32
    %365 = vector.broadcast %cst_267 : f32 to vector<16x64xf32>
    %366 = arith.maximumf %364, %365 : vector<16x64xf32>
    %367 = vector.extract_strided_slice %366 {offsets = [0, 0], sizes = [8, 64], strides = [1, 1]} : vector<16x64xf32> to vector<8x64xf32>
    %368 = vector.extract_strided_slice %366 {offsets = [8, 0], sizes = [8, 64], strides = [1, 1]} : vector<16x64xf32> to vector<8x64xf32>
    %369 = arith.maximumf %367, %368 : vector<8x64xf32>
    %c1_268 = arith.constant 1 : index
    %c0_269 = arith.constant 0 : index
    %c0_270 = arith.constant 0 : index
    %370 = vector.load %arg12[%c1_268, %c0_269, %c0_270] : memref<2x8x64xf32, #tpu.memory_space<vmem>>, vector<1x8x64xf32>
    %371 = vector.shape_cast %370 : vector<1x8x64xf32> to vector<8x64xf32>
    %372 = vector.shape_cast %369 : vector<8x64xf32> to vector<1x8x64xf32>
    tpu.vector_store %arg12[%c1_268, %c0_269, %c0_270], %372 {strides = array<i32>} : memref<2x8x64xf32, #tpu.memory_space<vmem>>, vector<1x8x64xf32>,
    return
  }
  func.func @transform_0(%arg0: i32) -> (i32, i32, i32) {
    %c0_i32 = arith.constant 0 : i32
    %c0_i32_0 = arith.constant 0 : i32
    %c0_i32_1 = arith.constant 0 : i32
    return %arg0, %c0_i32, %c0_i32_0 : i32, i32, i32
  }
  func.func @transform_1(%arg0: i32) -> (i32, i32, i32) {
    %c0_i32 = arith.constant 0 : i32
    %c0_i32_0 = arith.constant 0 : i32
    %c0_i32_1 = arith.constant 0 : i32
    return %arg0, %c0_i32, %c0_i32_0 : i32, i32, i32
  }
  func.func @transform_2(%arg0: i32) -> (i32, i32) {
    %c0_i32 = arith.constant 0 : i32
    %c0_i32_0 = arith.constant 0 : i32
    %c0_i32_1 = arith.constant 0 : i32
    return %c0_i32, %c0_i32_0 : i32, i32
  }
  func.func @transform_3(%arg0: i32) -> (i32, i32) {
    %c0_i32 = arith.constant 0 : i32
    %c0_i32_0 = arith.constant 0 : i32
    %c0_i32_1 = arith.constant 0 : i32
    return %c0_i32, %c0_i32_0 : i32, i32
  }
  func.func @transform_4(%arg0: i32) -> (i32, i32) {
    %c0_i32 = arith.constant 0 : i32
    %c0_i32_0 = arith.constant 0 : i32
    %c0_i32_1 = arith.constant 0 : i32
    return %c0_i32, %c0_i32_0 : i32, i32
  }
  func.func @transform_5(%arg0: i32) -> (i32, i32) {
    %c0_i32 = arith.constant 0 : i32
    %c0_i32_0 = arith.constant 0 : i32
    %c0_i32_1 = arith.constant 0 : i32
    return %c0_i32, %c0_i32_0 : i32, i32
  }
  func.func @transform_6(%arg0: i32) -> (i32, i32) {
    %c0_i32 = arith.constant 0 : i32
    %c0_i32_0 = arith.constant 0 : i32
    %c0_i32_1 = arith.constant 0 : i32
    return %c0_i32, %c0_i32_0 : i32, i32
  }
  func.func @transform_7(%arg0: i32) -> (i32, i32) {
    %c0_i32 = arith.constant 0 : i32
    %c0_i32_0 = arith.constant 0 : i32
    %c0_i32_1 = arith.constant 0 : i32
    return %c0_i32, %c0_i32_0 : i32, i32
  }
  func.func @transform_8(%arg0: i32) -> (i32, i32) {
    %c0_i32 = arith.constant 0 : i32
    %c0_i32_0 = arith.constant 0 : i32
    %c0_i32_1 = arith.constant 0 : i32
    return %c0_i32, %c0_i32_0 : i32, i32
  }
  func.func @transform_9(%arg0: i32) -> (i32, i32) {
    %c0_i32 = arith.constant 0 : i32
    %c0_i32_0 = arith.constant 0 : i32
    %c0_i32_1 = arith.constant 0 : i32
    return %c0_i32, %c0_i32_0 : i32, i32
  }
  func.func @transform_10(%arg0: i32) -> (i32, i32) {
    %c0_i32 = arith.constant 0 : i32
    %c0_i32_0 = arith.constant 0 : i32
    %c0_i32_1 = arith.constant 0 : i32
    return %c0_i32, %c0_i32_0 : i32, i32
  }
  func.func @transform_11(%arg0: i32) -> (i32, i32, i32) {
    %c0_i32 = arith.constant 0 : i32
    %c0_i32_0 = arith.constant 0 : i32
    %c0_i32_1 = arith.constant 0 : i32
    return %arg0, %c0_i32, %c0_i32_0 : i32, i32, i32
  }
}

module attributes {stable_mosaic.version = 11 : i64} {
  func.func @_head_kernel(%arg0: memref<4x512xf32, #tpu.memory_space<vmem>>, %arg1: memref<512x256xbf16, #tpu.memory_space<vmem>>, %arg2: memref<1x256xf32, #tpu.memory_space<vmem>>, %arg3: memref<256x512xbf16, #tpu.memory_space<vmem>>, %arg4: memref<1x512xf32, #tpu.memory_space<vmem>>, %arg5: memref<1x512xf32, #tpu.memory_space<vmem>>, %arg6: memref<512x256xbf16, #tpu.memory_space<vmem>>, %arg7: memref<1x256xf32, #tpu.memory_space<vmem>>, %arg8: memref<4x256xf32, #tpu.memory_space<vmem>>, %arg9: memref<4x256xf32, #tpu.memory_space<vmem>>) attributes {dimension_semantics = [], scalar_prefetch = 0 : i64, scratch_operands = 0 : i64, tpu.core_type = #tpu.core_type<tc>} {
    %c0 = arith.constant 0 : index
    %c0_0 = arith.constant 0 : index
    %0 = vector.load %arg0[%c0, %c0_0] : memref<4x512xf32, #tpu.memory_space<vmem>>, vector<4x512xf32>
    %c0_1 = arith.constant 0 : index
    %c0_2 = arith.constant 0 : index
    %1 = vector.load %arg1[%c0_1, %c0_2] : memref<512x256xbf16, #tpu.memory_space<vmem>>, vector<512x256xbf16>
    %2 = arith.extf %1 : vector<512x256xbf16> to vector<512x256xf32>
    %cst = arith.constant dense<0.000000e+00> : vector<4x256xf32>
    %3 = tpu.matmul %0, %2, %cst {dimension_numbers = #tpu.dot_dimension_numbers<[1], [0], [0], [1], [0, 0, 1, 1], [], []>} : vector<4x512xf32>, vector<512x256xf32>, vector<4x256xf32> -> vector<4x256xf32>
    %c0_3 = arith.constant 0 : index
    %c0_4 = arith.constant 0 : index
    %4 = vector.load %arg2[%c0_3, %c0_4] : memref<1x256xf32, #tpu.memory_space<vmem>>, vector<1x256xf32>
    %5 = vector.broadcast %4 : vector<1x256xf32> to vector<4x256xf32>
    %6 = arith.addf %3, %5 : vector<4x256xf32>
    %c0_5 = arith.constant 0 : index
    %c0_6 = arith.constant 0 : index
    %7 = vector.load %arg3[%c0_5, %c0_6] : memref<256x512xbf16, #tpu.memory_space<vmem>>, vector<256x512xbf16>
    %8 = arith.extf %7 : vector<256x512xbf16> to vector<256x512xf32>
    %cst_7 = arith.constant dense<0.000000e+00> : vector<4x512xf32>
    %9 = tpu.matmul %6, %8, %cst_7 {dimension_numbers = #tpu.dot_dimension_numbers<[1], [0], [0], [1], [0, 0, 1, 1], [], []>} : vector<4x256xf32>, vector<256x512xf32>, vector<4x512xf32> -> vector<4x512xf32>
    %c0_8 = arith.constant 0 : index
    %c0_9 = arith.constant 0 : index
    %10 = vector.load %arg4[%c0_8, %c0_9] : memref<1x512xf32, #tpu.memory_space<vmem>>, vector<1x512xf32>
    %11 = vector.broadcast %10 : vector<1x512xf32> to vector<4x512xf32>
    %12 = arith.mulf %9, %11 : vector<4x512xf32>
    %c0_10 = arith.constant 0 : index
    %c0_11 = arith.constant 0 : index
    %13 = vector.load %arg5[%c0_10, %c0_11] : memref<1x512xf32, #tpu.memory_space<vmem>>, vector<1x512xf32>
    %14 = vector.broadcast %13 : vector<1x512xf32> to vector<4x512xf32>
    %15 = arith.addf %12, %14 : vector<4x512xf32>
    %cst_12 = arith.constant 0.000000e+00 : f32
    %16 = vector.broadcast %cst_12 : f32 to vector<4x512xf32>
    %17 = arith.maximumf %15, %16 : vector<4x512xf32>
    %c0_13 = arith.constant 0 : index
    %c0_14 = arith.constant 0 : index
    %18 = vector.load %arg6[%c0_13, %c0_14] : memref<512x256xbf16, #tpu.memory_space<vmem>>, vector<512x256xbf16>
    %19 = arith.extf %18 : vector<512x256xbf16> to vector<512x256xf32>
    %cst_15 = arith.constant dense<0.000000e+00> : vector<4x256xf32>
    %20 = tpu.matmul %17, %19, %cst_15 {dimension_numbers = #tpu.dot_dimension_numbers<[1], [0], [0], [1], [0, 0, 1, 1], [], []>} : vector<4x512xf32>, vector<512x256xf32>, vector<4x256xf32> -> vector<4x256xf32>
    %c0_16 = arith.constant 0 : index
    %c0_17 = arith.constant 0 : index
    %21 = vector.load %arg7[%c0_16, %c0_17] : memref<1x256xf32, #tpu.memory_space<vmem>>, vector<1x256xf32>
    %22 = vector.broadcast %21 : vector<1x256xf32> to vector<4x256xf32>
    %23 = arith.addf %20, %22 : vector<4x256xf32>
    %24 = arith.mulf %6, %6 : vector<4x256xf32>
    %cst_18 = arith.constant dense<0.000000e+00> : vector<4xf32>
    %25 = vector.multi_reduction <add>, %24, %cst_18 [1] : vector<4x256xf32> to vector<4xf32>
    %26 = vector.shape_cast %25 : vector<4xf32> to vector<4x1xf32>
    %27 = math.rsqrt %26 : vector<4x1xf32>
    %cst_19 = arith.constant 9.99999995E+11 : f32
    %28 = vector.broadcast %cst_19 : f32 to vector<4x1xf32>
    %29 = arith.minimumf %27, %28 : vector<4x1xf32>
    %30 = vector.broadcast %29 : vector<4x1xf32> to vector<4x256xf32>
    %31 = arith.mulf %6, %30 : vector<4x256xf32>
    %c0_20 = arith.constant 0 : index
    %c0_21 = arith.constant 0 : index
    %32 = vector.load %arg8[%c0_20, %c0_21] : memref<4x256xf32, #tpu.memory_space<vmem>>, vector<4x256xf32>
    tpu.vector_store %arg8[%c0_20, %c0_21], %31 {strides = array<i32>} : memref<4x256xf32, #tpu.memory_space<vmem>>, vector<4x256xf32>,
    %33 = arith.mulf %23, %23 : vector<4x256xf32>
    %cst_22 = arith.constant dense<0.000000e+00> : vector<4xf32>
    %34 = vector.multi_reduction <add>, %33, %cst_22 [1] : vector<4x256xf32> to vector<4xf32>
    %35 = vector.shape_cast %34 : vector<4xf32> to vector<4x1xf32>
    %36 = math.rsqrt %35 : vector<4x1xf32>
    %cst_23 = arith.constant 9.99999995E+11 : f32
    %37 = vector.broadcast %cst_23 : f32 to vector<4x1xf32>
    %38 = arith.minimumf %36, %37 : vector<4x1xf32>
    %39 = vector.broadcast %38 : vector<4x1xf32> to vector<4x256xf32>
    %40 = arith.mulf %23, %39 : vector<4x256xf32>
    %c0_24 = arith.constant 0 : index
    %c0_25 = arith.constant 0 : index
    %41 = vector.load %arg9[%c0_24, %c0_25] : memref<4x256xf32, #tpu.memory_space<vmem>>, vector<4x256xf32>
    tpu.vector_store %arg9[%c0_24, %c0_25], %40 {strides = array<i32>} : memref<4x256xf32, #tpu.memory_space<vmem>>, vector<4x256xf32>,
    return
  }
}

</mosaic_0001>

<bundles_post_ra>
// kernel: cnn_forward.3
= control target key start
LH: loop header
LB: loop body
LE: loop exit
PB: predicated region body
PF: predicated region fallthrough
CT: control target
= control target key end

     0   :  { %vm1123_vm0 = vcmask 1043456   ;;  %s1854_s1 = inlined_call_operand.vmem [shape: bf16[512,256], index: 1, kind: input, shape index: {}]   ;;  %s1855_s0 = inlined_call_operand.vmem [shape: f32[4,512], index: 0, kind: input, shape index: {}]   ;;  %s1856_s3 = inlined_call_operand.vmem [shape: bf16[256,512], index: 3, kind: input, shape index: {}]   ;;  %s1857_s6 = inlined_call_operand.vmem [shape: bf16[512,256], index: 6, kind: input, shape index: {}]   ;;  %s1858_s2 = inlined_call_operand.vmem [shape: f32[1,256], index: 2, kind: input, shape index: {}]   ;;  %s1859_s8 = inlined_call_operand.vmem [shape: f32[4,256], index: 8, kind: output, shape index: {0}]   ;;  %s1860_s4 = inlined_call_operand.vmem [shape: f32[1,512], index: 4, kind: input, shape index: {}]   ;;  %s1861_s5 = inlined_call_operand.vmem [shape: f32[1,512], index: 5, kind: input, shape index: {}]   ;;  %s1862_s7 = inlined_call_operand.vmem [shape: f32[1,256], index: 7, kind: input, shape index: {}]   ;;  %s1863_s9 = inlined_call_operand.vmem [shape: f32[4,256], index: 9, kind: output, shape index: {1}]  }
   0x1   :  { %v48_v0 = vld [vmem:[%s1854_s1 + $0x78] sm:$0xff]  ;;  %v47_v2 = vld [vmem:[%s1854_s1 + $0x70] sm:$0xff]  ;;  %v46_v8 = vld [vmem:[%s1854_s1 + $0x68] sm:$0xff] }
   0x2   :  { %v80_v1 = vld [vmem:[%s1854_s1 + $0x178] sm:$0xff]  ;;  %v128_v3 = vunpack.c.h.bf16 %v48_v0  ;;  %v127_v5 = vunpack.c.l.bf16 %v48_v0  ;;  %v79_v7 = vld [vmem:[%s1854_s1 + $0x170] sm:$0xff]  ;;  %v78_v9 = vld [vmem:[%s1854_s1 + $0x168] sm:$0xff]  ;;  %v126_v10 = vunpack.c.h.bf16 %v47_v2  ;;  %v125_v12 = vunpack.c.l.bf16 %v47_v2 }
   0x3   :  { %v192_v4 = vunpack.c.h.bf16 %v80_v1  ;;  %v191_v6 = vunpack.c.l.bf16 %v80_v1  ;;  %v190_v11 = vunpack.c.h.bf16 %v79_v7  ;;  %v189_v13 = vunpack.c.l.bf16 %v79_v7  ;;  %v45_v14 = vld [vmem:[%s1854_s1 + $0x60] sm:$0xff]  ;;  %v44_v20 = vld [vmem:[%s1854_s1 + $0x58] sm:$0xff]  ;;  %v43_v26 = vld [vmem:[%s1854_s1 + $0x50] sm:$0xff] }
   0x4   :  { %v77_v15 = vld [vmem:[%s1854_s1 + $0x160] sm:$0xff]  ;;  %243 = vmatprep.subr.mxu0 %v128_v3  ;;  %v124_v16 = vunpack.c.h.bf16 %v46_v8  ;;  %v188_v17 = vunpack.c.h.bf16 %v78_v9  ;;  %v123_v18 = vunpack.c.l.bf16 %v46_v8  ;;  %v187_v19 = vunpack.c.l.bf16 %v78_v9  ;;  %v76_v21 = vld [vmem:[%s1854_s1 + $0x158] sm:$0xff]  ;;  %v75_v27 = vld [vmem:[%s1854_s1 + $0x150] sm:$0xff] }
   0x5   :  { %314 = vmatprep.subr.mxu1 %v192_v4  ;;  %244 = vmatpush1.msra.mxu0 %v127_v5  ;;  %v122_v22 = vunpack.c.h.bf16 %v45_v14  ;;  %v186_v23 = vunpack.c.h.bf16 %v77_v15  ;;  %v121_v24 = vunpack.c.l.bf16 %v45_v14  ;;  %v185_v25 = vunpack.c.l.bf16 %v77_v15  ;;  %v42_v32 = vld [vmem:[%s1854_s1 + $0x48] sm:$0xff]  ;;  %v41_v38 = vld [vmem:[%s1854_s1 + $0x40] sm:$0xff]  ;;  %v40_v44 = vld [vmem:[%s1854_s1 + $0x38] sm:$0xff] }
   0x6   :  { %315 = vmatpush1.msra.mxu1 %v191_v6  ;;  %245 = vmatprep.subr.mxu0 %v126_v10  ;;  %v120_v28 = vunpack.c.h.bf16 %v44_v20  ;;  %v184_v29 = vunpack.c.h.bf16 %v76_v21  ;;  %v119_v30 = vunpack.c.l.bf16 %v44_v20  ;;  %v183_v31 = vunpack.c.l.bf16 %v76_v21  ;;  %v74_v33 = vld [vmem:[%s1854_s1 + $0x148] sm:$0xff]  ;;  %v73_v39 = vld [vmem:[%s1854_s1 + $0x140] sm:$0xff]  ;;  %v72_v45 = vld [vmem:[%s1854_s1 + $0x138] sm:$0xff] }
   0x7   :  { %316 = vmatprep.subr.mxu1 %v190_v11  ;;  %246 = vmatpush1.msra.mxu0 %v125_v12  ;;  %v118_v34 = vunpack.c.h.bf16 %v43_v26  ;;  %v182_v35 = vunpack.c.h.bf16 %v75_v27  ;;  %v117_v36 = vunpack.c.l.bf16 %v43_v26  ;;  %v181_v37 = vunpack.c.l.bf16 %v75_v27  ;;  %v39_v50 = vld [vmem:[%s1854_s1 + $0x30] sm:$0xff]  ;;  %v38_v56 = vld [vmem:[%s1854_s1 + $0x28] sm:$0xff]  ;;  %v37_v62 = vld [vmem:[%s1854_s1 + $0x20] sm:$0xff] }
   0x8   :  { %317 = vmatpush1.msra.mxu1 %v189_v13  ;;  %247 = vmatprep.subr.mxu0 %v124_v16  ;;  %v116_v40 = vunpack.c.h.bf16 %v42_v32  ;;  %v180_v41 = vunpack.c.h.bf16 %v74_v33  ;;  %v115_v42 = vunpack.c.l.bf16 %v42_v32  ;;  %v179_v43 = vunpack.c.l.bf16 %v74_v33  ;;  %v71_v51 = vld [vmem:[%s1854_s1 + $0x130] sm:$0xff]  ;;  %v70_v57 = vld [vmem:[%s1854_s1 + $0x128] sm:$0xff]  ;;  %v69_v63 = vld [vmem:[%s1854_s1 + $0x120] sm:$0xff] }
   0x9   :  { %318 = vmatprep.subr.mxu1 %v188_v17  ;;  %248 = vmatpush1.msra.mxu0 %v123_v18  ;;  %v114_v46 = vunpack.c.h.bf16 %v41_v38  ;;  %v178_v47 = vunpack.c.h.bf16 %v73_v39  ;;  %v113_v48 = vunpack.c.l.bf16 %v41_v38  ;;  %v177_v49 = vunpack.c.l.bf16 %v73_v39  ;;  %v36_v4 = vld [vmem:[%s1854_s1 + $0x18] sm:$0xff]  ;;  %v35_v10 = vld [vmem:[%s1854_s1 + $0x10] sm:$0xff]  ;;  %v34_v16 = vld [vmem:[%s1854_s1 + $0x8] sm:$0xff] }
   0xa   :  { %319 = vmatpush1.msra.mxu1 %v187_v19  ;;  %249 = vmatprep.subr.mxu0 %v122_v22  ;;  %v112_v52 = vunpack.c.h.bf16 %v40_v44  ;;  %v176_v53 = vunpack.c.h.bf16 %v72_v45  ;;  %v111_v54 = vunpack.c.l.bf16 %v40_v44  ;;  %v175_v55 = vunpack.c.l.bf16 %v72_v45  ;;  %v68_v5 = vld [vmem:[%s1854_s1 + $0x118] sm:$0xff]  ;;  %v67_v11 = vld [vmem:[%s1854_s1 + $0x110] sm:$0xff]  ;;  %v66_v17 = vld [vmem:[%s1854_s1 + $0x108] sm:$0xff] }
   0xb   :  { %320 = vmatprep.subr.mxu1 %v186_v23  ;;  %250 = vmatpush1.msra.mxu0 %v121_v24  ;;  %v110_v58 = vunpack.c.h.bf16 %v39_v50  ;;  %v174_v59 = vunpack.c.h.bf16 %v71_v51  ;;  %v109_v60 = vunpack.c.l.bf16 %v39_v50  ;;  %v173_v61 = vunpack.c.l.bf16 %v71_v51  ;;  %v33_v22 = vld [vmem:[%s1854_s1] sm:$0xff] }
   0xc   :  { %321 = vmatpush1.msra.mxu1 %v185_v25  ;;  %251 = vmatprep.subr.mxu0 %v120_v28  ;;  %v108_v0 = vunpack.c.h.bf16 %v38_v56  ;;  %v172_v1 = vunpack.c.h.bf16 %v70_v57  ;;  %v107_v2 = vunpack.c.l.bf16 %v38_v56  ;;  %v171_v3 = vunpack.c.l.bf16 %v70_v57  ;;  %v65_v23 = vld [vmem:[%s1854_s1 + $0x100] sm:$0xff]  ;;  %v64_v28 = vld [vmem:[%s1854_s1 + $0xf8] sm:$0xff] }
   0xd   :  { %322 = vmatprep.subr.mxu1 %v184_v29  ;;  %252 = vmatpush1.msra.mxu0 %v119_v30  ;;  %v106_v6 = vunpack.c.h.bf16 %v37_v62  ;;  %v170_v7 = vunpack.c.h.bf16 %v69_v63  ;;  %v105_v8 = vunpack.c.l.bf16 %v37_v62  ;;  %v169_v9 = vunpack.c.l.bf16 %v69_v63  ;;  %v96_v29 = vld [vmem:[%s1854_s1 + $0x1f8] sm:$0xff] }
   0xe   :  { %323 = vmatpush1.msra.mxu1 %v183_v31  ;;  %253 = vmatprep.subr.mxu0 %v118_v34  ;;  %v104_v12 = vunpack.c.h.bf16 %v36_v4  ;;  %v168_v13 = vunpack.c.h.bf16 %v68_v5  ;;  %v103_v14 = vunpack.c.l.bf16 %v36_v4  ;;  %v167_v15 = vunpack.c.l.bf16 %v68_v5  ;;  %v63_v34 = vld [vmem:[%s1854_s1 + $0xf0] sm:$0xff] }
   0xf   :  { %324 = vmatprep.subr.mxu1 %v182_v35  ;;  %254 = vmatpush1.msra.mxu0 %v117_v36  ;;  %v102_v18 = vunpack.c.h.bf16 %v35_v10  ;;  %v166_v19 = vunpack.c.h.bf16 %v67_v11  ;;  %v101_v20 = vunpack.c.l.bf16 %v35_v10  ;;  %v165_v21 = vunpack.c.l.bf16 %v67_v11  ;;  %v95_v35 = vld [vmem:[%s1854_s1 + $0x1f0] sm:$0xff] }
  0x10   :  { %325 = vmatpush1.msra.mxu1 %v181_v37  ;;  %255 = vmatprep.subr.mxu0 %v116_v40  ;;  %v100_v24 = vunpack.c.h.bf16 %v34_v16  ;;  %v164_v25 = vunpack.c.h.bf16 %v66_v17  ;;  %v99_v26 = vunpack.c.l.bf16 %v34_v16  ;;  %v163_v27 = vunpack.c.l.bf16 %v66_v17  ;;  %v62_v40 = vld [vmem:[%s1854_s1 + $0xe8] sm:$0xff] }
  0x11   :  { %326 = vmatprep.subr.mxu1 %v180_v41  ;;  %256 = vmatpush1.msra.mxu0 %v115_v42  ;;  %v98_v30 = vunpack.c.h.bf16 %v33_v22  ;;  %v162_v31 = vunpack.c.h.bf16 %v65_v23  ;;  %v97_v32 = vunpack.c.l.bf16 %v33_v22  ;;  %v161_v33 = vunpack.c.l.bf16 %v65_v23  ;;  %v94_v41 = vld [vmem:[%s1854_s1 + $0x1e8] sm:$0xff] }
  0x12   :  { %327 = vmatpush1.msra.mxu1 %v179_v43  ;;  %257 = vmatprep.subr.mxu0 %v114_v46  ;;  %v160_v36 = vunpack.c.h.bf16 %v64_v28  ;;  %v224_v37 = vunpack.c.h.bf16 %v96_v29  ;;  %v159_v38 = vunpack.c.l.bf16 %v64_v28  ;;  %v223_v39 = vunpack.c.l.bf16 %v96_v29  ;;  %v61_v46 = vld [vmem:[%s1854_s1 + $0xe0] sm:$0xff] }
  0x13   :  { %328 = vmatprep.subr.mxu1 %v178_v47  ;;  %258 = vmatpush1.msra.mxu0 %v113_v48  ;;  %v158_v42 = vunpack.c.h.bf16 %v63_v34  ;;  %v222_v43 = vunpack.c.h.bf16 %v95_v35  ;;  %v157_v44 = vunpack.c.l.bf16 %v63_v34  ;;  %v221_v45 = vunpack.c.l.bf16 %v95_v35  ;;  %v93_v47 = vld [vmem:[%s1854_s1 + $0x1e0] sm:$0xff] }
  0x14   :  { %329 = vmatpush1.msra.mxu1 %v177_v49  ;;  %259 = vmatprep.subr.mxu0 %v112_v52  ;;  %v156_v48 = vunpack.c.h.bf16 %v62_v40  ;;  %v220_v49 = vunpack.c.h.bf16 %v94_v41  ;;  %v155_v50 = vunpack.c.l.bf16 %v62_v40  ;;  %v219_v51 = vunpack.c.l.bf16 %v94_v41  ;;  %v60_v52 = vld [vmem:[%s1854_s1 + $0xd8] sm:$0xff] }
  0x15   :  { %330 = vmatprep.subr.mxu1 %v176_v53  ;;  %260 = vmatpush1.msra.mxu0 %v111_v54  ;;  %v92_v53 = vld [vmem:[%s1854_s1 + $0x1d8] sm:$0xff]  ;;  %v154_v54 = vunpack.c.h.bf16 %v61_v46  ;;  %v153_v56 = vunpack.c.l.bf16 %v61_v46  ;;  %v217_v57 = vunpack.c.l.bf16 %v93_v47  ;;  %v151_v62 = vunpack.c.l.bf16 %v60_v52 }
  0x16   :  { %331 = vmatpush1.msra.mxu1 %v175_v55  ;;  %261 = vmatprep.subr.mxu0 %v110_v58  ;;  %v218_v55 = vunpack.c.h.bf16 %v93_v47  ;;  %v59_v58 = vld [vmem:[%s1854_s1 + $0xd0] sm:$0xff]  ;;  %v215_v63 = vunpack.c.l.bf16 %v92_v53 }
  0x17   :  { %332 = vmatprep.subr.mxu1 %v174_v59  ;;  %262 = vmatpush1.msra.mxu0 %v109_v60  ;;  %v91_v59 = vld [vmem:[%s1854_s1 + $0x1d0] sm:$0xff]  ;;  %v152_v60 = vunpack.c.h.bf16 %v60_v52  ;;  %v149_v4 = vunpack.c.l.bf16 %v59_v58 }
  0x18   :  { %333 = vmatpush1.msra.mxu1 %v173_v61  ;;  %263 = vmatprep.subr.mxu0 %v108_v0  ;;  %v216_v61 = vunpack.c.h.bf16 %v92_v53  ;;  %v58_v0 = vld [vmem:[%s1854_s1 + $0xc8] sm:$0xff]  ;;  %v213_v5 = vunpack.c.l.bf16 %v91_v59 }
  0x19   :  { %334 = vmatprep.subr.mxu1 %v172_v1  ;;  %264 = vmatpush1.msra.mxu0 %v107_v2  ;;  %v90_v1 = vld [vmem:[%s1854_s1 + $0x1c8] sm:$0xff]  ;;  %v150_v2 = vunpack.c.h.bf16 %v59_v58  ;;  %v147_v10 = vunpack.c.l.bf16 %v58_v0  ;;  %v31_v58 = vld [vmem:[%s1855_s0] sm:$0xff] }
  0x1a   :  { %335 = vmatpush1.msra.mxu1 %v171_v3  ;;  %265 = vmatprep.subr.mxu0 %v106_v6  ;;  %v214_v3 = vunpack.c.h.bf16 %v91_v59  ;;  %v57_v6 = vld [vmem:[%s1854_s1 + $0xc0] sm:$0xff]  ;;  %v211_v11 = vunpack.c.l.bf16 %v90_v1 }
  0x1b   :  { %336 = vmatprep.subr.mxu1 %v170_v7  ;;  %266 = vmatpush1.msra.mxu0 %v105_v8  ;;  %v89_v7 = vld [vmem:[%s1854_s1 + $0x1c0] sm:$0xff]  ;;  %v148_v8 = vunpack.c.h.bf16 %v58_v0  ;;  %v145_v16 = vunpack.c.l.bf16 %v57_v6 }
  0x1c   :  { %337 = vmatpush1.msra.mxu1 %v169_v9  ;;  %267 = vmatprep.subr.mxu0 %v104_v12  ;;  %v212_v9 = vunpack.c.h.bf16 %v90_v1  ;;  %v56_v12 = vld [vmem:[%s1854_s1 + $0xb8] sm:$0xff]  ;;  %v209_v17 = vunpack.c.l.bf16 %v89_v7  ;;  %v239_v1 = vcombine.high %v31_v58, %v31_v58 }
  0x1d   :  { %338 = vmatprep.subr.mxu1 %v168_v13  ;;  %268 = vmatpush1.msra.mxu0 %v103_v14  ;;  %v88_v13 = vld [vmem:[%s1854_s1 + $0x1b8] sm:$0xff]  ;;  %v146_v14 = vunpack.c.h.bf16 %v57_v6  ;;  %v143_v22 = vunpack.c.l.bf16 %v56_v12  ;;  %v413_v6 = vld [vmem:[%s1856_s3 + $0xe0] sm:$0xff] }
  0x1e   :  { %339 = vmatpush1.msra.mxu1 %v167_v15  ;;  %269 = vmatprep.subr.mxu0 %v102_v18  ;;  %v210_v15 = vunpack.c.h.bf16 %v89_v7  ;;  %v55_v18 = vld [vmem:[%s1854_s1 + $0xb0] sm:$0xff]  ;;  %v207_v23 = vunpack.c.l.bf16 %v88_v13  ;;  %v414_v7 = vld [vmem:[%s1856_s3 + $0xe8] sm:$0xff] }
  0x1f   :  { %340 = vmatprep.subr.mxu1 %v166_v19  ;;  %270 = vmatpush1.msra.mxu0 %v101_v20  ;;  %v87_v19 = vld [vmem:[%s1854_s1 + $0x1b0] sm:$0xff]  ;;  %v144_v20 = vunpack.c.h.bf16 %v56_v12  ;;  %v141_v28 = vunpack.c.l.bf16 %v55_v18 }
  0x20   :  { %341 = vmatpush1.msra.mxu1 %v165_v21  ;;  %271 = vmatprep.subr.mxu0 %v100_v24  ;;  %v208_v21 = vunpack.c.h.bf16 %v88_v13  ;;  %v54_v24 = vld [vmem:[%s1854_s1 + $0xa8] sm:$0xff]  ;;  %v205_v29 = vunpack.c.l.bf16 %v87_v19  ;;  %v411_v12 = vld [vmem:[%s1856_s3 + $0xd0] sm:$0xff]  ;;  %v412_v13 = vld [vmem:[%s1856_s3 + $0xd8] sm:$0xff] }
  0x21   :  { %342 = vmatprep.subr.mxu1 %v164_v25  ;;  %272 = vmatpush1.msra.mxu0 %v99_v26  ;;  %v86_v25 = vld [vmem:[%s1854_s1 + $0x1a8] sm:$0xff]  ;;  %v142_v26 = vunpack.c.h.bf16 %v55_v18  ;;  %v139_v34 = vunpack.c.l.bf16 %v54_v24  ;;  %v409_v18 = vld [vmem:[%s1856_s3 + $0xc0] sm:$0xff] }
  0x22   :  { %343 = vmatpush1.msra.mxu1 %v163_v27  ;;  %273 = vmatprep.subr.mxu0 %v98_v30  ;;  %v206_v27 = vunpack.c.h.bf16 %v87_v19  ;;  %v53_v30 = vld [vmem:[%s1854_s1 + $0xa0] sm:$0xff]  ;;  %v203_v35 = vunpack.c.l.bf16 %v86_v25  ;;  %v410_v19 = vld [vmem:[%s1856_s3 + $0xc8] sm:$0xff] }
  0x23   :  { %344 = vmatprep.subr.mxu1 %v162_v31  ;;  %274 = vmatpush1.msra.mxu0 %v97_v32  ;;  %v85_v31 = vld [vmem:[%s1854_s1 + $0x1a0] sm:$0xff]  ;;  %v140_v32 = vunpack.c.h.bf16 %v54_v24  ;;  %v137_v40 = vunpack.c.l.bf16 %v53_v30  ;;  %v407_v24 = vld [vmem:[%s1856_s3 + $0xb0] sm:$0xff] }
  0x24   :  { %345 = vmatpush1.msra.mxu1 %v161_v33  ;;  %275 = vmatprep.subr.mxu0 %v160_v36  ;;  %v204_v33 = vunpack.c.h.bf16 %v86_v25  ;;  %v52_v36 = vld [vmem:[%s1854_s1 + $0x98] sm:$0xff]  ;;  %v201_v41 = vunpack.c.l.bf16 %v85_v31 }
  0x25   :  { %346 = vmatprep.subr.mxu1 %v224_v37  ;;  %276 = vmatpush2.msra.mxu0 %v159_v38  ;;  %v84_v37 = vld [vmem:[%s1854_s1 + $0x198] sm:$0xff]  ;;  %v138_v38 = vunpack.c.h.bf16 %v53_v30  ;;  %v135_v46 = vunpack.c.l.bf16 %v52_v36  ;;  %v405_v30 = vld [vmem:[%s1856_s3 + $0xa0] sm:$0xff] }
  0x26   :  { %347 = vmatpush2.msra.mxu1 %v223_v39  ;;  %277 = vmatprep.subr.mxu0 %v158_v42  ;;  %v202_v39 = vunpack.c.h.bf16 %v85_v31  ;;  %v51_v42 = vld [vmem:[%s1854_s1 + $0x90] sm:$0xff]  ;;  %v199_v47 = vunpack.c.l.bf16 %v84_v37  ;;  %v408_v25 = vld [vmem:[%s1856_s3 + $0xb8] sm:$0xff]  ;;  %v406_v31 = vld [vmem:[%s1856_s3 + $0xa8] sm:$0xff] }
  0x27   :  { %348 = vmatprep.subr.mxu1 %v222_v43  ;;  %278 = vmatpush2.msra.mxu0 %v157_v44  ;;  %v83_v43 = vld [vmem:[%s1854_s1 + $0x190] sm:$0xff]  ;;  %v136_v44 = vunpack.c.h.bf16 %v52_v36  ;;  %v133_v52 = vunpack.c.l.bf16 %v51_v42 }
  0x28   :  { %349 = vmatpush2.msra.mxu1 %v221_v45  ;;  %279 = vmatprep.subr.mxu0 %v156_v48  ;;  %v200_v45 = vunpack.c.h.bf16 %v84_v37  ;;  %v50_v48 = vld [vmem:[%s1854_s1 + $0x88] sm:$0xff]  ;;  %v197_v53 = vunpack.c.l.bf16 %v83_v43  ;;  %v403_v36 = vld [vmem:[%s1856_s3 + $0x90] sm:$0xff]  ;;  %v404_v37 = vld [vmem:[%s1856_s3 + $0x98] sm:$0xff] }
  0x29   :  { %350 = vmatprep.subr.mxu1 %v220_v49  ;;  %280 = vmatpush2.msra.mxu0 %v155_v50  ;;  %v82_v49 = vld [vmem:[%s1854_s1 + $0x188] sm:$0xff]  ;;  %v134_v50 = vunpack.c.h.bf16 %v51_v42  ;;  %v131_v59 = vunpack.c.l.bf16 %v50_v48  ;;  %v401_v42 = vld [vmem:[%s1856_s3 + $0x80] sm:$0xff] }
  0x2a   :  { %351 = vmatpush2.msra.mxu1 %v219_v51  ;;  %281 = vmatprep.subr.mxu0 %v154_v54  ;;  %v198_v51 = vunpack.c.h.bf16 %v83_v43  ;;  %v49_v54 = vld [vmem:[%s1854_s1 + $0x80] sm:$0xff]  ;;  %v402_v43 = vld [vmem:[%s1856_s3 + $0x88] sm:$0xff] }
  0x2b   :  { %352 = vmatprep.subr.mxu1 %v218_v55  ;;  %282 = vmatpush2.msra.mxu0 %v153_v56  ;;  %v81_v55 = vld [vmem:[%s1854_s1 + $0x180] sm:$0xff]  ;;  %v132_v56 = vunpack.c.h.bf16 %v50_v48  ;;  %v129_v0 = vunpack.c.l.bf16 %v49_v54  ;;  %v399_v48 = vld [vmem:[%s1856_s3 + $0x70] sm:$0xff] }
  0x2c   :  { %353 = vmatpush2.msra.mxu1 %v217_v57  ;;  %283 = vmatprep.subr.mxu0 %v152_v60  ;;  %v196_v57 = vunpack.c.h.bf16 %v82_v49  ;;  %v195_v60 = vunpack.c.l.bf16 %v82_v49  ;;  %v400_v49 = vld [vmem:[%s1856_s3 + $0x78] sm:$0xff] }
  0x2d   :  { %354 = vmatprep.subr.mxu1 %v216_v61  ;;  %284 = vmatpush2.msra.mxu0 %v151_v62  ;;  %v32_v61 = vld [vmem:[%s1855_s0 + $0x8] sm:$0xff]  ;;  %v130_v62 = vunpack.c.h.bf16 %v49_v54  ;;  %v397_v54 = vld [vmem:[%s1856_s3 + $0x60] sm:$0xff] }
  0x2e   :  { %355 = vmatpush2.msra.mxu1 %v215_v63  ;;  %285 = vmatprep.subr.mxu0 %v150_v2  ;;  %v194_v63 = vunpack.c.h.bf16 %v81_v55  ;;  %v415_v2 = vld [vmem:[%s1856_s3 + $0xf0] sm:$0xff] }
  0x2f   :  { %356 = vmatprep.subr.mxu1 %v214_v3  ;;  %286 = vmatpush2.msra.mxu0 %v149_v4  ;;  %v416_v3 = vld [vmem:[%s1856_s3 + $0xf8] sm:$0xff]  ;;  %v193_v4 = vunpack.c.l.bf16 %v81_v55  ;;  %v398_v55 = vld [vmem:[%s1856_s3 + $0x68] sm:$0xff] }
  0x30   :  { %357 = vmatpush2.msra.mxu1 %v213_v5  ;;  %287 = vmatprep.subr.mxu0 %v148_v8  ;;  %v240_v5 = vcombine.high %v32_v61, %v32_v61  ;;  %v510_v8 = vunpack.c.h.bf16 %v415_v2 }
  0x31   :  { %358 = vmatprep.subr.mxu1 %v212_v9  ;;  %288 = vmatpush2.msra.mxu0 %v147_v10  ;;  %v512_v9 = vunpack.c.h.bf16 %v416_v3  ;;  %v509_v10 = vunpack.c.l.bf16 %v415_v2  ;;  %v393_v2 = vld [vmem:[%s1856_s3 + $0x40] sm:$0xff] }
  0x32   :  { %359 = vmatpush2.msra.mxu1 %v211_v11  ;;  %289 = vmatprep.subr.mxu0 %v146_v14  ;;  %v511_v11 = vunpack.c.l.bf16 %v416_v3  ;;  %v506_v14 = vunpack.c.h.bf16 %v413_v6  ;;  %v394_v3 = vld [vmem:[%s1856_s3 + $0x48] sm:$0xff] }
  0x33   :  { %360 = vmatprep.subr.mxu1 %v210_v15  ;;  %290 = vmatpush2.msra.mxu0 %v145_v16  ;;  %v508_v15 = vunpack.c.h.bf16 %v414_v7  ;;  %v505_v16 = vunpack.c.l.bf16 %v413_v6 }
  0x34   :  { %361 = vmatpush2.msra.mxu1 %v209_v17  ;;  %291 = vmatprep.subr.mxu0 %v144_v20  ;;  %v507_v17 = vunpack.c.l.bf16 %v414_v7  ;;  %v502_v20 = vunpack.c.h.bf16 %v411_v12 }
  0x35   :  { %362 = vmatprep.subr.mxu1 %v208_v21  ;;  %292 = vmatpush2.msra.mxu0 %v143_v22  ;;  %v504_v21 = vunpack.c.h.bf16 %v412_v13  ;;  %v501_v22 = vunpack.c.l.bf16 %v411_v12  ;;  %v465_v12 = vunpack.c.l.bf16 %v393_v2 }
  0x36   :  { %363 = vmatpush2.msra.mxu1 %v207_v23  ;;  %293 = vmatprep.subr.mxu0 %v142_v26  ;;  %v503_v23 = vunpack.c.l.bf16 %v412_v13  ;;  %v498_v26 = vunpack.c.h.bf16 %v409_v18  ;;  %v467_v13 = vunpack.c.l.bf16 %v394_v3 }
  0x37   :  { %364 = vmatprep.subr.mxu1 %v206_v27  ;;  %294 = vmatpush2.msra.mxu0 %v141_v28  ;;  %v500_v27 = vunpack.c.h.bf16 %v410_v19  ;;  %v497_v28 = vunpack.c.l.bf16 %v409_v18 }
  0x38   :  { %365 = vmatpush2.msra.mxu1 %v205_v29  ;;  %295 = vmatprep.subr.mxu0 %v140_v32  ;;  %v499_v29 = vunpack.c.l.bf16 %v410_v19  ;;  %v494_v32 = vunpack.c.h.bf16 %v407_v24 }
  0x39   :  { %366 = vmatprep.subr.mxu1 %v204_v33  ;;  %296 = vmatpush2.msra.mxu0 %v139_v34  ;;  %v496_v33 = vunpack.c.h.bf16 %v408_v25  ;;  %v493_v34 = vunpack.c.l.bf16 %v407_v24 }
  0x3a   :  { %367 = vmatpush2.msra.mxu1 %v203_v35  ;;  %297 = vmatprep.subr.mxu0 %v138_v38  ;;  %v495_v35 = vunpack.c.l.bf16 %v408_v25  ;;  %v490_v38 = vunpack.c.h.bf16 %v405_v30 }
  0x3b   :  { %368 = vmatprep.subr.mxu1 %v202_v39  ;;  %298 = vmatpush2.msra.mxu0 %v137_v40  ;;  %v492_v39 = vunpack.c.h.bf16 %v406_v31  ;;  %v489_v40 = vunpack.c.l.bf16 %v405_v30 }
  0x3c   :  { %369 = vmatpush2.msra.mxu1 %v201_v41  ;;  %299 = vmatprep.subr.mxu0 %v136_v44  ;;  %v491_v41 = vunpack.c.l.bf16 %v406_v31  ;;  %v486_v44 = vunpack.c.h.bf16 %v403_v36 }
  0x3d   :  { %370 = vmatprep.subr.mxu1 %v200_v45  ;;  %300 = vmatpush2.msra.mxu0 %v135_v46  ;;  %v488_v45 = vunpack.c.h.bf16 %v404_v37  ;;  %v485_v46 = vunpack.c.l.bf16 %v403_v36 }
  0x3e   :  { %371 = vmatpush2.msra.mxu1 %v199_v47  ;;  %301 = vmatprep.subr.mxu0 %v134_v50  ;;  %v487_v47 = vunpack.c.l.bf16 %v404_v37  ;;  %v482_v50 = vunpack.c.h.bf16 %v401_v42 }
  0x3f   :  { %372 = vmatprep.subr.mxu1 %v198_v51  ;;  %302 = vmatpush2.msra.mxu0 %v133_v52  ;;  %v484_v51 = vunpack.c.h.bf16 %v402_v43  ;;  %v481_v52 = vunpack.c.l.bf16 %v401_v42 }
  0x40   :  { %373 = vmatpush2.msra.mxu1 %v197_v53  ;;  %303 = vmatprep.subr.mxu0 %v132_v56  ;;  %v483_v53 = vunpack.c.l.bf16 %v402_v43  ;;  %v478_v56 = vunpack.c.h.bf16 %v399_v48 }
  0x41   :  { %374 = vmatprep.subr.mxu1 %v196_v57  ;;  %304 = vmatpush2.msra.mxu0 %v131_v59  ;;  %v480_v57 = vunpack.c.h.bf16 %v400_v49  ;;  %v479_v59 = vunpack.c.l.bf16 %v400_v49 }
  0x42   :  { %375 = vmatpush2.msra.mxu1 %v195_v60  ;;  %305 = vmatprep.subr.mxu0 %v130_v62  ;;  %v395_v60 = vld [vmem:[%s1856_s3 + $0x50] sm:$0xff]  ;;  %v474_v62 = vunpack.c.h.bf16 %v397_v54 }
  0x43   :  { %376 = vmatprep.subr.mxu1 %v194_v63  ;;  %306 = vmatpush2.msra.mxu0 %v129_v0  ;;  %v476_v63 = vunpack.c.h.bf16 %v398_v55  ;;  %v473_v0 = vunpack.c.l.bf16 %v397_v54  ;;  %v469_v6 = vunpack.c.l.bf16 %v395_v60 }
  0x44   :  { %307 = vmatprep.mubr.f32.mxu0 %v239_v1  ;;  %377 = vmatpush2.msra.mxu1 %v193_v4  ;;  %v475_v1 = vunpack.c.l.bf16 %v398_v55  ;;  %v470_v4 = vunpack.c.h.bf16 %v395_v60 }
  0x45   :  { %378 = vmatprep.mubr.f32.mxu1 %v240_v5  ;;  %308 = vmatmul.mubr.f32.vlgmr.msra.gmra.mxu0 %v31_v58  ;;  %v477_v58 = vunpack.c.l.bf16 %v399_v48 }
  0x46   :  { %379 = vmatmul.mubr.f32.vlgmr.msra.gmra.mxu1 %v32_v61  ;;  %577 = vmatprep.subr.mxu0 %v510_v8  ;;  %v396_v61 = vld [vmem:[%s1856_s3 + $0x58] sm:$0xff]  ;;  %v391_v8 = vld [vmem:[%s1856_s3 + $0x30] sm:$0xff] }
  0x47   :  { %648 = vmatprep.subr.mxu1 %v512_v9  ;;  %578 = vmatpush1.msra.mxu0 %v509_v10  ;;  %v472_v5 = vunpack.c.h.bf16 %v396_v61  ;;  %v471_v7 = vunpack.c.l.bf16 %v396_v61  ;;  %v392_v9 = vld [vmem:[%s1856_s3 + $0x38] sm:$0xff]  ;;  %v466_v10 = vunpack.c.h.bf16 %v393_v2  ;;  %v461_v18 = vunpack.c.l.bf16 %v391_v8 }
  0x48   :  { %649 = vmatpush1.msra.mxu1 %v511_v11  ;;  %579 = vmatprep.subr.mxu0 %v506_v14  ;;  %v468_v11 = vunpack.c.h.bf16 %v394_v3  ;;  %v389_v14 = vld [vmem:[%s1856_s3 + $0x20] sm:$0xff]  ;;  %v463_v19 = vunpack.c.l.bf16 %v392_v9 }
  0x49   :  { %650 = vmatprep.subr.mxu1 %v508_v15  ;;  %580 = vmatpush1.msra.mxu0 %v505_v16  ;;  %v390_v15 = vld [vmem:[%s1856_s3 + $0x28] sm:$0xff]  ;;  %v462_v16 = vunpack.c.h.bf16 %v391_v8  ;;  %v457_v24 = vunpack.c.l.bf16 %v389_v14 }
  0x4a   :  { %651 = vmatpush1.msra.mxu1 %v507_v17  ;;  %581 = vmatprep.subr.mxu0 %v502_v20  ;;  %v464_v17 = vunpack.c.h.bf16 %v392_v9  ;;  %v387_v20 = vld [vmem:[%s1856_s3 + $0x10] sm:$0xff]  ;;  %v459_v25 = vunpack.c.l.bf16 %v390_v15 }
  0x4b   :  { %652 = vmatprep.subr.mxu1 %v504_v21  ;;  %582 = vmatpush1.msra.mxu0 %v501_v22  ;;  %v388_v21 = vld [vmem:[%s1856_s3 + $0x18] sm:$0xff]  ;;  %v458_v22 = vunpack.c.h.bf16 %v389_v14  ;;  %v453_v30 = vunpack.c.l.bf16 %v387_v20 }
  0x4c   :  { %653 = vmatpush1.msra.mxu1 %v503_v23  ;;  %583 = vmatprep.subr.mxu0 %v498_v26  ;;  %v460_v23 = vunpack.c.h.bf16 %v390_v15  ;;  %v385_v26 = vld [vmem:[%s1856_s3] sm:$0xff]  ;;  %v455_v31 = vunpack.c.l.bf16 %v388_v21 }
  0x4d   :  { %654 = vmatprep.subr.mxu1 %v500_v27  ;;  %584 = vmatpush1.msra.mxu0 %v497_v28  ;;  %v386_v27 = vld [vmem:[%s1856_s3 + $0x8] sm:$0xff]  ;;  %v454_v28 = vunpack.c.h.bf16 %v387_v20  ;;  %v449_v36 = vunpack.c.l.bf16 %v385_v26 }
  0x4e   :  { %655 = vmatpush1.msra.mxu1 %v499_v29  ;;  %585 = vmatprep.subr.mxu0 %v494_v32  ;;  %v456_v29 = vunpack.c.h.bf16 %v388_v21  ;;  %v447_v32 = vld [vmem:[%s1856_s3 + $0x1f0] sm:$0xff]  ;;  %v451_v37 = vunpack.c.l.bf16 %v386_v27 }
  0x4f   :  { %656 = vmatprep.subr.mxu1 %v496_v33  ;;  %586 = vmatpush1.msra.mxu0 %v493_v34  ;;  %v448_v33 = vld [vmem:[%s1856_s3 + $0x1f8] sm:$0xff]  ;;  %v450_v34 = vunpack.c.h.bf16 %v385_v26  ;;  %v573_v42 = vunpack.c.l.bf16 %v447_v32 }
  0x50   :  { %657 = vmatpush1.msra.mxu1 %v495_v35  ;;  %587 = vmatprep.subr.mxu0 %v490_v38  ;;  %v452_v35 = vunpack.c.h.bf16 %v386_v27  ;;  %v445_v38 = vld [vmem:[%s1856_s3 + $0x1e0] sm:$0xff]  ;;  %v575_v43 = vunpack.c.l.bf16 %v448_v33 }
  0x51   :  { %658 = vmatprep.subr.mxu1 %v492_v39  ;;  %588 = vmatpush1.msra.mxu0 %v489_v40  ;;  %v446_v39 = vld [vmem:[%s1856_s3 + $0x1e8] sm:$0xff]  ;;  %v574_v40 = vunpack.c.h.bf16 %v447_v32  ;;  %v569_v48 = vunpack.c.l.bf16 %v445_v38 }
  0x52   :  { %659 = vmatpush1.msra.mxu1 %v491_v41  ;;  %589 = vmatprep.subr.mxu0 %v486_v44  ;;  %v576_v41 = vunpack.c.h.bf16 %v448_v33  ;;  %v443_v44 = vld [vmem:[%s1856_s3 + $0x1d0] sm:$0xff]  ;;  %v571_v49 = vunpack.c.l.bf16 %v446_v39 }
  0x53   :  { %660 = vmatprep.subr.mxu1 %v488_v45  ;;  %590 = vmatpush1.msra.mxu0 %v485_v46  ;;  %v444_v45 = vld [vmem:[%s1856_s3 + $0x1d8] sm:$0xff]  ;;  %v570_v46 = vunpack.c.h.bf16 %v445_v38  ;;  %v565_v54 = vunpack.c.l.bf16 %v443_v44 }
  0x54   :  { %661 = vmatpush1.msra.mxu1 %v487_v47  ;;  %591 = vmatprep.subr.mxu0 %v482_v50  ;;  %v572_v47 = vunpack.c.h.bf16 %v446_v39  ;;  %v441_v50 = vld [vmem:[%s1856_s3 + $0x1c0] sm:$0xff]  ;;  %v567_v55 = vunpack.c.l.bf16 %v444_v45 }
  0x55   :  { %662 = vmatprep.subr.mxu1 %v484_v51  ;;  %592 = vmatpush1.msra.mxu0 %v481_v52  ;;  %v442_v51 = vld [vmem:[%s1856_s3 + $0x1c8] sm:$0xff]  ;;  %v566_v52 = vunpack.c.h.bf16 %v443_v44  ;;  %v561_v60 = vunpack.c.l.bf16 %v441_v50  ;;  %v423_v44 = vld [vmem:[%s1856_s3 + $0x130] sm:$0xff] }
  0x56   :  { %663 = vmatpush1.msra.mxu1 %v483_v53  ;;  %593 = vmatprep.subr.mxu0 %v478_v56  ;;  %v568_v53 = vunpack.c.h.bf16 %v444_v45  ;;  %v439_v56 = vld [vmem:[%s1856_s3 + $0x1b0] sm:$0xff]  ;;  %v563_v61 = vunpack.c.l.bf16 %v442_v51  ;;  %v424_v45 = vld [vmem:[%s1856_s3 + $0x138] sm:$0xff] }
  0x57   :  { %664 = vmatprep.subr.mxu1 %v480_v57  ;;  %594 = vmatpush1.msra.mxu0 %v477_v58  ;;  %v440_v57 = vld [vmem:[%s1856_s3 + $0x1b8] sm:$0xff]  ;;  %v562_v58 = vunpack.c.h.bf16 %v441_v50  ;;  %v557_v2 = vunpack.c.l.bf16 %v439_v56  ;;  %v421_v50 = vld [vmem:[%s1856_s3 + $0x120] sm:$0xff] }
  0x58   :  { %665 = vmatpush1.msra.mxu1 %v479_v59  ;;  %595 = vmatprep.subr.mxu0 %v474_v62  ;;  %v564_v59 = vunpack.c.h.bf16 %v442_v51  ;;  %v437_v62 = vld [vmem:[%s1856_s3 + $0x1a0] sm:$0xff]  ;;  %v559_v3 = vunpack.c.l.bf16 %v440_v57  ;;  %v422_v51 = vld [vmem:[%s1856_s3 + $0x128] sm:$0xff] }
  0x59   :  { %666 = vmatprep.subr.mxu1 %v476_v63  ;;  %596 = vmatpush1.msra.mxu0 %v473_v0  ;;  %v438_v63 = vld [vmem:[%s1856_s3 + $0x1a8] sm:$0xff]  ;;  %v558_v0 = vunpack.c.h.bf16 %v439_v56  ;;  %v553_v8 = vunpack.c.l.bf16 %v437_v62  ;;  %v419_v56 = vld [vmem:[%s1856_s3 + $0x110] sm:$0xff] }
  0x5a   :  { %667 = vmatpush1.msra.mxu1 %v475_v1  ;;  %597 = vmatprep.subr.mxu0 %v470_v4  ;;  %v560_v1 = vunpack.c.h.bf16 %v440_v57  ;;  %v435_v4 = vld [vmem:[%s1856_s3 + $0x190] sm:$0xff]  ;;  %v555_v9 = vunpack.c.l.bf16 %v438_v63  ;;  %v420_v57 = vld [vmem:[%s1856_s3 + $0x118] sm:$0xff] }
  0x5b   :  { %668 = vmatprep.subr.mxu1 %v472_v5  ;;  %598 = vmatpush1.msra.mxu0 %v469_v6  ;;  %v436_v5 = vld [vmem:[%s1856_s3 + $0x198] sm:$0xff]  ;;  %v554_v6 = vunpack.c.h.bf16 %v437_v62  ;;  %v549_v14 = vunpack.c.l.bf16 %v435_v4  ;;  %v417_v62 = vld [vmem:[%s1856_s3 + $0x100] sm:$0xff] }
  0x5c   :  { %669 = vmatpush1.msra.mxu1 %v471_v7  ;;  %599 = vmatprep.subr.mxu0 %v466_v10  ;;  %v556_v7 = vunpack.c.h.bf16 %v438_v63  ;;  %v433_v10 = vld [vmem:[%s1856_s3 + $0x180] sm:$0xff]  ;;  %v551_v15 = vunpack.c.l.bf16 %v436_v5  ;;  %v418_v63 = vld [vmem:[%s1856_s3 + $0x108] sm:$0xff] }
  0x5d   :  { %670 = vmatprep.subr.mxu1 %v468_v11  ;;  %600 = vmatpush1.msra.mxu0 %v465_v12  ;;  %v434_v11 = vld [vmem:[%s1856_s3 + $0x188] sm:$0xff]  ;;  %v550_v12 = vunpack.c.h.bf16 %v435_v4  ;;  %v545_v20 = vunpack.c.l.bf16 %v433_v10  ;;  %v790_v4 = vld [vmem:[%s1857_s6 + $0x78] sm:$0xff] }
  0x5e   :  { %671 = vmatpush1.msra.mxu1 %v467_v13  ;;  %601 = vmatprep.subr.mxu0 %v462_v16  ;;  %v552_v13 = vunpack.c.h.bf16 %v436_v5  ;;  %v431_v16 = vld [vmem:[%s1856_s3 + $0x170] sm:$0xff]  ;;  %v547_v21 = vunpack.c.l.bf16 %v434_v11  ;;  %v822_v5 = vld [vmem:[%s1857_s6 + $0x178] sm:$0xff] }
  0x5f   :  { %672 = vmatprep.subr.mxu1 %v464_v17  ;;  %602 = vmatpush1.msra.mxu0 %v461_v18  ;;  %v432_v17 = vld [vmem:[%s1856_s3 + $0x178] sm:$0xff]  ;;  %v546_v18 = vunpack.c.h.bf16 %v433_v10  ;;  %v541_v26 = vunpack.c.l.bf16 %v431_v16 }
  0x60   :  { %673 = vmatpush1.msra.mxu1 %v463_v19  ;;  %603 = vmatprep.subr.mxu0 %v458_v22  ;;  %v548_v19 = vunpack.c.h.bf16 %v434_v11  ;;  %v429_v22 = vld [vmem:[%s1856_s3 + $0x160] sm:$0xff]  ;;  %v543_v27 = vunpack.c.l.bf16 %v432_v17 }
  0x61   :  { %674 = vmatprep.subr.mxu1 %v460_v23  ;;  %604 = vmatpush1.msra.mxu0 %v457_v24  ;;  %v430_v23 = vld [vmem:[%s1856_s3 + $0x168] sm:$0xff]  ;;  %v542_v24 = vunpack.c.h.bf16 %v431_v16  ;;  %v537_v32 = vunpack.c.l.bf16 %v429_v22  ;;  %v225_v11 = vld [vmem:[%s1858_s2] sm:$0x3] }
  0x62   :  { %675 = vmatpush1.msra.mxu1 %v459_v25  ;;  %605 = vmatprep.subr.mxu0 %v454_v28  ;;  %v544_v25 = vunpack.c.h.bf16 %v432_v17  ;;  %v427_v28 = vld [vmem:[%s1856_s3 + $0x150] sm:$0xff]  ;;  %v539_v33 = vunpack.c.l.bf16 %v430_v23 }
  0x63   :  { %676 = vmatprep.subr.mxu1 %v456_v29  ;;  %606 = vmatpush1.msra.mxu0 %v453_v30  ;;  %v428_v29 = vld [vmem:[%s1856_s3 + $0x158] sm:$0xff]  ;;  %v538_v30 = vunpack.c.h.bf16 %v429_v22  ;;  %v533_v38 = vunpack.c.l.bf16 %v427_v28  ;;  %v821_v22 = vld [vmem:[%s1857_s6 + $0x170] sm:$0xff] }
  0x64   :  { %677 = vmatpush1.msra.mxu1 %v455_v31  ;;  %607 = vmatprep.subr.mxu0 %v450_v34  ;;  %v540_v31 = vunpack.c.h.bf16 %v430_v23  ;;  %v425_v34 = vld [vmem:[%s1856_s3 + $0x140] sm:$0xff]  ;;  %v535_v39 = vunpack.c.l.bf16 %v428_v29 }
  0x65   :  { %678 = vmatprep.subr.mxu1 %v452_v35  ;;  %608 = vmatpush1.msra.mxu0 %v449_v36  ;;  %v426_v35 = vld [vmem:[%s1856_s3 + $0x148] sm:$0xff]  ;;  %v534_v36 = vunpack.c.h.bf16 %v427_v28 }
  0x66   :  { %679 = vmatpush1.msra.mxu1 %v451_v37  ;;  %609 = vmatprep.subr.mxu0 %v574_v40  ;;  %v536_v37 = vunpack.c.h.bf16 %v428_v29  ;;  %v530_v40 = vunpack.c.h.bf16 %v425_v34  ;;  %v932_v29 = vunpack.c.h.bf16 %v821_v22 }
  0x67   :  { %680 = vmatprep.subr.mxu1 %v576_v41  ;;  %610 = vmatpush2.msra.mxu0 %v573_v42  ;;  %v532_v41 = vunpack.c.h.bf16 %v426_v35  ;;  %v529_v42 = vunpack.c.l.bf16 %v425_v34 }
  0x68   :  { %681 = vmatpush2.msra.mxu1 %v575_v43  ;;  %611 = vmatprep.subr.mxu0 %v570_v46  ;;  %v531_v43 = vunpack.c.l.bf16 %v426_v35  ;;  %v526_v46 = vunpack.c.h.bf16 %v423_v44 }
  0x69   :  { %682 = vmatprep.subr.mxu1 %v572_v47  ;;  %612 = vmatpush2.msra.mxu0 %v569_v48  ;;  %v528_v47 = vunpack.c.h.bf16 %v424_v45  ;;  %v525_v48 = vunpack.c.l.bf16 %v423_v44 }
  0x6a   :  { %683 = vmatpush2.msra.mxu1 %v571_v49  ;;  %613 = vmatprep.subr.mxu0 %v566_v52  ;;  %v527_v49 = vunpack.c.l.bf16 %v424_v45  ;;  %v522_v52 = vunpack.c.h.bf16 %v421_v50 }
  0x6b   :  { %684 = vmatprep.subr.mxu1 %v568_v53  ;;  %614 = vmatpush2.msra.mxu0 %v565_v54  ;;  %v524_v53 = vunpack.c.h.bf16 %v422_v51  ;;  %v521_v54 = vunpack.c.l.bf16 %v421_v50 }
  0x6c   :  { %685 = vmatpush2.msra.mxu1 %v567_v55  ;;  %615 = vmatprep.subr.mxu0 %v562_v58  ;;  %v523_v55 = vunpack.c.l.bf16 %v422_v51  ;;  %v518_v58 = vunpack.c.h.bf16 %v419_v56 }
  0x6d   :  { %686 = vmatprep.subr.mxu1 %v564_v59  ;;  %616 = vmatpush2.msra.mxu0 %v561_v60  ;;  %v520_v59 = vunpack.c.h.bf16 %v420_v57  ;;  %v517_v60 = vunpack.c.l.bf16 %v419_v56 }
  0x6e   :  { %687 = vmatpush2.msra.mxu1 %v563_v61  ;;  %617 = vmatprep.subr.mxu0 %v558_v0  ;;  %v519_v61 = vunpack.c.l.bf16 %v420_v57  ;;  %v514_v0 = vunpack.c.h.bf16 %v417_v62 }
  0x6f   :  { %688 = vmatprep.subr.mxu1 %v560_v1  ;;  %618 = vmatpush2.msra.mxu0 %v557_v2  ;;  %v516_v1 = vunpack.c.h.bf16 %v418_v63  ;;  %v513_v2 = vunpack.c.l.bf16 %v417_v62 }
  0x70   :  { %689 = vmatpush2.msra.mxu1 %v559_v3  ;;  %619 = vmatprep.subr.mxu0 %v554_v6  ;;  %v515_v3 = vunpack.c.l.bf16 %v418_v63  ;;  %v870_v6 = vunpack.c.h.bf16 %v790_v4 }
  0x71   :  { %690 = vmatprep.subr.mxu1 %v556_v7  ;;  %620 = vmatpush2.msra.mxu0 %v553_v8  ;;  %v934_v7 = vunpack.c.h.bf16 %v822_v5  ;;  %v227_v8 = vlaneseq }
  0x72   :  { %691 = vmatpush2.msra.mxu1 %v555_v9  ;;  %621 = vmatprep.subr.mxu0 %v550_v12 }
  0x73   :  { %692 = vmatprep.subr.mxu1 %v552_v13  ;;  %622 = vmatpush2.msra.mxu0 %v549_v14  ;;  %v1614_v9 = vshrl.u32 %v227_v8, 7  ;;  %v782_v8 = vld [vmem:[%s1857_s6 + $0x38] sm:$0xff] }
  0x74   :  { %693 = vmatpush2.msra.mxu1 %v551_v15  ;;  %623 = vmatprep.subr.mxu0 %v546_v18 }
  0x75   :  { %694 = vmatprep.subr.mxu1 %v548_v19  ;;  %624 = vmatpush2.msra.mxu0 %v545_v20  ;;  %v1617_v10 = vsub.s32 0, %v1614_v9  ;;  %v1623_v12 = vsub.s32 1, %v1614_v9 }
  0x76   :  { %695 = vmatpush2.msra.mxu1 %v547_v21  ;;  %625 = vmatprep.subr.mxu0 %v542_v24  ;;  %v789_v21 = vld [vmem:[%s1857_s6 + $0x70] sm:$0xff] }
  0x77   :  { %696 = vmatprep.subr.mxu1 %v544_v25  ;;  %626 = vmatpush2.msra.mxu0 %v541_v26  ;;  %v230_v13 = vrot.slane %v225_v11, %v1617_v10  ;;  %v234_v14 = vrot.slane %v225_v11, %v1623_v12  ;;  %v869_v26 = vunpack.c.l.bf16 %v790_v4  ;;  %v868_v28 = vunpack.c.h.bf16 %v789_v21  ;;  %v814_v11 = vld [vmem:[%s1857_s6 + $0x138] sm:$0xff] }
  0x78   :  { %697 = vmatpush2.msra.mxu1 %v543_v27  ;;  %627 = vmatprep.subr.mxu0 %v538_v30  ;;  %v933_v27 = vunpack.c.l.bf16 %v822_v5 }
  0x79   :  { %698 = vmatprep.subr.mxu1 %v540_v31  ;;  %628 = vmatpush2.msra.mxu0 %v537_v32  ;;  %v867_v31 = vunpack.c.l.bf16 %v789_v21  ;;  %v931_v32 = vunpack.c.l.bf16 %v821_v22 }
  0x7a   :  { %699 = vmatpush2.msra.mxu1 %v539_v33  ;;  %629 = vmatprep.subr.mxu0 %v534_v36  ;;  %v788_v36 = vld [vmem:[%s1857_s6 + $0x68] sm:$0xff] }
  0x7b   :  { %700 = vmatprep.subr.mxu1 %v536_v37  ;;  %630 = vmatpush2.msra.mxu0 %v533_v38  ;;  %v820_v37 = vld [vmem:[%s1857_s6 + $0x168] sm:$0xff]  ;;  %v866_v38 = vunpack.c.h.bf16 %v788_v36 }
  0x7c   :  { %701 = vmatpush2.msra.mxu1 %v535_v39  ;;  %631 = vmatprep.subr.mxu0 %v530_v40  ;;  %v930_v39 = vunpack.c.h.bf16 %v820_v37  ;;  %v865_v40 = vunpack.c.l.bf16 %v788_v36 }
  0x7d   :  { %702 = vmatprep.subr.mxu1 %v532_v41  ;;  %632 = vmatpush2.msra.mxu0 %v529_v42  ;;  %v929_v41 = vunpack.c.l.bf16 %v820_v37  ;;  %v787_v42 = vld [vmem:[%s1857_s6 + $0x60] sm:$0xff]  ;;  %v778_v37 = vld [vmem:[%s1857_s6 + $0x18] sm:$0xff] }
  0x7e   :  { %703 = vmatpush2.msra.mxu1 %v531_v43  ;;  %633 = vmatprep.subr.mxu0 %v526_v46  ;;  %v819_v43 = vld [vmem:[%s1857_s6 + $0x160] sm:$0xff]  ;;  %v864_v44 = vunpack.c.h.bf16 %v787_v42  ;;  %v863_v46 = vunpack.c.l.bf16 %v787_v42 }
  0x7f   :  { %704 = vmatprep.subr.mxu1 %v528_v47  ;;  %634 = vmatpush2.msra.mxu0 %v525_v48  ;;  %v928_v45 = vunpack.c.h.bf16 %v819_v43  ;;  %v927_v47 = vunpack.c.l.bf16 %v819_v43  ;;  %v786_v48 = vld [vmem:[%s1857_s6 + $0x58] sm:$0xff]  ;;  %v777_v43 = vld [vmem:[%s1857_s6 + $0x10] sm:$0xff] }
  0x80   :  { %705 = vmatpush2.msra.mxu1 %v527_v49  ;;  %635 = vmatprep.subr.mxu0 %v522_v52  ;;  %v818_v49 = vld [vmem:[%s1857_s6 + $0x158] sm:$0xff]  ;;  %v862_v50 = vunpack.c.h.bf16 %v786_v48  ;;  %v861_v52 = vunpack.c.l.bf16 %v786_v48 }
  0x81   :  { %706 = vmatprep.subr.mxu1 %v524_v53  ;;  %636 = vmatpush2.msra.mxu0 %v521_v54  ;;  %v926_v51 = vunpack.c.h.bf16 %v818_v49  ;;  %v925_v53 = vunpack.c.l.bf16 %v818_v49  ;;  %v785_v54 = vld [vmem:[%s1857_s6 + $0x50] sm:$0xff]  ;;  %v776_v49 = vld [vmem:[%s1857_s6 + $0x8] sm:$0xff] }
  0x82   :  { %707 = vmatpush2.msra.mxu1 %v523_v55  ;;  %637 = vmatprep.subr.mxu0 %v518_v58  ;;  %v817_v55 = vld [vmem:[%s1857_s6 + $0x150] sm:$0xff]  ;;  %v860_v56 = vunpack.c.h.bf16 %v785_v54  ;;  %v859_v58 = vunpack.c.l.bf16 %v785_v54 }
  0x83   :  { %708 = vmatprep.subr.mxu1 %v520_v59  ;;  %638 = vmatpush2.msra.mxu0 %v517_v60  ;;  %v924_v57 = vunpack.c.h.bf16 %v817_v55  ;;  %v923_v59 = vunpack.c.l.bf16 %v817_v55  ;;  %v784_v60 = vld [vmem:[%s1857_s6 + $0x48] sm:$0xff] }
  0x84   :  { %709 = vmatpush2.msra.mxu1 %v519_v61  ;;  %639 = vmatprep.subr.mxu0 %v514_v0  ;;  %v816_v61 = vld [vmem:[%s1857_s6 + $0x148] sm:$0xff]  ;;  %v858_v62 = vunpack.c.h.bf16 %v784_v60  ;;  %v857_v0 = vunpack.c.l.bf16 %v784_v60 }
  0x85   :  { %710 = vmatprep.subr.mxu1 %v516_v1  ;;  %640 = vmatpush2.msra.mxu0 %v513_v2  ;;  %v922_v63 = vunpack.c.h.bf16 %v816_v61  ;;  %v921_v1 = vunpack.c.l.bf16 %v816_v61  ;;  %v783_v2 = vld [vmem:[%s1857_s6 + $0x40] sm:$0xff] }
  0x86   :  { %711 = vmatpush2.msra.mxu1 %v515_v3  ;;  %979 = vmatprep.subr.mxu0 %v870_v6  ;;  %v815_v3 = vld [vmem:[%s1857_s6 + $0x140] sm:$0xff]  ;;  %v856_v4 = vunpack.c.h.bf16 %v783_v2  ;;  %v855_v6 = vunpack.c.l.bf16 %v783_v2 }
  0x87   :  { %1050 = vmatprep.subr.mxu1 %v934_v7  ;;  %v920_v5 = vunpack.c.h.bf16 %v815_v3  ;;  %v919_v7 = vunpack.c.l.bf16 %v815_v3 }
 0x105   :  { %v309_v15 = vpop.f32.mrf.mxu0 }
 0x106   :  { %v380_v16 = vpop.f32.mrf.mxu1  ;;  %v310_v17 = vadd.f32 %v309_v15, %v230_v13  ;;  %v854_v13 = vunpack.c.h.bf16 %v782_v8  ;;  %v853_v15 = vunpack.c.l.bf16 %v782_v8 }
 0x107   :  { %v311_v18 = vpop.f32.mrf.mxu0 }
 0x108   :  { %v1627_v19 = vadd.f32 %v380_v16, %v310_v17  ;;  %v312_v20 = vadd.f32 %v311_v18, %v234_v14  ;;  %v382_v23 = vpop.f32.mrf.mxu1  ;;  %v918_v14 = vunpack.c.h.bf16 %v814_v11  ;;  %v917_v16 = vunpack.c.l.bf16 %v814_v11  ;;  %v781_v17 = vld [vmem:[%s1857_s6 + $0x30] sm:$0xff] }
 0x109   :  { %v813_v18 = vld [vmem:[%s1857_s6 + $0x130] sm:$0xff]  ;;  %v851_v22 = vunpack.c.l.bf16 %v781_v17 }
 0x10a   :  { %v1635_v24 = vadd.f32 %v382_v23, %v312_v20  ;;  %v1121_v25 = vmul.f32 %v1627_v19, %v1627_v19  ;;  %v852_v20 = vunpack.c.h.bf16 %v781_v17  ;;  %v916_v21 = vunpack.c.h.bf16 %v813_v18 }
 0x10b   :  { %v915_v23 = vunpack.c.l.bf16 %v813_v18 }
 0x10c   :  { %641 = vmatprep.mubr.f32.mxu0 %v1635_v24  ;;  %712 = vmatprep.mubr.f32.mxu1 %v1635_v24  ;;  %v1122_v30 = vmul.f32 %v1635_v24, %v1635_v24  ;;  %v1124_v33 = vsel %vm1123_vm0, %v1121_v25, 0.0  ;;  %v780_v25 = vld [vmem:[%s1857_s6 + $0x28] sm:$0xff] }
 0x10d   :  { %642 = vmatmul.mubr.f32.vlgmr.msra.gmra.mxu0 %v1627_v19  ;;  %713 = vmatmul.mubr.f32.vlgmr.msra.gmra.mxu1 %v1627_v19 }
 0x10e   :  { %v1125_v34 = vsel %vm1123_vm0, %v1122_v30, 0.0  ;;  %980 = vmatpush1.msra.mxu0 %v869_v26  ;;  %1051 = vmatpush1.msra.mxu1 %v933_v27  ;;  %v812_v26 = vld [vmem:[%s1857_s6 + $0x128] sm:$0xff]  ;;  %v850_v27 = vunpack.c.h.bf16 %v780_v25 }
 0x10f   :  { %v1126_v35 = vadd.f32 %v1125_v34, %v1124_v33  ;;  %981 = vmatprep.subr.mxu0 %v868_v28  ;;  %1052 = vmatprep.subr.mxu1 %v932_v29  ;;  %v914_v28 = vunpack.c.h.bf16 %v812_v26  ;;  %v849_v29 = vunpack.c.l.bf16 %v780_v25  ;;  %v913_v30 = vunpack.c.l.bf16 %v812_v26 }
 0x110   :  { %982 = vmatpush1.msra.mxu0 %v867_v31  ;;  %1053 = vmatpush1.msra.mxu1 %v931_v32  ;;  %v779_v31 = vld [vmem:[%s1857_s6 + $0x20] sm:$0xff] }
 0x111   :  { %1127 = vadd.xlane.f32.xlu0 %v1126_v35  ;;  %983 = vmatprep.subr.mxu0 %v866_v38  ;;  %v811_v32 = vld [vmem:[%s1857_s6 + $0x120] sm:$0xff]  ;;  %v848_v33 = vunpack.c.h.bf16 %v779_v31  ;;  %v847_v35 = vunpack.c.l.bf16 %v779_v31  ;;  %v810_v38 = vld [vmem:[%s1857_s6 + $0x118] sm:$0xff] }
 0x112   :  { %1054 = vmatprep.subr.mxu1 %v930_v39  ;;  %984 = vmatpush1.msra.mxu0 %v865_v40  ;;  %v912_v34 = vunpack.c.h.bf16 %v811_v32  ;;  %v911_v36 = vunpack.c.l.bf16 %v811_v32  ;;  %v846_v39 = vunpack.c.h.bf16 %v778_v37  ;;  %v910_v40 = vunpack.c.h.bf16 %v810_v38 }
 0x113   :  { %1055 = vmatpush1.msra.mxu1 %v929_v41  ;;  %985 = vmatprep.subr.mxu0 %v864_v44  ;;  %v845_v41 = vunpack.c.l.bf16 %v778_v37  ;;  %v909_v42 = vunpack.c.l.bf16 %v810_v38  ;;  %v809_v44 = vld [vmem:[%s1857_s6 + $0x110] sm:$0xff] }
 0x114   :  { %1056 = vmatprep.subr.mxu1 %v928_v45  ;;  %986 = vmatpush1.msra.mxu0 %v863_v46  ;;  %v843_v45 = vunpack.c.l.bf16 %v777_v43  ;;  %v844_v46 = vunpack.c.h.bf16 %v777_v43  ;;  %v908_v48 = vunpack.c.h.bf16 %v809_v44 }
 0x115   :  { %1057 = vmatpush1.msra.mxu1 %v927_v47  ;;  %987 = vmatprep.subr.mxu0 %v862_v50  ;;  %v907_v47 = vunpack.c.l.bf16 %v809_v44  ;;  %v808_v50 = vld [vmem:[%s1857_s6 + $0x108] sm:$0xff] }
 0x116   :  { %1058 = vmatprep.subr.mxu1 %v926_v51  ;;  %988 = vmatpush1.msra.mxu0 %v861_v52  ;;  %v775_v51 = vld [vmem:[%s1857_s6] sm:$0xff]  ;;  %v841_v52 = vunpack.c.l.bf16 %v776_v49  ;;  %v905_v54 = vunpack.c.l.bf16 %v808_v50  ;;  %v906_v55 = vunpack.c.h.bf16 %v808_v50 }
 0x117   :  { %1059 = vmatpush1.msra.mxu1 %v925_v53  ;;  %989 = vmatprep.subr.mxu0 %v860_v56  ;;  %v842_v53 = vunpack.c.h.bf16 %v776_v49  ;;  %v807_v56 = vld [vmem:[%s1857_s6 + $0x100] sm:$0xff]  ;;  %v839_v61 = vunpack.c.l.bf16 %v775_v51 }
 0x118   :  { %1060 = vmatprep.subr.mxu1 %v924_v57  ;;  %990 = vmatpush1.msra.mxu0 %v859_v58  ;;  %v806_v57 = vld [vmem:[%s1857_s6 + $0xf8] sm:$0xff]  ;;  %v904_v60 = vunpack.c.h.bf16 %v807_v56 }
 0x119   :  { %1061 = vmatpush1.msra.mxu1 %v923_v59  ;;  %991 = vmatprep.subr.mxu0 %v858_v62  ;;  %v838_v58 = vld [vmem:[%s1857_s6 + $0x1f8] sm:$0xff]  ;;  %v840_v59 = vunpack.c.h.bf16 %v775_v51  ;;  %v903_v62 = vunpack.c.l.bf16 %v807_v56  ;;  %v901_v3 = vunpack.c.l.bf16 %v806_v57 }
 0x11a   :  { %1062 = vmatprep.subr.mxu1 %v922_v63  ;;  %992 = vmatpush1.msra.mxu0 %v857_v0  ;;  %v805_v63 = vld [vmem:[%s1857_s6 + $0xf0] sm:$0xff]  ;;  %v966_v2 = vunpack.c.h.bf16 %v838_v58 }
 0x11b   :  { %1063 = vmatpush1.msra.mxu1 %v921_v1  ;;  %993 = vmatprep.subr.mxu0 %v856_v4  ;;  %v837_v0 = vld [vmem:[%s1857_s6 + $0x1f0] sm:$0xff]  ;;  %v902_v1 = vunpack.c.h.bf16 %v806_v57  ;;  %v965_v4 = vunpack.c.l.bf16 %v838_v58  ;;  %v899_v11 = vunpack.c.l.bf16 %v805_v63  ;;  %v796_v58 = vld [vmem:[%s1857_s6 + $0xa8] sm:$0xff] }
 0x11c   :  { %1064 = vmatprep.subr.mxu1 %v920_v5  ;;  %994 = vmatpush1.msra.mxu0 %v855_v6  ;;  %v804_v5 = vld [vmem:[%s1857_s6 + $0xe8] sm:$0xff]  ;;  %v964_v8 = vunpack.c.h.bf16 %v837_v0 }
 0x11d   :  { %1065 = vmatpush1.msra.mxu1 %v919_v7  ;;  %995 = vmatprep.subr.mxu0 %v854_v13  ;;  %v836_v6 = vld [vmem:[%s1857_s6 + $0x1e8] sm:$0xff]  ;;  %v900_v7 = vunpack.c.h.bf16 %v805_v63  ;;  %v963_v13 = vunpack.c.l.bf16 %v837_v0  ;;  %v897_v18 = vunpack.c.l.bf16 %v804_v5  ;;  %v882_v0 = vunpack.c.h.bf16 %v796_v58 }
 0x11e   :  { %1066 = vmatprep.subr.mxu1 %v918_v14  ;;  %996 = vmatpush1.msra.mxu0 %v853_v15  ;;  %v803_v14 = vld [vmem:[%s1857_s6 + $0xe0] sm:$0xff]  ;;  %v962_v17 = vunpack.c.h.bf16 %v836_v6 }
 0x11f   :  { %1067 = vmatpush1.msra.mxu1 %v917_v16  ;;  %997 = vmatprep.subr.mxu0 %v852_v20  ;;  %v835_v15 = vld [vmem:[%s1857_s6 + $0x1e0] sm:$0xff]  ;;  %v898_v16 = vunpack.c.h.bf16 %v804_v5  ;;  %v961_v20 = vunpack.c.l.bf16 %v836_v6  ;;  %v895_v26 = vunpack.c.l.bf16 %v803_v14 }
 0x120   :  { %1068 = vmatprep.subr.mxu1 %v916_v21  ;;  %998 = vmatpush1.msra.mxu0 %v851_v22  ;;  %v802_v21 = vld [vmem:[%s1857_s6 + $0xd8] sm:$0xff]  ;;  %v960_v25 = vunpack.c.h.bf16 %v835_v15  ;;  %v827_v5 = vld [vmem:[%s1857_s6 + $0x1a0] sm:$0xff] }
 0x121   :  { %1069 = vmatpush1.msra.mxu1 %v915_v23  ;;  %999 = vmatprep.subr.mxu0 %v850_v27  ;;  %v834_v22 = vld [vmem:[%s1857_s6 + $0x1d8] sm:$0xff]  ;;  %v896_v23 = vunpack.c.h.bf16 %v803_v14  ;;  %v959_v27 = vunpack.c.l.bf16 %v835_v15  ;;  %v893_v32 = vunpack.c.l.bf16 %v802_v21 }
 0x122   :  { %1070 = vmatprep.subr.mxu1 %v914_v28  ;;  %1000 = vmatpush1.msra.mxu0 %v849_v29  ;;  %v801_v28 = vld [vmem:[%s1857_s6 + $0xd0] sm:$0xff]  ;;  %v958_v31 = vunpack.c.h.bf16 %v834_v22  ;;  %v826_v14 = vld [vmem:[%s1857_s6 + $0x198] sm:$0xff] }
 0x123   :  { %1071 = vmatpush1.msra.mxu1 %v913_v30  ;;  %1001 = vmatprep.subr.mxu0 %v848_v33  ;;  %v833_v29 = vld [vmem:[%s1857_s6 + $0x1d0] sm:$0xff]  ;;  %v894_v30 = vunpack.c.h.bf16 %v802_v21  ;;  %v957_v33 = vunpack.c.l.bf16 %v834_v22  ;;  %v891_v38 = vunpack.c.l.bf16 %v801_v28  ;;  %v941_v21 = vunpack.c.l.bf16 %v826_v14 }
 0x124   :  { %1072 = vmatprep.subr.mxu1 %v912_v34  ;;  %1002 = vmatpush1.msra.mxu0 %v847_v35  ;;  %v800_v34 = vld [vmem:[%s1857_s6 + $0xc8] sm:$0xff]  ;;  %v956_v37 = vunpack.c.h.bf16 %v833_v29 }
 0x125   :  { %1073 = vmatpush1.msra.mxu1 %v911_v36  ;;  %1003 = vmatprep.subr.mxu0 %v846_v39  ;;  %v832_v35 = vld [vmem:[%s1857_s6 + $0x1c8] sm:$0xff]  ;;  %v892_v36 = vunpack.c.h.bf16 %v801_v28  ;;  %v955_v39 = vunpack.c.l.bf16 %v833_v29  ;;  %v889_v44 = vunpack.c.l.bf16 %v800_v34 }
 0x126   :  { %1074 = vmatprep.subr.mxu1 %v910_v40  ;;  %1004 = vmatpush1.msra.mxu0 %v845_v41  ;;  %v799_v40 = vld [vmem:[%s1857_s6 + $0xc0] sm:$0xff]  ;;  %v954_v43 = vunpack.c.h.bf16 %v832_v35  ;;  %v824_v28 = vld [vmem:[%s1857_s6 + $0x188] sm:$0xff] }
 0x127   :  { %1075 = vmatpush1.msra.mxu1 %v909_v42  ;;  %1005 = vmatprep.subr.mxu0 %v844_v46  ;;  %v831_v41 = vld [vmem:[%s1857_s6 + $0x1c0] sm:$0xff]  ;;  %v890_v42 = vunpack.c.h.bf16 %v800_v34  ;;  %v798_v46 = vld [vmem:[%s1857_s6 + $0xb8] sm:$0xff]  ;;  %v887_v50 = vunpack.c.l.bf16 %v799_v40 }
 0x128   :  { %1076 = vmatprep.subr.mxu1 %v908_v48  ;;  %1006 = vmatpush1.msra.mxu0 %v843_v45  ;;  %v953_v45 = vunpack.c.l.bf16 %v832_v35  ;;  %v888_v48 = vunpack.c.h.bf16 %v799_v40  ;;  %v952_v49 = vunpack.c.h.bf16 %v831_v41  ;;  %v951_v51 = vunpack.c.l.bf16 %v831_v41  ;;  %v823_v34 = vld [vmem:[%s1857_s6 + $0x180] sm:$0xff] }
 0x129   :  { %1077 = vmatpush1.msra.mxu1 %v907_v47  ;;  %1007 = vmatprep.subr.mxu0 %v842_v53  ;;  %v830_v47 = vld [vmem:[%s1857_s6 + $0x1b8] sm:$0xff]  ;;  %v829_v53 = vld [vmem:[%s1857_s6 + $0x1b0] sm:$0xff]  ;;  %v885_v56 = vunpack.c.l.bf16 %v798_v46 }
 0x12a   :  { %1078 = vmatprep.subr.mxu1 %v906_v55  ;;  %1008 = vmatpush1.msra.mxu0 %v841_v52  ;;  %v797_v52 = vld [vmem:[%s1857_s6 + $0xb0] sm:$0xff]  ;;  %v950_v55 = vunpack.c.h.bf16 %v830_v47  ;;  %v949_v57 = vunpack.c.l.bf16 %v830_v47  ;;  %v947_v63 = vunpack.c.l.bf16 %v829_v53  ;;  %v735_v47 = vsub.s32 3, %v1614_v9 }
 0x12b   :  { %1079 = vmatpush1.msra.mxu1 %v905_v54  ;;  %1009 = vmatprep.subr.mxu0 %v840_v59  ;;  %v886_v54 = vunpack.c.h.bf16 %v798_v46  ;;  %v828_v59 = vld [vmem:[%s1857_s6 + $0x1a8] sm:$0xff]  ;;  %v719_v46 = vld [vmem:[%s1860_s4] sm:$0xf] }
 0x12c   :  { %1080 = vmatprep.subr.mxu1 %v904_v60  ;;  %1010 = vmatpush1.msra.mxu0 %v839_v61  ;;  %v884_v60 = vunpack.c.h.bf16 %v797_v52  ;;  %v948_v61 = vunpack.c.h.bf16 %v829_v53 }
 0x12d   :  { %1081 = vmatpush1.msra.mxu1 %v903_v62  ;;  %1011 = vmatprep.subr.mxu0 %v902_v1  ;;  %v883_v62 = vunpack.c.l.bf16 %v797_v52  ;;  %v946_v1 = vunpack.c.h.bf16 %v828_v59 }
 0x12e   :  { %1082 = vmatprep.subr.mxu1 %v966_v2  ;;  %1012 = vmatpush2.msra.mxu0 %v901_v3  ;;  %v881_v2 = vunpack.c.l.bf16 %v796_v58  ;;  %v945_v3 = vunpack.c.l.bf16 %v828_v59 }
 0x12f   :  { %1083 = vmatpush2.msra.mxu1 %v965_v4  ;;  %1013 = vmatprep.subr.mxu0 %v900_v7  ;;  %v795_v4 = vld [vmem:[%s1857_s6 + $0xa0] sm:$0xff]  ;;  %v944_v7 = vunpack.c.h.bf16 %v827_v5 }
 0x130   :  { %1084 = vmatprep.subr.mxu1 %v964_v8  ;;  %1014 = vmatpush2.msra.mxu0 %v899_v11  ;;  %v880_v6 = vunpack.c.h.bf16 %v795_v4  ;;  %v879_v8 = vunpack.c.l.bf16 %v795_v4  ;;  %v943_v11 = vunpack.c.l.bf16 %v827_v5 }
 0x131   :  { %1085 = vmatpush2.msra.mxu1 %v963_v13  ;;  %1015 = vmatprep.subr.mxu0 %v898_v16  ;;  %v794_v13 = vld [vmem:[%s1857_s6 + $0x98] sm:$0xff]  ;;  %v942_v16 = vunpack.c.h.bf16 %v826_v14 }
 0x132   :  { %1086 = vmatprep.subr.mxu1 %v962_v17  ;;  %1016 = vmatpush2.msra.mxu0 %v897_v18  ;;  %v878_v15 = vunpack.c.h.bf16 %v794_v13  ;;  %v877_v17 = vunpack.c.l.bf16 %v794_v13  ;;  %v793_v18 = vld [vmem:[%s1857_s6 + $0x90] sm:$0xff] }
 0x133   :  { %1087 = vmatpush2.msra.mxu1 %v961_v20  ;;  %1017 = vmatprep.subr.mxu0 %v896_v23  ;;  %v825_v20 = vld [vmem:[%s1857_s6 + $0x190] sm:$0xff]  ;;  %v876_v22 = vunpack.c.h.bf16 %v793_v18 }
 0x134   :  { %1088 = vmatprep.subr.mxu1 %v960_v25  ;;  %1018 = vmatpush2.msra.mxu0 %v895_v26  ;;  %v940_v23 = vunpack.c.h.bf16 %v825_v20  ;;  %v875_v25 = vunpack.c.l.bf16 %v793_v18  ;;  %v939_v26 = vunpack.c.l.bf16 %v825_v20 }
 0x135   :  { %1089 = vmatpush2.msra.mxu1 %v959_v27  ;;  %1019 = vmatprep.subr.mxu0 %v894_v30  ;;  %v792_v27 = vld [vmem:[%s1857_s6 + $0x88] sm:$0xff]  ;;  %v938_v30 = vunpack.c.h.bf16 %v824_v28 }
 0x136   :  { %1090 = vmatprep.subr.mxu1 %v958_v31  ;;  %1020 = vmatpush2.msra.mxu0 %v893_v32  ;;  %v874_v29 = vunpack.c.h.bf16 %v792_v27  ;;  %v873_v31 = vunpack.c.l.bf16 %v792_v27  ;;  %v937_v32 = vunpack.c.l.bf16 %v824_v28 }
 0x137   :  { %1091 = vmatpush2.msra.mxu1 %v957_v33  ;;  %1021 = vmatprep.subr.mxu0 %v892_v36  ;;  %v791_v33 = vld [vmem:[%s1857_s6 + $0x80] sm:$0xff]  ;;  %v936_v36 = vunpack.c.h.bf16 %v823_v34 }
 0x138   :  { %1092 = vmatprep.subr.mxu1 %v956_v37  ;;  %1022 = vmatpush2.msra.mxu0 %v891_v38  ;;  %v872_v35 = vunpack.c.h.bf16 %v791_v33  ;;  %v871_v37 = vunpack.c.l.bf16 %v791_v33  ;;  %v935_v38 = vunpack.c.l.bf16 %v823_v34 }
 0x139   :  { %1093 = vmatpush2.msra.mxu1 %v955_v39  ;;  %1023 = vmatprep.subr.mxu0 %v890_v42 }
 0x13a   :  { %1094 = vmatprep.subr.mxu1 %v954_v43  ;;  %1024 = vmatpush2.msra.mxu0 %v889_v44 }
 0x13b   :  { %1095 = vmatpush2.msra.mxu1 %v953_v45  ;;  %1025 = vmatprep.subr.mxu0 %v888_v48  ;;  %v731_v45 = vsub.s32 2, %v1614_v9  ;;  %v724_v48 = vrot.slane %v719_v46, %v1617_v10 }
 0x13c   :  { %1096 = vmatprep.subr.mxu1 %v952_v49  ;;  %1026 = vmatpush2.msra.mxu0 %v887_v50  ;;  %v728_v49 = vrot.slane %v719_v46, %v1623_v12  ;;  %v736_v50 = vrot.slane %v719_v46, %v735_v47 }
 0x13d   :  { %1097 = vmatpush2.msra.mxu1 %v951_v51  ;;  %1027 = vmatprep.subr.mxu0 %v886_v54 }
 0x13e   :  { %1098 = vmatprep.subr.mxu1 %v950_v55  ;;  %1028 = vmatpush2.msra.mxu0 %v885_v56 }
 0x13f   :  { %1099 = vmatpush2.msra.mxu1 %v949_v57  ;;  %1029 = vmatprep.subr.mxu0 %v884_v60 }
 0x140   :  { %1100 = vmatprep.subr.mxu1 %v948_v61  ;;  %1030 = vmatpush2.msra.mxu0 %v883_v62 }
 0x141   :  { %1101 = vmatpush2.msra.mxu1 %v947_v63  ;;  %1031 = vmatprep.subr.mxu0 %v882_v0 }
 0x142   :  { %1102 = vmatprep.subr.mxu1 %v946_v1  ;;  %1032 = vmatpush2.msra.mxu0 %v881_v2 }
 0x143   :  { %1103 = vmatpush2.msra.mxu1 %v945_v3  ;;  %1033 = vmatprep.subr.mxu0 %v880_v6  ;;  %v967_v6 = vld [vmem:[%s1862_s7] sm:$0x3] }
 0x144   :  { %1104 = vmatprep.subr.mxu1 %v944_v7  ;;  %1034 = vmatpush2.msra.mxu0 %v879_v8  ;;  %v972_v7 = vrot.slane %v967_v6, %v1617_v10  ;;  %v976_v8 = vrot.slane %v967_v6, %v1623_v12 }
 0x145   :  { %1105 = vmatpush2.msra.mxu1 %v943_v11  ;;  %1035 = vmatprep.subr.mxu0 %v878_v15 }
 0x146   :  { %1106 = vmatprep.subr.mxu1 %v942_v16  ;;  %1036 = vmatpush2.msra.mxu0 %v877_v17 }
 0x147   :  { %1107 = vmatpush2.msra.mxu1 %v941_v21  ;;  %1037 = vmatprep.subr.mxu0 %v876_v22 }
 0x148   :  { %1108 = vmatprep.subr.mxu1 %v940_v23  ;;  %1038 = vmatpush2.msra.mxu0 %v875_v25 }
 0x149   :  { %1109 = vmatpush2.msra.mxu1 %v939_v26  ;;  %1039 = vmatprep.subr.mxu0 %v874_v29 }
 0x14a   :  { %1110 = vmatprep.subr.mxu1 %v938_v30  ;;  %1040 = vmatpush2.msra.mxu0 %v873_v31 }
 0x14b   :  { %1111 = vmatpush2.msra.mxu1 %v937_v32  ;;  %1041 = vmatprep.subr.mxu0 %v872_v35 }
 0x14c   :  { %1112 = vmatprep.subr.mxu1 %v936_v36  ;;  %1042 = vmatpush2.msra.mxu0 %v871_v37 }
 0x14d   :  { %1113 = vmatpush2.msra.mxu1 %v935_v38 }
 0x19a   :  { %v1128_v39 = vpop.xlane.xlu0 %1127 }
 0x19b   :  { %1164 = vrsqrt.f32 %v1128_v39 }
 0x1a8   :  { %v1165_v40 = vpop.eup %1164 }
 0x1a9   :  { %v1130_v41 = vmin.f32 %v1165_v40, 1e+12 }
 0x1ab   :  { %v1131_v42 = vmul.f32 %v1130_v41, %v1627_v19  ;;  %v1132_v43 = vmul.f32 %v1130_v41, %v1635_v24  ;;  %v745_v19 = vld [vmem:[%s1861_s5] sm:$0xf]  ;;  %v732_v24 = vrot.slane %v719_v46, %v731_v45 }
 0x1ac   :  { %v750_v52 = vrot.slane %v745_v19, %v1617_v10  ;;  %v758_v54 = vrot.slane %v745_v19, %v731_v45  ;;  %v754_v57 = vrot.slane %v745_v19, %v1623_v12  ;;  %v762_v9 = vrot.slane %v745_v19, %v735_v47 }
 0x1ad   :  { %v1135_v44 = vcombine.low %v1131_v42, %v1132_v43 }
 0x1af   :  { %1137 = vst [vmem:[%s1859_s8] sm:$0xff] %v1135_v44 }
 0x1cd   :  { %v643_v51 = vpop.f32.mrf.mxu0  ;;  %v714_v53 = vpop.f32.mrf.mxu1 }
 0x1ce   :  { %v741_v55 = vmul.f32 %v724_v48, %v643_v51  ;;  %v743_v56 = vmul.f32 %v732_v24, %v714_v53 }
 0x1cf   :  { %v645_v58 = vpop.f32.mrf.mxu0  ;;  %v716_v59 = vpop.f32.mrf.mxu1 }
 0x1d0   :  { %v742_v60 = vmul.f32 %v728_v49, %v645_v58  ;;  %v744_v61 = vmul.f32 %v736_v50, %v716_v59  ;;  %v767_v62 = vadd.f32 %v750_v52, %v741_v55  ;;  %v769_v63 = vadd.f32 %v758_v54, %v743_v56 }
 0x1d2   :  { %v768_v0 = vadd.f32 %v754_v57, %v742_v60  ;;  %v770_v1 = vadd.f32 %v762_v9, %v744_v61  ;;  %v771_v4 = vmax.f32 %v767_v62, 0.0  ;;  %v773_v5 = vmax.f32 %v769_v63, 0.0 }
 0x1d4   :  { %v772_v2 = vmax.f32 %v768_v0, 0.0  ;;  %v774_v3 = vmax.f32 %v770_v1, 0.0 }
 0x1d6   :  { %1043 = vmatprep.mubr.f32.mxu0 %v772_v2  ;;  %1114 = vmatprep.mubr.f32.mxu1 %v774_v3 }
 0x1d7   :  { %1044 = vmatmul.mubr.f32.vlgmr.msra.gmra.mxu0 %v771_v4  ;;  %1115 = vmatmul.mubr.f32.vlgmr.msra.gmra.mxu1 %v773_v5 }
 0x297   :  { %v1045_v11 = vpop.f32.mrf.mxu0  ;;  %v1116_v13 = vpop.f32.mrf.mxu1 }
 0x298   :  { %v1046_v14 = vadd.f32 %v1045_v11, %v972_v7 }
 0x299   :  { %v1047_v15 = vpop.f32.mrf.mxu0  ;;  %v1118_v18 = vpop.f32.mrf.mxu1 }
 0x29a   :  { %v1117_v16 = vadd.f32 %v1116_v13, %v1046_v14  ;;  %v1048_v17 = vadd.f32 %v1047_v15, %v976_v8 }
 0x29c   :  { %v1138_v20 = vmul.f32 %v1117_v16, %v1117_v16  ;;  %v1119_v21 = vadd.f32 %v1118_v18, %v1048_v17 }
 0x29e   :  { %v1139_v22 = vmul.f32 %v1119_v21, %v1119_v21  ;;  %v1140_v23 = vsel %vm1123_vm0, %v1138_v20, 0.0 }
 0x2a0   :  { %v1141_v25 = vsel %vm1123_vm0, %v1139_v22, 0.0 }
 0x2a1   :  { %v1142_v26 = vadd.f32 %v1141_v25, %v1140_v23 }
 0x2a3   :  { %1143 = vadd.xlane.f32.xlu0 %v1142_v26 }
 0x32c   :  { %v1144_v27 = vpop.xlane.xlu0 %1143 }
 0x32d   :  { %1166 = vrsqrt.f32 %v1144_v27 }
 0x33a   :  { %v1167_v10 = vpop.eup %1166 }
 0x33b   :  { %v1146_v12 = vmin.f32 %v1167_v10, 1e+12 }
 0x33d   :  { %v1147_v28 = vmul.f32 %v1146_v12, %v1117_v16  ;;  %v1148_v29 = vmul.f32 %v1146_v12, %v1119_v21 }
 0x33f   :  { %v1151_v30 = vcombine.low %v1147_v28, %v1148_v29 }
 0x341   :  { %1153 = vst [vmem:[%s1863_s9] sm:$0xff] %v1151_v30 }

// kernel: cnn_forward.2
= control target key start
LH: loop header
LB: loop body
LE: loop exit
PB: predicated region body
PF: predicated region fallthrough
CT: control target
= control target key end

     0   :  { %s3633_s17 = smov 0   ;;  %s4857_s0 = inlined_call_operand.vmem [shape: f32[4,7,316], index: 0, kind: input, shape index: {}]   ;;  %s4858_s1 = inlined_call_operand.vmem [shape: f32[4,7,316], index: 1, kind: input, shape index: {}]   ;;  %s4859_s2 = inlined_call_operand.vmem [shape: f32[4,7], index: 2, kind: input, shape index: {}]   ;;  %s4860_s3 = inlined_call_operand.vmem [shape: f32[4,1], index: 3, kind: input, shape index: {}]   ;;  %s4861_s4 = inlined_call_operand.vmem [shape: f32[4,1], index: 4, kind: input, shape index: {}]   ;;  %s4862_s5 = inlined_call_operand.vmem [shape: bf16[28,16], index: 5, kind: input, shape index: {}]   ;;  %s4863_s6 = inlined_call_operand.vmem [shape: f32[1,16], index: 6, kind: input, shape index: {}]   ;;  %s4864_s7 = inlined_call_operand.vmem [shape: f32[1,16], index: 7, kind: input, shape index: {}]   ;;  %s4865_s8 = inlined_call_operand.vmem [shape: bf16[112,64], index: 8, kind: input, shape index: {}]   ;;  %s4866_s9 = inlined_call_operand.vmem [shape: f32[1,64], index: 9, kind: input, shape index: {}]   ;;  %s4867_s10 = inlined_call_operand.vmem [shape: f32[1,64], index: 10, kind: input, shape index: {}]   ;;  %s4868_s11 = inlined_call_operand.vmem [shape: f32[4,8,64], index: 11, kind: output, shape index: {}]  }
   0x1 LB: > { %s3313_s18 = sadd.s32 4294967295, %s3551_s17   ;;  %p3317_p0 = scmp.ge.s32.totalorder %s3551_s17, 1  ;;  %s3551_s17 = sphi %s3633_s17, %s21_s17  }
   0x2   : > { %p351_p1 = scmp.lt.s32.totalorder %s3551_s17, 3 }
   0x4   : > { %p352_p2 = pnand %p3317_p0, %p351_p1 }
   0x5   : > { %s3318_s21 = sshll.u32 (!%p352_p2), %s3313_s18, 1  ;;  %s3560_s14 = smov (!%p352_p2), 4  }
   0x6   : > { %355 = sbr.rel (%p352_p2) target bundleno = 1662 (0x67e), region = 64  ;;  %p399_p3 = scmp.lt.s32.totalorder (!%p352_p2), %s3318_s21, 3 }
   0x7   : > { %s3561_s15 = smov (!%p352_p2), 8   ;;  %s3562_s16 = smov (!%p352_p2), 12  }
   0x8   : > { %s3563_s18 = smov (!%p352_p2), 16   ;;  %s3564_s19 = smov (!%p352_p2), 20  }
   0x9   : > { %s3565_s20 = smov (!%p352_p2), 24   ;;  %s3568_s13 = smov (!%p352_p2), 32  }
   0xa   : > { %s3569_s22 = smov (!%p352_p2), 80   ;;  %s3570_s25 = smov (!%p352_p2), 96  }
   0xb   : > { %v419_v0 = vld [vmem:[%s4859_s2] sm:$0xf]  ;;  %v3553_v1 = vmov 1   ;;  %v3554_v2 = vmov 2   ;;  %v3555_v3 = vmov 5   ;;  %v3556_v4 = vmov 3  }
   0xc   : > { %3525 = vset.pattern.permute.xlu0 %v3553_v1  ;;  %3526 = vset.pattern.permute.xlu1 %v3554_v2  ;;  %s4950_s21 = smov (!%p399_p3, %s3318_s21), 3  ;;  %v455_v5 = vlaneseq  ;;  %v3557_v6 = vmov 0   ;;  %v3558_v7 = vmov 4   ;;  %v421_v8 = vld [vmem:[%s4861_s4] sm:$0xf]  ;;  %v3559_v10 = vmov 6  }
   0xd   : > { %492 = vperm.xlu0 %3525, %v419_v0   ;;  %532 = vperm.xlu1 %3526, %v419_v0   ;;  %s3496_s24 = smul.u32 24, %s4950_s21  ;;  %v420_v12 = vld [vmem:[%s4860_s3] sm:$0xf]  ;;  %vm858_vm0 = vcmask 31744   ;;  %vm898_vm1 = vcmask 27648   ;;  %vm983_vm2 = vcmask 64544  }
   0xe   : > { %v456_v9 = vshrl.u32 %v455_v5, 7  ;;  %vm1083_vm3 = vcmask 97344   ;;  %vm1176_vm4 = vcmask 130144   ;;  %vm1269_vm5 = vcmask 162944   ;;  %s3571_s28 = smov 48   ;;  %s3323_s23 = sshll.u32 %s4950_s21, 3 }
   0xf   : > { %s3653_s27 = scalar_lea.vmem %s4857_s0, %s3496_s24  ;;  %s3658_s30 = scalar_lea.vmem %s4858_s1, %s3496_s24  ;;  %vm1566_vm6 = vcmask 1045504   ;;  %vm1362_vm7 = vcmask 195744   ;;  %vm1455_vm8 = vcmask 228544   ;;  %vm3567_vm9 = vmmov 0  }
  0x10   : > { %v3660_v11 = vsub.s32 0, %v456_v9  ;;  %v3665_v13 = vsub.s32 1, %v456_v9  ;;  %v3667_v14 = vsub.s32 2, %v456_v9  ;;  %v3669_v15 = vsub.s32 3, %v456_v9  ;;  %v3676_v18 = vld [vmem:[%s3653_s27 + $0x18] sm:$0x7f]  ;;  %s4785_s29 = scalar_lea.vmem %s4868_s11, %s3323_s23 }
  0x11   : > { %3529 = vset.pattern.permute.xlu0 %v3555_v3  ;;  %3527 = vset.pattern.permute.xlu1 %v3556_v4  ;;  %v3671_v16 = vsub.s32 4, %v456_v9  ;;  %v3673_v17 = vsub.s32 5, %v456_v9  ;;  %v3679_v19 = vld [vmem:[%s3658_s30 + $0x18] sm:$0x7f]  ;;  %v3681_v20 = vsub.s32 6, %v456_v9  ;;  %vm990_vm10 = vcmask 60448  }
  0x12   : > { %652 = vperm.xlu0 %3529, %v419_v0   ;;  %572 = vperm.xlu1 %3527, %v419_v0   ;;  %v1966_v21 = vrot.slane %v3676_v18, %v3660_v11  ;;  %v3688_v23 = vld [vmem:[%s3653_s27 + $0x20] sm:$0x7f]  ;;  %v2002_v24 = vrot.slane %v3676_v18, %v3665_v13  ;;  %v2020_v25 = vrot.slane %v3679_v19, %v3665_v13  ;;  %v3710_v33 = vld [vmem:[%s3653_s27 + $0x28] sm:$0x7f]  ;;  %vm1090_vm11 = vcmask 93248   ;;  %s3572_s24 = smov 64  }
  0x13   : > { %v3699_v28 = vld [vmem:[%s3658_s30 + $0x20] sm:$0x7f]  ;;  %v3739_v47 = vld [vmem:[%s3658_s30 + $0x28] sm:$0x7f]  ;;  %vm1183_vm12 = vcmask 126048   ;;  %vm1276_vm13 = vcmask 158848  }
  0x14   : > { %v3784_v5 = vld [vmem:[%s3653_s27 + $0x8] sm:$0x7f]  ;;  %v3802_v60 = vld [vmem:[%s3653_s27] sm:$0x7f]  ;;  %vm1369_vm14 = vcmask 191648   ;;  %vm4875_vm15 = vcmask 224448  }
  0x15   : > { %v502_v9 = vrot.slane %v3784_v5, %v3665_v13  ;;  %v3805_v1 = vld [vmem:[%s3658_s30] sm:$0x7f]  ;;  %v582_v59 = vrot.slane %v3784_v5, %v3669_v15  ;;  %v622_v63 = vrot.slane %v3784_v5, %v3671_v16  ;;  %v662_v57 = vrot.slane %v3784_v5, %v3673_v17 }
  0x16   : > { %3530 = vset.pattern.permute.xlu0 %v3557_v6  ;;  %3528 = vset.pattern.permute.xlu1 %v3558_v7  ;;  %v462_v7 = vrot.slane %v3784_v5, %v3660_v11  ;;  %v458_v56 = vrot.slane %v3802_v60, %v3660_v11  ;;  %v476_v43 = vrot.slane %v3805_v1, %v3660_v11 }
  0x17   : > { %452 = vperm.xlu0 %3530, %v419_v0   ;;  %612 = vperm.xlu1 %3528, %v419_v0   ;;  %v702_v51 = vrot.slane %v3784_v5, %v3681_v20  ;;  %v498_v48 = vrot.slane %v3802_v60, %v3665_v13  ;;  %v516_v55 = vrot.slane %v3805_v1, %v3665_v13 }
  0x18   : > { %v538_v42 = vrot.slane %v3802_v60, %v3667_v14  ;;  %v556_v54 = vrot.slane %v3805_v1, %v3667_v14  ;;  %v578_v53 = vrot.slane %v3802_v60, %v3669_v15  ;;  %v618_v46 = vrot.slane %v3802_v60, %v3671_v16 }
  0x19   : > { %v636_v36 = vrot.slane %v3805_v1, %v3671_v16  ;;  %v658_v45 = vrot.slane %v3802_v60, %v3673_v17  ;;  %v698_v49 = vrot.slane %v3802_v60, %v3681_v20  ;;  %v716_v35 = vrot.slane %v3805_v1, %v3681_v20 }
  0x1b   : > { %741 = vperm.xlu0 %3530, %v421_v8   ;;  %3531 = vset.pattern.permute.xlu1 %v3559_v10 }
  0x1c   : > { %692 = vperm.xlu1 %3531, %v419_v0  }
  0x20   : > { %3532 = vset.pattern.permute.xlu1 %v3557_v6  ;;  %v3787_v6 = vld [vmem:[%s3658_s30 + $0x8] sm:$0x7f] }
  0x21   : > { %733 = vperm.xlu1 %3532, %v420_v12   ;;  %v480_v8 = vrot.slane %v3787_v6, %v3660_v11  ;;  %v520_v10 = vrot.slane %v3787_v6, %v3665_v13  ;;  %v542_v12 = vrot.slane %v3784_v5, %v3667_v14  ;;  %v560_v2 = vrot.slane %v3787_v6, %v3667_v14 }
  0x22   : > { %v600_v0 = vrot.slane %v3787_v6, %v3669_v15  ;;  %v640_v62 = vrot.slane %v3787_v6, %v3671_v16  ;;  %v680_v52 = vrot.slane %v3787_v6, %v3673_v17  ;;  %v720_v41 = vrot.slane %v3787_v6, %v3681_v20 }
  0x23   : > { %v596_v5 = vrot.slane %v3805_v1, %v3669_v15  ;;  %v676_v6 = vrot.slane %v3805_v1, %v3673_v17 }
  0x88   : > { %v3779_v3 = vpop.permute.xlu0 %492  ;;  %v3781_v4 = vpop.permute.xlu1 %532 }
  0x89   : > { %v508_v44 = vmul.f32 %v502_v9, %v3779_v3  ;;  %v526_v50 = vmul.f32 %v520_v10, %v3779_v3  ;;  %v548_v31 = vmul.f32 %v542_v12, %v3781_v4  ;;  %v566_v40 = vmul.f32 %v560_v2, %v3781_v4 }
  0x8a   : > { %v507_v39 = vmul.f32 %v498_v48, %v3779_v3  ;;  %v525_v9 = vmul.f32 %v516_v55, %v3779_v3  ;;  %v547_v60 = vmul.f32 %v538_v42, %v3781_v4  ;;  %v565_v1 = vmul.f32 %v556_v54, %v3781_v4 }
  0x8b   : > { %v2011_v2 = vmul.f32 %v2002_v24, %v3779_v3  ;;  %v2029_v48 = vmul.f32 %v2020_v25, %v3779_v3 }
  0x8d   : > { %v3815_v61 = vpop.permute.xlu0 %652  ;;  %v3817_v58 = vpop.permute.xlu1 %572 }
  0x8e   : > { %v588_v42 = vmul.f32 %v582_v59, %v3817_v58  ;;  %v606_v54 = vmul.f32 %v600_v0, %v3817_v58  ;;  %v587_v24 = vmul.f32 %v578_v53, %v3817_v58  ;;  %v605_v26 = vmul.f32 %v596_v5, %v3817_v58 }
  0x92   : > { %v3857_v32 = vpop.permute.xlu0 %452  ;;  %v3859_v34 = vpop.permute.xlu1 %612 }
  0x93   : > { %v468_v10 = vmul.f32 %v462_v7, %v3857_v32  ;;  %v486_v38 = vmul.f32 %v480_v8, %v3857_v32  ;;  %v467_v37 = vmul.f32 %v458_v56, %v3857_v32  ;;  %v485_v30 = vmul.f32 %v476_v43, %v3857_v32 }
  0x94   : > { %v668_v56 = vmul.f32 %v662_v57, %v3815_v61  ;;  %v686_v43 = vmul.f32 %v680_v52, %v3815_v61  ;;  %v628_v52 = vmul.f32 %v622_v63, %v3859_v34 }
  0x95   : > { %v511_v55 = vadd.f32 %v508_v44, %v468_v10  ;;  %v529_v7 = vadd.f32 %v526_v50, %v486_v38  ;;  %v510_v8 = vadd.f32 %v507_v39, %v467_v37  ;;  %v528_v12 = vadd.f32 %v525_v9, %v485_v30 }
  0x96   : > { %v667_v44 = vmul.f32 %v658_v45, %v3815_v61  ;;  %v685_v50 = vmul.f32 %v676_v6, %v3815_v61  ;;  %v646_v30 = vmul.f32 %v640_v62, %v3859_v34  ;;  %v627_v39 = vmul.f32 %v618_v46, %v3859_v34 }
  0x97   : > { %v551_v29 = vadd.f32 %v548_v31, %v511_v55  ;;  %v569_v27 = vadd.f32 %v566_v40, %v529_v7  ;;  %v3885_v22 = vpop.permute.xlu1 %692  ;;  %v550_v25 = vadd.f32 %v547_v60, %v510_v8  ;;  %v568_v38 = vadd.f32 %v565_v1, %v528_v12 }
  0x98   : > { %v645_v40 = vmul.f32 %v636_v36, %v3859_v34  ;;  %v708_v5 = vmul.f32 %v702_v51, %v3885_v22  ;;  %v726_v45 = vmul.f32 %v720_v41, %v3885_v22  ;;  %v4879_v36 = vrot.slane %v3679_v19, %v3660_v11 }
  0x99   : > { %v591_v59 = vadd.f32 %v588_v42, %v551_v29  ;;  %v609_v57 = vadd.f32 %v606_v54, %v569_v27  ;;  %v590_v31 = vadd.f32 %v587_v24, %v550_v25  ;;  %v608_v37 = vadd.f32 %v605_v26, %v568_v38 }
  0x9a   : > { %v707_v27 = vmul.f32 %v698_v49, %v3885_v22  ;;  %v725_v29 = vmul.f32 %v716_v35, %v3885_v22  ;;  %v1975_v26 = vmul.f32 %v1966_v21, %v3857_v32  ;;  %v1993_v46 = vmul.f32 %v4879_v36, %v3857_v32 }
  0x9b   : > { %v631_v53 = vadd.f32 %v628_v52, %v591_v59  ;;  %v649_v0 = vadd.f32 %v646_v30, %v609_v57  ;;  %v630_v9 = vadd.f32 %v627_v39, %v590_v31  ;;  %v648_v6 = vadd.f32 %v645_v40, %v608_v37 }
  0x9c   : > { %v3905_v51 = vpop.permute.xlu1 %733  ;;  %v4880_v35 = vrot.slane %v3676_v18, %v3667_v14  ;;  %v4881_v60 = vrot.slane %v3679_v19, %v3667_v14  ;;  %v2014_v7 = vadd.f32 %v2011_v2, %v1975_v26  ;;  %v2032_v42 = vadd.f32 %v2029_v48, %v1993_v46  ;;  %v3925_v2 = vpop.permute.xlu0 %741 }
  0x9d   : > { %v671_v63 = vadd.f32 %v668_v56, %v631_v53  ;;  %v689_v62 = vadd.f32 %v686_v43, %v649_v0  ;;  %v670_v41 = vadd.f32 %v667_v44, %v630_v9  ;;  %v688_v10 = vadd.f32 %v685_v50, %v648_v6 }
  0x9e   : > { %v2047_v49 = vmul.f32 %v4880_v35, %v3781_v4  ;;  %v2065_v1 = vmul.f32 %v4881_v60, %v3781_v4  ;;  %v4882_v43 = vrot.slane %v3676_v18, %v3669_v15  ;;  %v4883_v12 = vrot.slane %v3679_v19, %v3669_v15 }
  0x9f   : > { %v711_v21 = vadd.f32 %v708_v5, %v671_v63  ;;  %v729_v55 = vadd.f32 %v726_v45, %v689_v62  ;;  %v710_v54 = vadd.f32 %v707_v27, %v670_v41  ;;  %v728_v56 = vadd.f32 %v725_v29, %v688_v10 }
  0xa0   : > { %v2083_v8 = vmul.f32 %v4882_v43, %v3817_v58  ;;  %v2101_v24 = vmul.f32 %v4883_v12, %v3817_v58  ;;  %v2050_v44 = vadd.f32 %v2047_v49, %v2014_v7  ;;  %v2068_v50 = vadd.f32 %v2065_v1, %v2032_v42 }
  0xa1   : > { %v737_v25 = vmul.f32 %v3905_v51, %v711_v21  ;;  %v751_v38 = vmul.f32 %v3905_v51, %v729_v55  ;;  %v736_v48 = vmul.f32 %v3905_v51, %v710_v54  ;;  %v750_v59 = vmul.f32 %v3905_v51, %v728_v56 }
  0xa2   : > { %v4884_v57 = vrot.slane %v3688_v23, %v3665_v13  ;;  %v4885_v30 = vrot.slane %v3699_v28, %v3665_v13  ;;  %v2086_v40 = vadd.f32 %v2083_v8, %v2050_v44  ;;  %v2104_v53 = vadd.f32 %v2101_v24, %v2068_v50 }
  0xa3   : > { %v745_v37 = vadd.f32 %v3925_v2, %v737_v25  ;;  %v754_v39 = vadd.f32 %v751_v38, %v3925_v2  ;;  %v744_v0 = vadd.f32 %v3925_v2, %v736_v48  ;;  %v753_v5 = vadd.f32 %v750_v59, %v3925_v2 }
  0xa4   : > { %v2012_v52 = vmul.f32 %v4884_v57, %v3779_v3  ;;  %v2030_v31 = vmul.f32 %v4885_v30, %v3779_v3  ;;  %v4886_v45 = vrot.slane %v3688_v23, %v3667_v14  ;;  %v4887_v6 = vrot.slane %v3699_v28, %v3667_v14 }
  0xa5   : > { %v748_v29 = vmax.f32 %v745_v37, 0.0  ;;  %v757_v63 = vmax.f32 %v754_v39, 0.0  ;;  %v4888_v62 = vrot.slane %v3676_v18, %v3671_v16  ;;  %v4889_v36 = vrot.slane %v3679_v19, %v3671_v16 }
  0xa6   : > { %v2048_v9 = vmul.f32 %v4886_v45, %v3781_v4  ;;  %v2066_v27 = vmul.f32 %v4887_v6, %v3781_v4  ;;  %v747_v41 = vmax.f32 %v744_v0, 0.0  ;;  %v756_v10 = vmax.f32 %v753_v5, 0.0 }
  0xa7   : > { %v2119_v26 = vmul.f32 %v4888_v62, %v3859_v34  ;;  %v2137_v46 = vmul.f32 %v4889_v36, %v3859_v34  ;;  %v4890_v35 = vrot.slane %v3676_v18, %v3673_v17  ;;  %v4891_v60 = vrot.slane %v3679_v19, %v3673_v17 }
  0xa8   : > { %v760_v21 = vmax.f32 %v748_v29, %v757_v63  ;;  %v4892_v42 = vrot.slane %v3676_v18, %v3681_v20  ;;  %v759_v56 = vmax.f32 %v747_v41, %v756_v10  ;;  %v4893_v43 = vrot.slane %v3679_v19, %v3681_v20 }
  0xa9   : > { %v2155_v49 = vmul.f32 %v4890_v35, %v3815_v61  ;;  %v2173_v1 = vmul.f32 %v4891_v60, %v3815_v61  ;;  %v2122_v55 = vadd.f32 %v2119_v26, %v2086_v40  ;;  %v2140_v7 = vadd.f32 %v2137_v46, %v2104_v53 }
  0xaa   : > { %v2191_v54 = vmul.f32 %v4892_v42, %v3885_v22  ;;  %v2209_v8 = vmul.f32 %v4893_v43, %v3885_v22  ;;  %v4894_v12 = vrot.slane %v3688_v23, %v3669_v15  ;;  %v4895_v25 = vrot.slane %v3699_v28, %v3669_v15  ;;  %794 = vxpose.xlu0.b32.start.end [1/1] (short) %v760_v21, 128 }
  0xab   : > { %v2158_v44 = vadd.f32 %v2155_v49, %v2122_v55  ;;  %v2176_v18 = vadd.f32 %v2173_v1, %v2140_v7  ;;  %v4896_v50 = vrot.slane %v3688_v23, %v3660_v11  ;;  %v4897_v19 = vrot.slane %v3699_v28, %v3660_v11  ;;  %762 = vxpose.xlu1.b32.start.end [1/1] (short) %v759_v56, 128 }
  0xac   : > { %v2084_v24 = vmul.f32 %v4894_v12, %v3817_v58  ;;  %v2102_v38 = vmul.f32 %v4895_v25, %v3817_v58  ;;  %v4898_v57 = vrot.slane %v3688_v23, %v3671_v16  ;;  %v4899_v37 = vrot.slane %v3699_v28, %v3671_v16 }
  0xad   : > { %v1976_v48 = vmul.f32 %v4896_v50, %v3857_v32  ;;  %v1994_v59 = vmul.f32 %v4897_v19, %v3857_v32  ;;  %v4900_v40 = vrot.slane %v3688_v23, %v3673_v17  ;;  %v4901_v0 = vrot.slane %v3699_v28, %v3673_v17 }
  0xae   : > { %v2120_v30 = vmul.f32 %v4898_v57, %v3859_v34  ;;  %v2138_v39 = vmul.f32 %v4899_v37, %v3859_v34  ;;  %v2194_v45 = vadd.f32 %v2191_v54, %v2158_v44  ;;  %v2212_v6 = vadd.f32 %v2209_v8, %v2176_v18 }
  0xaf   : > { %v2156_v53 = vmul.f32 %v4900_v40, %v3815_v61  ;;  %v2174_v5 = vmul.f32 %v4901_v0, %v3815_v61  ;;  %v2015_v29 = vadd.f32 %v2012_v52, %v1976_v48  ;;  %v2033_v63 = vadd.f32 %v2030_v31, %v1994_v59 }
  0xb0   : > { %v4902_v62 = vrot.slane %v3688_v23, %v3681_v20  ;;  %v4903_v36 = vrot.slane %v3710_v33, %v3660_v11  ;;  %v4904_v41 = vrot.slane %v3739_v47, %v3660_v11  ;;  %v4905_v52 = vrot.slane %v3710_v33, %v3665_v13 }
  0xb1   : > { %v2215_v35 = vmul.f32 %v2194_v45, %v3905_v51  ;;  %v2224_v23 = vmul.f32 %v2212_v6, %v3905_v51  ;;  %v2051_v49 = vadd.f32 %v2048_v9, %v2015_v29  ;;  %v2069_v60 = vadd.f32 %v2066_v27, %v2033_v63 }
  0xb2   : > { %v2192_v26 = vmul.f32 %v4902_v62, %v3885_v22  ;;  %v1977_v46 = vmul.f32 %v4903_v36, %v3857_v32  ;;  %v1995_v10 = vmul.f32 %v4904_v41, %v3857_v32  ;;  %v2013_v31 = vmul.f32 %v4905_v52, %v3779_v3 }
  0xb3   : > { %v4906_v1 = vrot.slane %v3699_v28, %v3681_v20  ;;  %v4907_v7 = vrot.slane %v3739_v47, %v3665_v13  ;;  %v4908_v54 = vrot.slane %v3710_v33, %v3667_v14  ;;  %v2218_v43 = vadd.f32 %v2215_v35, %v3925_v2 }
  0xb4   : > { %v2016_v55 = vadd.f32 %v2013_v31, %v1977_v46  ;;  %v2227_v9 = vadd.f32 %v2224_v23, %v3925_v2  ;;  %v2087_v27 = vadd.f32 %v2084_v24, %v2051_v49  ;;  %v2105_v8 = vadd.f32 %v2102_v38, %v2069_v60 }
  0xb5   : > { %v2210_v21 = vmul.f32 %v4906_v1, %v3885_v22  ;;  %v2031_v42 = vmul.f32 %v4907_v7, %v3779_v3  ;;  %v2049_v56 = vmul.f32 %v4908_v54, %v3781_v4  ;;  %v4909_v25 = vrot.slane %v3739_v47, %v3667_v14  ;;  %v449_v7 = vld [vmem:[%s3658_s30 + $0x10] sm:$0x7f] }
  0xb6   : > { %v4910_v18 = vrot.slane %v3710_v33, %v3669_v15  ;;  %v2221_v48 = vmax.f32 %v2218_v43, 0.0  ;;  %v2230_v19 = vmax.f32 %v2227_v9, 0.0  ;;  %v2123_v59 = vadd.f32 %v2120_v30, %v2087_v27 }
  0xb7   : > { %v2034_v12 = vadd.f32 %v2031_v42, %v1995_v10  ;;  %v2052_v28 = vadd.f32 %v2049_v56, %v2016_v55  ;;  %v2067_v44 = vmul.f32 %v4909_v25, %v3781_v4  ;;  %v2141_v57 = vadd.f32 %v2138_v39, %v2105_v8  ;;  %v446_v55 = vld [vmem:[%s3653_s27 + $0x10] sm:$0x7f] }
  0xb8   : > { %v2085_v50 = vmul.f32 %v4910_v18, %v3817_v58  ;;  %v4911_v24 = vrot.slane %v3739_v47, %v3669_v15  ;;  %v4912_v0 = vrot.slane %v3710_v33, %v3671_v16  ;;  %v4053_v6 = vmax.f32 %v2221_v48, %v2230_v19 }
  0xb9   : > { %v2070_v37 = vadd.f32 %v2067_v44, %v2034_v12  ;;  %v2159_v29 = vadd.f32 %v2156_v53, %v2123_v59  ;;  %v2177_v63 = vadd.f32 %v2174_v5, %v2141_v57  ;;  %v4913_v30 = vrot.slane %v3739_v47, %v3671_v16 }
  0xba   : > { %v2088_v40 = vadd.f32 %v2085_v50, %v2052_v28  ;;  %v2103_v38 = vmul.f32 %v4911_v24, %v3817_v58  ;;  %v2121_v45 = vmul.f32 %v4912_v0, %v3859_v34  ;;  %v4914_v46 = vrot.slane %v3710_v33, %v3673_v17 }
  0xbb   : > { %v2139_v39 = vmul.f32 %v4913_v30, %v3859_v34  ;;  %v4915_v10 = vrot.slane %v3710_v33, %v3681_v20  ;;  %v2195_v31 = vadd.f32 %v2192_v26, %v2159_v29  ;;  %v2213_v53 = vadd.f32 %v2210_v21, %v2177_v63 }
  0xbc   : > { %v2106_v62 = vadd.f32 %v2103_v38, %v2070_v37  ;;  %v2124_v36 = vadd.f32 %v2121_v45, %v2088_v40  ;;  %v2157_v41 = vmul.f32 %v4914_v46, %v3815_v61  ;;  %v4916_v23 = vrot.slane %v3739_v47, %v3673_v17 }
  0xbd   : > { %v2193_v52 = vmul.f32 %v4915_v10, %v3885_v22  ;;  %v4917_v60 = vrot.slane %v3739_v47, %v3681_v20  ;;  %v2216_v42 = vmul.f32 %v2195_v31, %v3905_v51  ;;  %v2225_v33 = vmul.f32 %v2213_v53, %v3905_v51 }
  0xbe   : > { %v2142_v5 = vadd.f32 %v2139_v39, %v2106_v62  ;;  %v2160_v35 = vadd.f32 %v2157_v41, %v2124_v36  ;;  %v2175_v49 = vmul.f32 %v4916_v23, %v3815_v61  ;;  %v466_v26 = vrot.slane %v446_v55, %v3660_v11 }
  0xbf   : > { %v2211_v1 = vmul.f32 %v4917_v60, %v3885_v22  ;;  %v484_v21 = vrot.slane %v449_v7, %v3660_v11  ;;  %v2219_v43 = vadd.f32 %v2216_v42, %v3925_v2  ;;  %v2228_v9 = vadd.f32 %v2225_v33, %v3925_v2 }
  0xc0   : > { %v2178_v54 = vadd.f32 %v2175_v49, %v2142_v5  ;;  %v2196_v56 = vadd.f32 %v2193_v52, %v2160_v35  ;;  %v506_v27 = vrot.slane %v446_v55, %v3665_v13  ;;  %v524_v47 = vrot.slane %v449_v7, %v3665_v13 }
  0xc1   : > { %v2222_v28 = vmax.f32 %v2219_v43, 0.0  ;;  %v2231_v25 = vmax.f32 %v2228_v9, 0.0  ;;  %v469_v44 = vmul.f32 %v466_v26, %v3857_v32  ;;  %v487_v18 = vmul.f32 %v484_v21, %v3857_v32 }
  0xc2   : > { %v2214_v8 = vadd.f32 %v2211_v1, %v2178_v54  ;;  %v2217_v12 = vmul.f32 %v2196_v56, %v3905_v51  ;;  %v546_v48 = vrot.slane %v446_v55, %v3667_v14  ;;  %v564_v19 = vrot.slane %v449_v7, %v3667_v14 }
  0xc3   : > { %v4092_v59 = vmax.f32 %v2222_v28, %v2231_v25  ;;  %v509_v13 = vmul.f32 %v506_v27, %v3779_v3  ;;  %v527_v57 = vmul.f32 %v524_v47, %v3779_v3  ;;  %v586_v0 = vrot.slane %v446_v55, %v3669_v15 }
  0xc4   : > { %v2220_v11 = vadd.f32 %v2217_v12, %v3925_v2  ;;  %v2226_v50 = vmul.f32 %v2214_v8, %v3905_v51  ;;  %v549_v45 = vmul.f32 %v546_v48, %v3781_v4  ;;  %v567_v29 = vmul.f32 %v564_v19, %v3781_v4 }
  0xc5   : > { %v512_v24 = vadd.f32 %v509_v13, %v469_v44  ;;  %v530_v38 = vadd.f32 %v527_v57, %v487_v18  ;;  %v604_v14 = vrot.slane %v449_v7, %v3669_v15  ;;  %v589_v3 = vmul.f32 %v586_v0, %v3817_v58 }
  0xc6   : > { %v2223_v37 = vmax.f32 %v2220_v11, 0.0  ;;  %v2229_v40 = vadd.f32 %v2226_v50, %v3925_v2  ;;  %v626_v36 = vrot.slane %v446_v55, %v3671_v16  ;;  %v644_v46 = vrot.slane %v449_v7, %v3671_v16 }
  0xc7   : > { %v552_v30 = vadd.f32 %v549_v45, %v512_v24  ;;  %v570_v39 = vadd.f32 %v567_v29, %v530_v38  ;;  %v607_v62 = vmul.f32 %v604_v14, %v3817_v58  ;;  %v666_v15 = vrot.slane %v446_v55, %v3673_v17 }
  0xc8   : > { %v2232_v32 = vmax.f32 %v2229_v40, 0.0  ;;  %v629_v52 = vmul.f32 %v626_v36, %v3859_v34  ;;  %v647_v4 = vmul.f32 %v644_v46, %v3859_v34  ;;  %v684_v31 = vrot.slane %v449_v7, %v3673_v17 }
  0xc9   : > { %v592_v41 = vadd.f32 %v589_v3, %v552_v30  ;;  %v610_v10 = vadd.f32 %v607_v62, %v570_v39  ;;  %v706_v35 = vrot.slane %v446_v55, %v3681_v20  ;;  %v724_v58 = vrot.slane %v449_v7, %v3681_v20 }
  0xca   : > { %v4101_v63 = vmax.f32 %v2223_v37, %v2232_v32  ;;  %v669_v23 = vmul.f32 %v666_v15, %v3815_v61  ;;  %v687_v16 = vmul.f32 %v684_v31, %v3815_v61 }
  0xcb   : > { %v632_v53 = vadd.f32 %v629_v52, %v592_v41  ;;  %v650_v5 = vadd.f32 %v647_v4, %v610_v10  ;;  %v709_v1 = vmul.f32 %v706_v35, %v3885_v22  ;;  %v727_v34 = vmul.f32 %v724_v58, %v3885_v22 }
  0xcd   : > { %v672_v49 = vadd.f32 %v669_v23, %v632_v53  ;;  %v690_v60 = vadd.f32 %v687_v16, %v650_v5 }
  0xcf   : > { %v712_v42 = vadd.f32 %v709_v1, %v672_v49  ;;  %v730_v33 = vadd.f32 %v727_v34, %v690_v60 }
  0xd1   : > { %v738_v17 = vmul.f32 %v3905_v51, %v712_v42  ;;  %v752_v26 = vmul.f32 %v3905_v51, %v730_v33 }
  0xd3   : > { %v746_v55 = vadd.f32 %v3925_v2, %v738_v17  ;;  %v755_v20 = vadd.f32 %v752_v26, %v3925_v2 }
  0xd5   : > { %v749_v7 = vmax.f32 %v746_v55, 0.0  ;;  %v758_v21 = vmax.f32 %v755_v20, 0.0 }
  0xd7   : > { %v761_v54 = vmax.f32 %v749_v7, %v758_v21 }
  0xe7   : > { %826 = vxpose.xlu0.b32.start.end [1/1] (short) (narrow) %v761_v54, 64 }
 0x126   : > { %v810_v61 = vpop.trf.xlu0 }
 0x127   : > { %875 = vst.msk [vmem:[#allocation2 + $0x80] sm:$0xff] %vm858_vm0, %v810_v61  ;;  %v778_v56 = vpop.trf.xlu1 }
 0x128   : > { %859 = vst.msk [vmem:[#allocation2] sm:$0xff] %vm858_vm0, %v778_v56 }
 0x12a   : > { %v811_v22 = vpop.trf.xlu0 }
 0x12b   : > { %876 = vst.msk [vmem:[#allocation2 + $0x88] sm:$0xff] %vm858_vm0, %v811_v22  ;;  %v779_v43 = vpop.trf.xlu1 }
 0x12c   : > { %860 = vst.msk [vmem:[#allocation2 + $0x8] sm:$0xff] %vm858_vm0, %v779_v43 }
 0x12e   : > { %v812_v51 = vpop.trf.xlu0 }
 0x12f   : > { %877 = vst.msk [vmem:[#allocation2 + $0x90] sm:$0xff] %vm858_vm0, %v812_v51  ;;  %v780_v2 = vpop.trf.xlu1 }
 0x130   : > { %861 = vst.msk [vmem:[#allocation2 + $0x10] sm:$0xff] %vm858_vm0, %v780_v2 }
 0x132   : > { %v813_v9 = vpop.trf.xlu0 }
 0x133   : > { %878 = vst.msk [vmem:[#allocation2 + $0x98] sm:$0xff] %vm858_vm0, %v813_v9  ;;  %v781_v27 = vpop.trf.xlu1 }
 0x134   : > { %862 = vst.msk [vmem:[#allocation2 + $0x18] sm:$0xff] %vm858_vm0, %v781_v27 }
 0x136   : > { %v814_v47 = vpop.trf.xlu0 }
 0x137   : > { %879 = vst.msk [vmem:[#allocation2 + $0xa0] sm:$0xff] %vm858_vm0, %v814_v47  ;;  %v782_v8 = vpop.trf.xlu1 }
 0x138   : > { %863 = vst.msk [vmem:[#allocation2 + $0x20] sm:$0xff] %vm858_vm0, %v782_v8 }
 0x13a   : > { %v815_v12 = vpop.trf.xlu0 }
 0x13b   : > { %880 = vst.msk [vmem:[#allocation2 + $0xa8] sm:$0xff] %vm858_vm0, %v815_v12  ;;  %v783_v28 = vpop.trf.xlu1 }
 0x13c   : > { %864 = vst.msk [vmem:[#allocation2 + $0x28] sm:$0xff] %vm858_vm0, %v783_v28 }
 0x13e   : > { %v816_v25 = vpop.trf.xlu0 }
 0x13f   : > { %881 = vst.msk [vmem:[#allocation2 + $0xb0] sm:$0xff] %vm858_vm0, %v816_v25  ;;  %v784_v44 = vpop.trf.xlu1 }
 0x140   : > { %865 = vst.msk [vmem:[#allocation2 + $0x30] sm:$0xff] %vm858_vm0, %v784_v44 }
 0x142   : > { %v817_v18 = vpop.trf.xlu0 }
 0x143   : > { %882 = vst.msk [vmem:[#allocation2 + $0xb8] sm:$0xff] %vm858_vm0, %v817_v18  ;;  %v785_v11 = vpop.trf.xlu1  ;;  %v942_v50 = vld [vmem:[#allocation2 + $0x1] ss:$6 sm:$0xff]  ;;  %v1042_v19 = vld [vmem:[#allocation2 + $0x2] ss:$6 sm:$0xff] }
 0x144   : > { %866 = vst.msk [vmem:[#allocation2 + $0x38] sm:$0xff] %vm858_vm0, %v785_v11  ;;  %962 = vrot.lane.b32.xlu1 %v942_v50, %s3560_s14  ;;  %v1093_v48 = vld [vmem:[#allocation2 + $0x5] ss:$6 sm:$0xff]  ;;  %v900_v13 = vld [vmem:[#allocation2] ss:$6 sm:$0xff] }
 0x145   : > { %1113 = vrot.lane.b32.xlu0 %v1093_v48, %s3561_s15  ;;  %913 = vst.msk [vmem:[#allocation3] sm:$0xff] %vm858_vm0, %v900_v13  ;;  %v921_v37 = vld [vmem:[#allocation2 + $0x3] ss:$6 sm:$0xff]  ;;  %v1234_v45 = vld [vmem:[#allocation2 + $0x4] ss:$6 sm:$0xff] }
 0x146   : > { %v818_v57 = vpop.trf.xlu0  ;;  %934 = vst.msk [vmem:[#allocation3 + $0x34] sm:$0xff] %vm858_vm0, %v921_v37  ;;  %v1141_v24 = vld [vmem:[#allocation2 + $0x3] ss:$6 sm:$0xff]  ;;  %v993_v36 = vld [vmem:[#allocation2 + $0x4] ss:$6 sm:$0xff] }
 0x147   : > { %883 = vst.msk [vmem:[#allocation2 + $0xc0] sm:$0xff] %vm858_vm0, %v818_v57  ;;  %v786_v40 = vpop.trf.xlu1  ;;  %v1327_v39 = vld [vmem:[#allocation2 + $0x5] ss:$6 sm:$0xff]  ;;  %v1420_v4 = vld [vmem:[#allocation2 + $0x6] ss:$6 sm:$0xff] }
 0x148   : > { %867 = vst.msk [vmem:[#allocation2 + $0x40] sm:$0xff] %vm858_vm0, %v786_v40  ;;  %1062 = vrot.lane.b32.xlu1 %v1042_v19, %s3561_s15  ;;  %v1186_v43 = vld [vmem:[#allocation2 + $0x6] ss:$6 sm:$0xff]  ;;  %v1279_v2 = vld [vmem:[#allocation2 + $0x7] ss:$6 sm:$0xff] }
 0x149   : > { %v1372_v47 = vld [vmem:[#allocation2 + $0x8] ss:$6 sm:$0xff]  ;;  %v1465_v8 = vld [vmem:[#allocation2 + $0x9] ss:$6 sm:$0xff] }
 0x14a   : > { %v819_v38 = vpop.trf.xlu0  ;;  %v906_v0 = vld [vmem:[#allocation2 + $0x90] ss:$6 sm:$0xff]  ;;  %v927_v29 = vld [vmem:[#allocation2 + $0x93] ss:$6 sm:$0xff] }
 0x14b   : > { %884 = vst.msk [vmem:[#allocation2 + $0xc8] sm:$0xff] %vm858_vm0, %v819_v38  ;;  %v787_v32 = vpop.trf.xlu1  ;;  %916 = vst.msk [vmem:[#allocation3 + $0x18] sm:$0xff] %vm858_vm0, %v906_v0  ;;  %v948_v12 = vld [vmem:[#allocation2 + $0x91] ss:$6 sm:$0xff]  ;;  %v1048_v28 = vld [vmem:[#allocation2 + $0x92] ss:$6 sm:$0xff] }
 0x14c   : > { %868 = vst.msk [vmem:[#allocation2 + $0x48] sm:$0xff] %vm858_vm0, %v787_v32  ;;  %1155 = vrot.lane.b32.xlu1 %v1141_v24, %s3562_s16  ;;  %937 = vst.msk [vmem:[#allocation3 + $0x4c] sm:$0xff] %vm858_vm0, %v927_v29  ;;  %v1144_v44 = vld [vmem:[#allocation2 + $0x93] ss:$6 sm:$0xff]  ;;  %v1237_v11 = vld [vmem:[#allocation2 + $0x94] ss:$6 sm:$0xff] }
 0x14d   : > { %v1330_v48 = vld [vmem:[#allocation2 + $0x95] ss:$6 sm:$0xff]  ;;  %v999_v37 = vld [vmem:[#allocation2 + $0x94] ss:$6 sm:$0xff] }
 0x14e   : > { %v820_v14 = vpop.trf.xlu0  ;;  %v1099_v24 = vld [vmem:[#allocation2 + $0x95] ss:$6 sm:$0xff]  ;;  %v1423_v0 = vld [vmem:[#allocation2 + $0x96] ss:$6 sm:$0xff] }
 0x14f   : > { %885 = vst.msk [vmem:[#allocation2 + $0xd0] sm:$0xff] %vm858_vm0, %v820_v14  ;;  %v788_v30 = vpop.trf.xlu1 }
 0x150   : > { %869 = vst.msk [vmem:[#allocation2 + $0x50] sm:$0xff] %vm858_vm0, %v788_v30  ;;  %1248 = vrot.lane.b32.xlu1 %v1234_v45, %s3563_s18 }
 0x152   : > { %v821_v3 = vpop.trf.xlu0 }
 0x153   : > { %886 = vst.msk [vmem:[#allocation2 + $0xd8] sm:$0xff] %vm858_vm0, %v821_v3  ;;  %v789_v62 = vpop.trf.xlu1 }
 0x154   : > { %870 = vst.msk [vmem:[#allocation2 + $0x58] sm:$0xff] %vm858_vm0, %v789_v62  ;;  %1341 = vrot.lane.b32.xlu1 %v1327_v39, %s3564_s19 }
 0x156   : > { %v822_v46 = vpop.trf.xlu0 }
 0x157   : > { %887 = vst.msk [vmem:[#allocation2 + $0xe0] sm:$0xff] %vm858_vm0, %v822_v46  ;;  %v790_v41 = vpop.trf.xlu1 }
 0x158   : > { %871 = vst.msk [vmem:[#allocation2 + $0x60] sm:$0xff] %vm858_vm0, %v790_v41  ;;  %1013 = vrot.lane.b32.xlu1 %v993_v36, %s3560_s14 }
 0x15a   : > { %v823_v10 = vpop.trf.xlu0 }
 0x15b   : > { %888 = vst.msk [vmem:[#allocation2 + $0xe8] sm:$0xff] %vm858_vm0, %v823_v10  ;;  %v791_v52 = vpop.trf.xlu1  ;;  %v902_v15 = vld [vmem:[#allocation2 + $0x30] ss:$6 sm:$0xff]  ;;  %v923_v31 = vld [vmem:[#allocation2 + $0x33] ss:$6 sm:$0xff] }
 0x15c   : > { %872 = vst.msk [vmem:[#allocation2 + $0x68] sm:$0xff] %vm858_vm0, %v791_v52  ;;  %1434 = vrot.lane.b32.xlu1 %v1420_v4, %s3565_s20  ;;  %914 = vst.msk [vmem:[#allocation3 + $0x8] sm:$0xff] %vm858_vm0, %v902_v15  ;;  %v944_v25 = vld [vmem:[#allocation2 + $0x31] ss:$6 sm:$0xff]  ;;  %v995_v18 = vld [vmem:[#allocation2 + $0x34] ss:$6 sm:$0xff] }
 0x15d   : > { %935 = vst.msk [vmem:[#allocation3 + $0x3c] sm:$0xff] %vm858_vm0, %v923_v31  ;;  %v1044_v14 = vld [vmem:[#allocation2 + $0x32] ss:$6 sm:$0xff]  ;;  %v1142_v3 = vld [vmem:[#allocation2 + $0x33] ss:$6 sm:$0xff]  ;;  %v3566_v52 = vmov 0.0  }
 0x15e   : > { %v824_v53 = vpop.trf.xlu0  ;;  %v1235_v36 = vld [vmem:[#allocation2 + $0x34] ss:$6 sm:$0xff]  ;;  %3396 = vmatprep.subr.bf16.mxu0 %v3566_v52  ;;  %3428 = vmatprep.subr.bf16.mxu1 %v3566_v52  ;;  %v1328_v31 = vld [vmem:[#allocation2 + $0x35] ss:$6 sm:$0xff] }
 0x15f   : > { %889 = vst.msk [vmem:[#allocation2 + $0xf0] sm:$0xff] %vm858_vm0, %v824_v53  ;;  %v792_v5 = vpop.trf.xlu1  ;;  %v1188_v50 = vld [vmem:[#allocation2 + $0x36] ss:$6 sm:$0xff]  ;;  %3400 = vmatprep.mubr.msk.bf16.mxu0 %vm3567_vm9, %v3566_v52  ;;  %3442 = vmatprep.mubr.msk.bf16.mxu1 %vm3567_vm9, %v3566_v52 }
 0x160   : > { %873 = vst.msk [vmem:[#allocation2 + $0x70] sm:$0xff] %vm858_vm0, %v792_v5  ;;  %v1374_v19 = vld [vmem:[#allocation2 + $0x38] ss:$6 sm:$0xff] }
 0x161   : > { %v3533_v10 = vld [vmem:[%s4862_s5 + $0x8] sm:$0x3f]   ;;  %v3534_v5 = vld [vmem:[%s4862_s5] sm:$0xff]  }
 0x162   : > { %v825_v35 = vpop.trf.xlu0  ;;  %v908_v23 = vld [vmem:[#allocation2 + $0xc0] ss:$6 sm:$0xff]  ;;  %v929_v16 = vld [vmem:[#allocation2 + $0xc3] ss:$6 sm:$0xff]  ;;  %v4223_v4 = vsel %vm1566_vm6, %v3533_v10, 0  ;;  %vm4869_vm6 = vcmask 228352  }
 0x163   : > { %890 = vst.msk [vmem:[#allocation2 + $0xf8] sm:$0xff] %vm858_vm0, %v825_v35  ;;  %v793_v58 = vpop.trf.xlu1  ;;  %917 = vst.msk [vmem:[#allocation3 + $0x20] sm:$0xff] %vm858_vm0, %v908_v23  ;;  %v950_v57 = vld [vmem:[#allocation2 + $0xc1] ss:$6 sm:$0xff]  ;;  %v1050_v40 = vld [vmem:[#allocation2 + $0xc2] ss:$6 sm:$0xff]  ;;  %3397 = vmatpush3.bf16.msra.mxu0 %v4223_v4 }
 0x164   : > { %874 = vst.msk [vmem:[#allocation2 + $0x78] sm:$0xff] %vm858_vm0, %v793_v58  ;;  %938 = vst.msk [vmem:[#allocation3 + $0x54] sm:$0xff] %vm858_vm0, %v929_v16  ;;  %v1145_v38 = vld [vmem:[#allocation2 + $0xc3] ss:$6 sm:$0xff]  ;;  %v1238_v45 = vld [vmem:[#allocation2 + $0xc4] ss:$6 sm:$0xff]  ;;  %3398 = vmatprep.subr.bf16.mxu0 %v3566_v52 }
 0x165   : > { %v1331_v30 = vld [vmem:[#allocation2 + $0xc5] ss:$6 sm:$0xff]  ;;  %v1095_v23 = vld [vmem:[#allocation2 + $0x35] ss:$6 sm:$0xff] }
 0x166   : > { %v842_v49 = vpop.trf.xlu0  ;;  %v1424_v62 = vld [vmem:[#allocation2 + $0xc6] ss:$6 sm:$0xff] }
 0x167   : > { %891 = vst.msk [vmem:[#allocation2 + $0x100] sm:$0xff] %vm858_vm0, %v842_v49  ;;  %3399 = vmatpush3.bf16.msra.mxu0 %v3534_v5 }
 0x168   : > { %3478 = vmatprep.subr.bf16.mxu0 %v3566_v52 }
 0x16a   : > { %v843_v60 = vpop.trf.xlu0 }
 0x16b   : > { %892 = vst.msk [vmem:[#allocation2 + $0x108] sm:$0xff] %vm858_vm0, %v843_v60  ;;  %v904_v34 = vld [vmem:[#allocation2 + $0x60] ss:$6 sm:$0xff]  ;;  %v925_v42 = vld [vmem:[#allocation2 + $0x63] ss:$6 sm:$0xff] }
 0x16c   : > { %915 = vst.msk [vmem:[#allocation3 + $0x10] sm:$0xff] %vm858_vm0, %v904_v34  ;;  %936 = vst.msk [vmem:[#allocation3 + $0x44] sm:$0xff] %vm858_vm0, %v925_v42  ;;  %v946_v41 = vld [vmem:[#allocation2 + $0x61] ss:$6 sm:$0xff]  ;;  %v1046_v53 = vld [vmem:[#allocation2 + $0x62] ss:$6 sm:$0xff] }
 0x16d   : > { %v1143_v16 = vld [vmem:[#allocation2 + $0x63] ss:$6 sm:$0xff]  ;;  %v1421_v60 = vld [vmem:[#allocation2 + $0x36] ss:$6 sm:$0xff] }
 0x16e   : > { %v844_v1 = vpop.trf.xlu0  ;;  %v1281_v34 = vld [vmem:[#allocation2 + $0x37] ss:$6 sm:$0xff] }
 0x16f   : > { %893 = vst.msk [vmem:[#allocation2 + $0x110] sm:$0xff] %vm858_vm0, %v844_v1  ;;  %v1236_v1 = vld [vmem:[#allocation2 + $0x64] ss:$6 sm:$0xff]  ;;  %v1329_v42 = vld [vmem:[#allocation2 + $0x65] ss:$6 sm:$0xff] }
 0x172   : > { %v845_v33 = vpop.trf.xlu0 }
 0x173   : > { %894 = vst.msk [vmem:[#allocation2 + $0x118] sm:$0xff] %vm858_vm0, %v845_v33  ;;  %v1467_v33 = vld [vmem:[#allocation2 + $0x39] ss:$6 sm:$0xff] }
 0x176   : > { %v846_v17 = vpop.trf.xlu0 }
 0x177   : > { %895 = vst.msk [vmem:[#allocation2 + $0x120] sm:$0xff] %vm858_vm0, %v846_v17  ;;  %v1422_v17 = vld [vmem:[#allocation2 + $0x66] ss:$6 sm:$0xff] }
 0x17a   : > { %v847_v26 = vpop.trf.xlu0  ;;  %v910_v55 = vld [vmem:[#allocation2 + $0xf0] ss:$6 sm:$0xff]  ;;  %v931_v20 = vld [vmem:[#allocation2 + $0xf3] ss:$6 sm:$0xff] }
 0x17b   : > { %896 = vst.msk [vmem:[#allocation2 + $0x128] sm:$0xff] %vm858_vm0, %v847_v26  ;;  %918 = vst.msk [vmem:[#allocation3 + $0x28] sm:$0xff] %vm858_vm0, %v910_v55  ;;  %v952_v26 = vld [vmem:[#allocation2 + $0xf1] ss:$6 sm:$0xff]  ;;  %v997_v55 = vld [vmem:[#allocation2 + $0x64] ss:$6 sm:$0xff] }
 0x17c   : > { %939 = vst.msk [vmem:[#allocation3 + $0x5c] sm:$0xff] %vm858_vm0, %v931_v20  ;;  %v1052_v20 = vld [vmem:[#allocation2 + $0xf2] ss:$6 sm:$0xff] }
 0x17e   : > { %v848_v7 = vpop.trf.xlu0 }
 0x17f   : > { %897 = vst.msk [vmem:[#allocation2 + $0x130] sm:$0xff] %vm858_vm0, %v848_v7  ;;  %v1097_v7 = vld [vmem:[#allocation2 + $0x65] ss:$6 sm:$0xff] }
 0x182   : > { %v849_v21 = vpop.trf.xlu0 }
 0x183   : > { %899 = vst.msk [vmem:[#allocation2 + $0x138] sm:$0xf] %vm898_vm1, %v849_v21  ;;  %v1146_v21 = vld [vmem:[#allocation2 + $0xf3] ss:$6 sm:$0xff] }
 0x186   : > { %v954_v54 = vld [vmem:[#allocation2 + $0x121] ss:$6 sm:$0xf]  ;;  %v1054_v61 = vld [vmem:[#allocation2 + $0x122] ss:$6 sm:$0xf] }
 0x187   : > { %974 = vrot.lane.b32.xlu0 %v954_v54, %s3560_s14  ;;  %1074 = vrot.lane.b32.xlu1 %v1054_v61, %s3561_s15  ;;  %v912_v56 = vld [vmem:[#allocation2 + $0x120] ss:$6 sm:$0xf]  ;;  %v1147_v22 = vld [vmem:[#allocation2 + $0x123] ss:$6 sm:$0xf] }
 0x188   : > { %919 = vst.msk [vmem:[#allocation3 + $0x30] sm:$0xf] %vm898_vm1, %v912_v56  ;;  %v933_v51 = vld [vmem:[#allocation2 + $0x123] ss:$6 sm:$0xf] }
 0x189   : > { %940 = vst.msk [vmem:[#allocation3 + $0x64] sm:$0xf] %vm898_vm1, %v933_v51  ;;  %v1240_v9 = vld [vmem:[#allocation2 + $0x124] ss:$6 sm:$0xf] }
 0x18a   : > { %v1333_v27 = vld [vmem:[#allocation2 + $0x125] ss:$6 sm:$0xf]  ;;  %v1426_v13 = vld [vmem:[#allocation2 + $0x126] ss:$6 sm:$0xf] }
 0x18b   : > { %1167 = vrot.lane.b32.xlu0 %v1147_v22, %s3562_s16  ;;  %1206 = vrot.lane.b32.xlu1 %v1186_v43, %s3562_s16  ;;  %v1190_v54 = vld [vmem:[#allocation2 + $0x66] ss:$6 sm:$0xff]  ;;  %v1283_v56 = vld [vmem:[#allocation2 + $0x67] ss:$6 sm:$0xff]  ;;  %v1425_v51 = vld [vmem:[#allocation2 + $0xf6] ss:$6 sm:$0xff] }
 0x18c   : > { %v1239_v61 = vld [vmem:[#allocation2 + $0xf4] ss:$6 sm:$0xff]  ;;  %v1332_v22 = vld [vmem:[#allocation2 + $0xf5] ss:$6 sm:$0xff] }
 0x18d   : > { %v1376_v43 = vld [vmem:[#allocation2 + $0x68] ss:$6 sm:$0xff] }
 0x18e   : > { %v1384_v10 = vld [vmem:[#allocation2 + $0x128] ss:$6 sm:$0xf] }
 0x18f   : > { %1299 = vrot.lane.b32.xlu0 %v1279_v2, %s3563_s18  ;;  %1260 = vrot.lane.b32.xlu1 %v1240_v9, %s3563_s18  ;;  %v1469_v2 = vld [vmem:[#allocation2 + $0x69] ss:$6 sm:$0xff]  ;;  %v1192_v9 = vld [vmem:[#allocation2 + $0x96] ss:$6 sm:$0xff] }
 0x193   : > { %1353 = vrot.lane.b32.xlu0 %v1333_v27, %s3564_s19  ;;  %1392 = vrot.lane.b32.xlu1 %v1372_v47, %s3564_s19  ;;  %v1001_v27 = vld [vmem:[#allocation2 + $0xc4] ss:$6 sm:$0xff]  ;;  %v1285_v47 = vld [vmem:[#allocation2 + $0x97] ss:$6 sm:$0xff] }
 0x197   : > { %1485 = vrot.lane.b32.xlu0 %v1465_v8, %s3565_s20  ;;  %968 = vrot.lane.b32.xlu1 %v948_v12, %s3560_s14  ;;  %v1101_v8 = vld [vmem:[#allocation2 + $0xc5] ss:$6 sm:$0xff] }
 0x19b   : > { %1068 = vrot.lane.b32.xlu1 %v1048_v28, %s3561_s15  ;;  %964 = vrot.lane.b32.xlu0 %v944_v25, %s3560_s14  ;;  %v1378_v25 = vld [vmem:[#allocation2 + $0x98] ss:$6 sm:$0xff] }
 0x19f   : > { %1161 = vrot.lane.b32.xlu1 %v1144_v44, %s3562_s16  ;;  %1015 = vrot.lane.b32.xlu0 %v995_v18, %s3560_s14  ;;  %v1194_v44 = vld [vmem:[#allocation2 + $0xc6] ss:$6 sm:$0xff] }
 0x1a3   : > { %1254 = vrot.lane.b32.xlu1 %v1237_v11, %s3563_s18  ;;  %1208 = vrot.lane.b32.xlu0 %v1188_v50, %s3562_s16  ;;  %v1471_v50 = vld [vmem:[#allocation2 + $0x99] ss:$6 sm:$0xff] }
 0x1a7   : > { %1347 = vrot.lane.b32.xlu1 %v1330_v48, %s3564_s19  ;;  %1394 = vrot.lane.b32.xlu0 %v1374_v19, %s3564_s19  ;;  %v1287_v48 = vld [vmem:[#allocation2 + $0xc7] ss:$6 sm:$0xff] }
 0x1ab   : > { %1446 = vrot.lane.b32.xlu1 %v1426_v13, %s3565_s20  ;;  %970 = vrot.lane.b32.xlu0 %v950_v57, %s3560_s14  ;;  %v1003_v57 = vld [vmem:[#allocation2 + $0xf4] ss:$6 sm:$0xff] }
 0x1af   : > { %1019 = vrot.lane.b32.xlu1 %v999_v37, %s3560_s14  ;;  %1070 = vrot.lane.b32.xlu0 %v1050_v40, %s3561_s15  ;;  %v1380_v37 = vld [vmem:[#allocation2 + $0xc8] ss:$6 sm:$0xff] }
 0x1b3   : > { %1119 = vrot.lane.b32.xlu1 %v1099_v24, %s3561_s15  ;;  %1163 = vrot.lane.b32.xlu0 %v1145_v38, %s3562_s16  ;;  %v1103_v38 = vld [vmem:[#allocation2 + $0xf5] ss:$6 sm:$0xff] }
 0x1b6   : > { %v963_v32 = vpop.permute.xlu1 %962 }
 0x1b7   : > { %984 = vst.msk [vmem:[#allocation3] sm:$0xff] %vm983_vm2, %v963_v32  ;;  %1440 = vrot.lane.b32.xlu1 %v1423_v0, %s3565_s20  ;;  %1256 = vrot.lane.b32.xlu0 %v1238_v45, %s3563_s18  ;;  %v1114_v35 = vpop.permute.xlu0 %1113  ;;  %v1473_v32 = vld [vmem:[#allocation2 + $0xc9] ss:$6 sm:$0xff] }
 0x1ba   : > { %v1063_v29 = vpop.permute.xlu1 %1062 }
 0x1bb   : > { %1084 = vst.msk [vmem:[#allocation3] sm:$0xff] %vm1083_vm3, %v1063_v29  ;;  %1064 = vrot.lane.b32.xlu1 %v1044_v14, %s3561_s15  ;;  %1349 = vrot.lane.b32.xlu0 %v1331_v30, %s3564_s19  ;;  %v1196_v29 = vld [vmem:[#allocation2 + $0xf6] ss:$6 sm:$0xff] }
 0x1bc   : > { %v1005_v14 = vld [vmem:[#allocation2 + $0x124] ss:$6 sm:$0xf] }
 0x1be   : > { %v1156_v39 = vpop.permute.xlu1 %1155 }
 0x1bf   : > { %1177 = vst.msk [vmem:[#allocation3] sm:$0xff] %vm1176_vm4, %v1156_v39  ;;  %1157 = vrot.lane.b32.xlu1 %v1142_v3, %s3562_s16  ;;  %1442 = vrot.lane.b32.xlu0 %v1424_v62, %s3565_s20  ;;  %v1289_v3 = vld [vmem:[#allocation2 + $0xf7] ss:$6 sm:$0xff]  ;;  %v1198_v62 = vld [vmem:[#allocation2 + $0x126] ss:$6 sm:$0xf] }
 0x1c2   : > { %v1249_v46 = vpop.permute.xlu1 %1248 }
 0x1c3   : > { %1270 = vst.msk [vmem:[#allocation3] sm:$0xff] %vm1269_vm5, %v1249_v46  ;;  %1250 = vrot.lane.b32.xlu1 %v1235_v36, %s3563_s18  ;;  %966 = vrot.lane.b32.xlu0 %v946_v41, %s3560_s14  ;;  %v1382_v41 = vld [vmem:[#allocation2 + $0xf8] ss:$6 sm:$0xff] }
 0x1c6   : > { %v1342_v15 = vpop.permute.xlu1 %1341 }
 0x1c7   : > { %1363 = vst.msk [vmem:[#allocation3] sm:$0xff] %vm1362_vm7, %v1342_v15  ;;  %1343 = vrot.lane.b32.xlu1 %v1328_v31, %s3564_s19  ;;  %1066 = vrot.lane.b32.xlu0 %v1046_v53, %s3561_s15  ;;  %v1475_v53 = vld [vmem:[#allocation2 + $0xf9] ss:$6 sm:$0xff] }
 0x1ca   : > { %v1014_v58 = vpop.permute.xlu1 %1013 }
 0x1cb   : > { %1034 = vst.msk [vmem:[#allocation3 + $0x34] sm:$0xff] %vm983_vm2, %v1014_v58  ;;  %1115 = vrot.lane.b32.xlu1 %v1095_v23, %s3561_s15  ;;  %1159 = vrot.lane.b32.xlu0 %v1143_v16, %s3562_s16  ;;  %v1105_v58 = vld [vmem:[#allocation2 + $0x125] ss:$6 sm:$0xf] }
 0x1cc   : > { %1134 = vst.msk [vmem:[#allocation3 + $0x34] sm:$0xff] %vm1083_vm3, %v1114_v35 }
 0x1ce   : > { %v1435_v49 = vpop.permute.xlu1 %1434 }
 0x1cf   : > { %1456 = vst.msk [vmem:[#allocation3] sm:$0xff] %vm1455_vm8, %v1435_v49  ;;  %1436 = vrot.lane.b32.xlu1 %v1421_v60, %s3565_s20  ;;  %1252 = vrot.lane.b32.xlu0 %v1236_v1, %s3563_s18  ;;  %v1291_v49 = vld [vmem:[#allocation2 + $0x127] ss:$6 sm:$0xf] }
 0x1d3   : > { %1301 = vrot.lane.b32.xlu1 %v1281_v34, %s3563_s18  ;;  %1345 = vrot.lane.b32.xlu0 %v1329_v42, %s3564_s19  ;;  %v1477_v34 = vld [vmem:[#allocation2 + $0x129] ss:$6 sm:$0xf] }
 0x1d7   : > { %1487 = vrot.lane.b32.xlu1 %v1467_v33, %s3565_s20  ;;  %1438 = vrot.lane.b32.xlu0 %v1422_v17, %s3565_s20 }
 0x1db   : > { %972 = vrot.lane.b32.xlu1 %v952_v26, %s3560_s14  ;;  %1017 = vrot.lane.b32.xlu0 %v997_v55, %s3560_s14 }
 0x1df   : > { %1072 = vrot.lane.b32.xlu1 %v1052_v20, %s3561_s15  ;;  %1117 = vrot.lane.b32.xlu0 %v1097_v7, %s3561_s15 }
 0x1e3   : > { %1165 = vrot.lane.b32.xlu1 %v1146_v21, %s3562_s16  ;;  %1210 = vrot.lane.b32.xlu0 %v1190_v54, %s3562_s16 }
 0x1e7   : > { %1258 = vrot.lane.b32.xlu1 %v1239_v61, %s3563_s18  ;;  %1303 = vrot.lane.b32.xlu0 %v1283_v56, %s3563_s18 }
 0x1eb   : > { %1351 = vrot.lane.b32.xlu1 %v1332_v22, %s3564_s19  ;;  %1396 = vrot.lane.b32.xlu0 %v1376_v43, %s3564_s19 }
 0x1ef   : > { %1444 = vrot.lane.b32.xlu1 %v1425_v51, %s3565_s20  ;;  %1489 = vrot.lane.b32.xlu0 %v1469_v2, %s3565_s20 }
 0x1f3   : > { %1212 = vrot.lane.b32.xlu1 %v1192_v9, %s3562_s16  ;;  %1021 = vrot.lane.b32.xlu0 %v1001_v27, %s3560_s14 }
 0x1f7   : > { %1305 = vrot.lane.b32.xlu1 %v1285_v47, %s3563_s18  ;;  %1121 = vrot.lane.b32.xlu0 %v1101_v8, %s3561_s15 }
 0x1f9   : > { %v975_v12 = vpop.permute.xlu0 %974  ;;  %v1075_v28 = vpop.permute.xlu1 %1074 }
 0x1fa   : > { %991 = vst.msk [vmem:[#allocation3 + $0x30] sm:$0xf] %vm990_vm10, %v975_v12  ;;  %v1513_v12 = vld [vmem:[#allocation3] sm:$0xff] }
 0x1fb   : > { %1091 = vst.msk [vmem:[#allocation3 + $0x30] sm:$0xf] %vm1090_vm11, %v1075_v28  ;;  %1398 = vrot.lane.b32.xlu1 %v1378_v25, %s3564_s19  ;;  %1214 = vrot.lane.b32.xlu0 %v1194_v44, %s3562_s16 }
 0x1fd   : > { %v1168_v18 = vpop.permute.xlu0 %1167  ;;  %v1207_v11 = vpop.permute.xlu1 %1206 }
 0x1fe   : > { %1184 = vst.msk [vmem:[#allocation3 + $0x30] sm:$0xf] %vm1183_vm12, %v1168_v18 }
 0x1ff   : > { %1227 = vst.msk [vmem:[#allocation3 + $0x34] sm:$0xff] %vm1176_vm4, %v1207_v11  ;;  %1491 = vrot.lane.b32.xlu1 %v1471_v50, %s3565_s20  ;;  %1307 = vrot.lane.b32.xlu0 %v1287_v48, %s3563_s18 }
 0x201   : > { %v1300_v19 = vpop.permute.xlu0 %1299  ;;  %v1261_v13 = vpop.permute.xlu1 %1260 }
 0x202   : > { %1320 = vst.msk [vmem:[#allocation3 + $0x34] sm:$0xff] %vm1269_vm5, %v1300_v19 }
 0x203   : > { %1277 = vst.msk [vmem:[#allocation3 + $0x30] sm:$0xf] %vm1276_vm13, %v1261_v13  ;;  %1023 = vrot.lane.b32.xlu1 %v1003_v57, %s3560_s14  ;;  %1400 = vrot.lane.b32.xlu0 %v1380_v37, %s3564_s19 }
 0x205   : > { %v1354_v40 = vpop.permute.xlu0 %1353  ;;  %v1393_v24 = vpop.permute.xlu1 %1392 }
 0x206   : > { %1370 = vst.msk [vmem:[#allocation3 + $0x30] sm:$0xf] %vm1369_vm14, %v1354_v40 }
 0x207   : > { %1413 = vst.msk [vmem:[#allocation3 + $0x34] sm:$0xff] %vm1362_vm7, %v1393_v24  ;;  %1123 = vrot.lane.b32.xlu1 %v1103_v38, %s3561_s15  ;;  %1493 = vrot.lane.b32.xlu0 %v1473_v32, %s3565_s20 }
 0x209   : > { %v1486_v0 = vpop.permute.xlu0 %1485  ;;  %v969_v45 = vpop.permute.xlu1 %968 }
 0x20a   : > { %1506 = vst.msk [vmem:[#allocation3 + $0x34] sm:$0xff] %vm1455_vm8, %v1486_v0 }
 0x20b   : > { %987 = vst.msk [vmem:[#allocation3 + $0x18] sm:$0xff] %vm983_vm2, %v969_v45  ;;  %1216 = vrot.lane.b32.xlu1 %v1196_v29, %s3562_s16  ;;  %1025 = vrot.lane.b32.xlu0 %v1005_v14, %s3560_s14 }
 0x20d   : > { %v965_v30 = vpop.permute.xlu0 %964  ;;  %v1069_v39 = vpop.permute.xlu1 %1068 }
 0x20e   : > { %985 = vst.msk [vmem:[#allocation3 + $0x8] sm:$0xff] %vm983_vm2, %v965_v30 }
 0x20f   : > { %1087 = vst.msk [vmem:[#allocation3 + $0x18] sm:$0xff] %vm1083_vm3, %v1069_v39  ;;  %1309 = vrot.lane.b32.xlu1 %v1289_v3, %s3563_s18  ;;  %1218 = vrot.lane.b32.xlu0 %v1198_v62, %s3562_s16 }
 0x211   : > { %v1016_v36 = vpop.permute.xlu0 %1015  ;;  %v1162_v46 = vpop.permute.xlu1 %1161 }
 0x212   : > { %1035 = vst.msk [vmem:[#allocation3 + $0x3c] sm:$0xff] %vm983_vm2, %v1016_v36 }
 0x213   : > { %1180 = vst.msk [vmem:[#allocation3 + $0x18] sm:$0xff] %vm1176_vm4, %v1162_v46  ;;  %1402 = vrot.lane.b32.xlu1 %v1382_v41, %s3564_s19  ;;  %1404 = vrot.lane.b32.xlu0 %v1384_v10, %s3564_s19 }
 0x215   : > { %v1209_v15 = vpop.permute.xlu0 %1208  ;;  %v1255_v31 = vpop.permute.xlu1 %1254 }
 0x216   : > { %1273 = vst.msk [vmem:[#allocation3 + $0x18] sm:$0xff] %vm1269_vm5, %v1255_v31 }
 0x217   : > { %1495 = vrot.lane.b32.xlu1 %v1475_v53, %s3565_s20 }
 0x219   : > { %v1395_v5 = vpop.permute.xlu0 %1394  ;;  %v1348_v35 = vpop.permute.xlu1 %1347 }
 0x21a   : > { %1366 = vst.msk [vmem:[#allocation3 + $0x18] sm:$0xff] %vm1362_vm7, %v1348_v35 }
 0x21b   : > { %1125 = vrot.lane.b32.xlu1 %v1105_v58, %s3561_s15 }
 0x21d   : > { %v971_v23 = vpop.permute.xlu0 %970  ;;  %v1447_v16 = vpop.permute.xlu1 %1446 }
 0x21e   : > { %988 = vst.msk [vmem:[#allocation3 + $0x20] sm:$0xff] %vm983_vm2, %v971_v23 }
 0x21f   : > { %1463 = vst.msk [vmem:[#allocation3 + $0x30] sm:$0xf] %vm4875_vm15, %v1447_v16  ;;  %1311 = vrot.lane.b32.xlu1 %v1291_v49, %s3563_s18 }
 0x221   : > { %v1071_v60 = vpop.permute.xlu0 %1070  ;;  %v1020_v1 = vpop.permute.xlu1 %1019 }
 0x222   : > { %1088 = vst.msk [vmem:[#allocation3 + $0x20] sm:$0xff] %vm1083_vm3, %v1071_v60 }
 0x223   : > { %1037 = vst.msk [vmem:[#allocation3 + $0x4c] sm:$0xff] %vm983_vm2, %v1020_v1  ;;  %1497 = vrot.lane.b32.xlu1 %v1477_v34, %s3565_s20 }
 0x225   : > { %v1164_v42 = vpop.permute.xlu0 %1163  ;;  %v1120_v33 = vpop.permute.xlu1 %1119 }
 0x226   : > { %1181 = vst.msk [vmem:[#allocation3 + $0x20] sm:$0xff] %vm1176_vm4, %v1164_v42  ;;  %v1519_v10 = vld [vmem:[#allocation3 + $0x30] sm:$0xff] }
 0x227   : > { %1137 = vst.msk [vmem:[#allocation3 + $0x4c] sm:$0xff] %vm1083_vm3, %v1120_v33 }
 0x229   : > { %v1257_v17 = vpop.permute.xlu0 %1256  ;;  %v1441_v26 = vpop.permute.xlu1 %1440 }
 0x22a   : > { %1274 = vst.msk [vmem:[#allocation3 + $0x20] sm:$0xff] %vm1269_vm5, %v1257_v17 }
 0x22b   : > { %1459 = vst.msk [vmem:[#allocation3 + $0x18] sm:$0xff] %vm1455_vm8, %v1441_v26 }
 0x22d   : > { %v1350_v55 = vpop.permute.xlu0 %1349  ;;  %v1065_v20 = vpop.permute.xlu1 %1064 }
 0x22e   : > { %1367 = vst.msk [vmem:[#allocation3 + $0x20] sm:$0xff] %vm1362_vm7, %v1350_v55 }
 0x22f   : > { %1085 = vst.msk [vmem:[#allocation3 + $0x8] sm:$0xff] %vm1083_vm3, %v1065_v20 }
 0x231   : > { %v1443_v7 = vpop.permute.xlu0 %1442  ;;  %2236 = vxpose.xlu0.b32.start.end [1/1] (short) %v4053_v6, 128  ;;  %v1158_v21 = vpop.permute.xlu1 %1157 }
 0x232   : > { %1460 = vst.msk [vmem:[#allocation3 + $0x20] sm:$0xff] %vm1455_vm8, %v1443_v7  ;;  %v1516_v19 = vld [vmem:[#allocation3 + $0x18] sm:$0xff] }
 0x233   : > { %1178 = vst.msk [vmem:[#allocation3 + $0x8] sm:$0xff] %vm1176_vm4, %v1158_v21 }
 0x235   : > { %v967_v54 = vpop.permute.xlu0 %966  ;;  %v1251_v61 = vpop.permute.xlu1 %1250 }
 0x236   : > { %986 = vst.msk [vmem:[#allocation3 + $0x10] sm:$0xff] %vm983_vm2, %v967_v54 }
 0x237   : > { %1271 = vst.msk [vmem:[#allocation3 + $0x8] sm:$0xff] %vm1269_vm5, %v1251_v61 }
 0x239   : > { %v1067_v56 = vpop.permute.xlu0 %1066  ;;  %v1344_v22 = vpop.permute.xlu1 %1343  ;;  %v1517_v39 = vld [vmem:[#allocation3 + $0x20] sm:$0xff] }
 0x23a   : > { %1086 = vst.msk [vmem:[#allocation3 + $0x10] sm:$0xff] %vm1083_vm3, %v1067_v56 }
 0x23b   : > { %1364 = vst.msk [vmem:[#allocation3 + $0x8] sm:$0xff] %vm1362_vm7, %v1344_v22 }
 0x23d   : > { %v1160_v43 = vpop.permute.xlu0 %1159  ;;  %v1116_v51 = vpop.permute.xlu1 %1115 }
 0x23e   : > { %1179 = vst.msk [vmem:[#allocation3 + $0x10] sm:$0xff] %vm1176_vm4, %v1160_v43 }
 0x23f   : > { %1135 = vst.msk [vmem:[#allocation3 + $0x3c] sm:$0xff] %vm1083_vm3, %v1116_v51 }
 0x240   : > { %1228 = vst.msk [vmem:[#allocation3 + $0x3c] sm:$0xff] %vm1176_vm4, %v1209_v15 }
 0x241   : > { %v1253_v6 = vpop.permute.xlu0 %1252  ;;  %v1437_v2 = vpop.permute.xlu1 %1436 }
 0x242   : > { %1272 = vst.msk [vmem:[#allocation3 + $0x10] sm:$0xff] %vm1269_vm5, %v1253_v6 }
 0x243   : > { %1457 = vst.msk [vmem:[#allocation3 + $0x8] sm:$0xff] %vm1455_vm8, %v1437_v2 }
 0x245   : > { %v1346_v9 = vpop.permute.xlu0 %1345  ;;  %v1302_v27 = vpop.permute.xlu1 %1301 }
 0x246   : > { %1365 = vst.msk [vmem:[#allocation3 + $0x10] sm:$0xff] %vm1362_vm7, %v1346_v9 }
 0x247   : > { %1321 = vst.msk [vmem:[#allocation3 + $0x3c] sm:$0xff] %vm1269_vm5, %v1302_v27 }
 0x248   : > { %1414 = vst.msk [vmem:[#allocation3 + $0x3c] sm:$0xff] %vm1362_vm7, %v1395_v5 }
 0x249   : > { %v1439_v47 = vpop.permute.xlu0 %1438  ;;  %v1488_v8 = vpop.permute.xlu1 %1487 }
 0x24a   : > { %v1514_v28 = vld [vmem:[#allocation3 + $0x8] sm:$0xff]  ;;  %1458 = vst.msk [vmem:[#allocation3 + $0x10] sm:$0xff] %vm1455_vm8, %v1439_v47  ;;  %1507 = vst.msk [vmem:[#allocation3 + $0x3c] sm:$0xff] %vm1455_vm8, %v1488_v8 }
 0x24b   : > { %v1526_v25 = vpack.c.bf16 %v1514_v28, %v1513_v12 }
 0x24c   : > { %2268 = vxpose.xlu1.b32.start.end [1/1] (short) %v4092_v59, 128 }
 0x24d   : > { %3401 = vmatmul.mubr.msk.bf16.vlgmr.msra.gmra.mxu0 %vm4869_vm6, %v1526_v25  ;;  %v1018_v44 = vpop.permute.xlu0 %1017  ;;  %v973_v18 = vpop.permute.xlu1 %972 }
 0x24e   : > { %3404 = vmatprep.mubr.msk.bf16.mxu0 %vm3567_vm9, %v3566_v52  ;;  %1036 = vst.msk [vmem:[#allocation3 + $0x44] sm:$0xff] %vm983_vm2, %v1018_v44  ;;  %989 = vst.msk [vmem:[#allocation3 + $0x28] sm:$0xff] %vm983_vm2, %v973_v18 }
 0x251   : > { %v1118_v11 = vpop.permute.xlu0 %1117  ;;  %v1073_v50 = vpop.permute.xlu1 %1072  ;;  %v1515_v48 = vld [vmem:[#allocation3 + $0x10] sm:$0xff]  ;;  %v1520_v41 = vld [vmem:[#allocation3 + $0x38] sm:$0xff] }
 0x252   : > { %1136 = vst.msk [vmem:[#allocation3 + $0x44] sm:$0xff] %vm1083_vm3, %v1118_v11  ;;  %1089 = vst.msk [vmem:[#allocation3 + $0x28] sm:$0xff] %vm1083_vm3, %v1073_v50  ;;  %v1527_v59 = vpack.c.bf16 %v1516_v19, %v1515_v48  ;;  %v1529_v53 = vpack.c.bf16 %v1520_v41, %v1519_v10 }
 0x255   : > { %3405 = vmatmul.mubr.msk.bf16.gmra.mxu0 %vm4869_vm6, %v1527_v59  ;;  %v1211_v13 = vpop.permute.xlu0 %1210  ;;  %v1166_v57 = vpop.permute.xlu1 %1165 }
 0x256   : > { %3408 = vmatprep.mubr.msk.bf16.mxu0 %vm3567_vm9, %v3566_v52  ;;  %1229 = vst.msk [vmem:[#allocation3 + $0x44] sm:$0xff] %vm1176_vm4, %v1211_v13  ;;  %1182 = vst.msk [vmem:[#allocation3 + $0x28] sm:$0xff] %vm1176_vm4, %v1166_v57 }
 0x259   : > { %v1304_v37 = vpop.permute.xlu0 %1303  ;;  %v1259_v40 = vpop.permute.xlu1 %1258 }
 0x25a   : > { %1322 = vst.msk [vmem:[#allocation3 + $0x44] sm:$0xff] %vm1269_vm5, %v1304_v37  ;;  %1275 = vst.msk [vmem:[#allocation3 + $0x28] sm:$0xff] %vm1269_vm5, %v1259_v40 }
 0x25d   : > { %v1397_v24 = vpop.permute.xlu0 %1396  ;;  %v1352_v38 = vpop.permute.xlu1 %1351 }
 0x25e   : > { %1415 = vst.msk [vmem:[#allocation3 + $0x44] sm:$0xff] %vm1362_vm7, %v1397_v24  ;;  %1368 = vst.msk [vmem:[#allocation3 + $0x28] sm:$0xff] %vm1362_vm7, %v1352_v38 }
 0x261   : > { %v1490_v32 = vpop.permute.xlu0 %1489  ;;  %v1445_v0 = vpop.permute.xlu1 %1444 }
 0x262   : > { %1508 = vst.msk [vmem:[#allocation3 + $0x44] sm:$0xff] %vm1455_vm8, %v1490_v32  ;;  %1461 = vst.msk [vmem:[#allocation3 + $0x28] sm:$0xff] %vm1455_vm8, %v1445_v0 }
 0x265   : > { %v1022_v45 = vpop.permute.xlu0 %1021  ;;  %v1213_v29 = vpop.permute.xlu1 %1212 }
 0x266   : > { %1038 = vst.msk [vmem:[#allocation3 + $0x54] sm:$0xff] %vm983_vm2, %v1022_v45 }
 0x267   : > { %1230 = vst.msk [vmem:[#allocation3 + $0x4c] sm:$0xff] %vm1176_vm4, %v1213_v29 }
 0x269   : > { %v1122_v14 = vpop.permute.xlu0 %1121  ;;  %v1306_v30 = vpop.permute.xlu1 %1305  ;;  %v1518_v3 = vld [vmem:[#allocation3 + $0x28] sm:$0xff] }
 0x26a   : > { %1138 = vst.msk [vmem:[#allocation3 + $0x54] sm:$0xff] %vm1083_vm3, %v1122_v14  ;;  %v1528_v62 = vpack.c.bf16 %v1518_v3, %v1517_v39 }
 0x26b   : > { %1323 = vst.msk [vmem:[#allocation3 + $0x4c] sm:$0xff] %vm1269_vm5, %v1306_v30 }
 0x26c   : > { %3409 = vmatmul.mubr.msk.bf16.gmra.mxu0 %vm4869_vm6, %v1528_v62 }
 0x26d   : > { %v1215_v36 = vpop.permute.xlu0 %1214  ;;  %v1399_v46 = vpop.permute.xlu1 %1398  ;;  %3412 = vmatprep.mubr.msk.bf16.mxu0 %vm3567_vm9, %v3566_v52 }
 0x26e   : > { %1231 = vst.msk [vmem:[#allocation3 + $0x54] sm:$0xff] %vm1176_vm4, %v1215_v36  ;;  %2300 = vxpose.xlu0.b32.start.end [1/1] (short) (narrow) %v4101_v63, 64  ;;  %v1521_v63 = vld [vmem:[#allocation3 + $0x40] sm:$0xff] }
 0x26f   : > { %1416 = vst.msk [vmem:[#allocation3 + $0x4c] sm:$0xff] %vm1362_vm7, %v1399_v46 }
 0x271   : > { %v1308_v15 = vpop.permute.xlu0 %1307  ;;  %v1492_v31 = vpop.permute.xlu1 %1491 }
 0x272   : > { %1324 = vst.msk [vmem:[#allocation3 + $0x54] sm:$0xff] %vm1269_vm5, %v1308_v15 }
 0x273   : > { %1509 = vst.msk [vmem:[#allocation3 + $0x4c] sm:$0xff] %vm1455_vm8, %v1492_v31 }
 0x274   : > { %3413 = vmatmul.mubr.msk.bf16.gmra.mxu0 %vm4869_vm6, %v1529_v53 }
 0x275   : > { %v1401_v5 = vpop.permute.xlu0 %1400  ;;  %v1024_v35 = vpop.permute.xlu1 %1023  ;;  %3416 = vmatprep.mubr.msk.bf16.mxu0 %vm3567_vm9, %v3566_v52 }
 0x276   : > { %1417 = vst.msk [vmem:[#allocation3 + $0x54] sm:$0xff] %vm1362_vm7, %v1401_v5 }
 0x277   : > { %1039 = vst.msk [vmem:[#allocation3 + $0x5c] sm:$0xff] %vm983_vm2, %v1024_v35 }
 0x279   : > { %v1494_v23 = vpop.permute.xlu0 %1493  ;;  %v1124_v16 = vpop.permute.xlu1 %1123 }
 0x27a   : > { %v1522_v58 = vld [vmem:[#allocation3 + $0x48] sm:$0xff]  ;;  %1510 = vst.msk [vmem:[#allocation3 + $0x54] sm:$0xff] %vm1455_vm8, %v1494_v23 }
 0x27b   : > { %1139 = vst.msk [vmem:[#allocation3 + $0x5c] sm:$0xff] %vm1083_vm3, %v1124_v16  ;;  %v1530_v49 = vpack.c.bf16 %v1522_v58, %v1521_v63 }
 0x27d   : > { %3417 = vmatmul.mubr.msk.bf16.gmra.mxu0 %vm4869_vm6, %v1530_v49  ;;  %v1026_v60 = vpop.permute.xlu0 %1025  ;;  %v1217_v1 = vpop.permute.xlu1 %1216 }
 0x27e   : > { %3420 = vmatprep.mubr.msk.bf16.mxu0 %vm3567_vm9, %v3566_v52  ;;  %1040 = vst.msk [vmem:[#allocation3 + $0x64] sm:$0xf] %vm990_vm10, %v1026_v60 }
 0x27f   : > { %1232 = vst.msk [vmem:[#allocation3 + $0x5c] sm:$0xff] %vm1176_vm4, %v1217_v1 }
 0x281   : > { %v1310_v34 = vpop.permute.xlu1 %1309  ;;  %v1219_v17 = vpop.permute.xlu0 %1218  ;;  %v1523_v55 = vld [vmem:[#allocation3 + $0x50] sm:$0xff] }
 0x282   : > { %1325 = vst.msk [vmem:[#allocation3 + $0x5c] sm:$0xff] %vm1269_vm5, %v1310_v34 }
 0x285   : > { %v1403_v42 = vpop.permute.xlu1 %1402  ;;  %v1405_v21 = vpop.permute.xlu0 %1404 }
 0x286   : > { %1418 = vst.msk [vmem:[#allocation3 + $0x5c] sm:$0xff] %vm1362_vm7, %v1403_v42 }
 0x289   : > { %v1496_v33 = vpop.permute.xlu1 %1495 }
 0x28a   : > { %1511 = vst.msk [vmem:[#allocation3 + $0x5c] sm:$0xff] %vm1455_vm8, %v1496_v33 }
 0x28d   : > { %v1126_v26 = vpop.permute.xlu1 %1125 }
 0x28e   : > { %1140 = vst.msk [vmem:[#allocation3 + $0x64] sm:$0xf] %vm1090_vm11, %v1126_v26 }
 0x28f   : > { %1233 = vst.msk [vmem:[#allocation3 + $0x64] sm:$0xf] %vm1183_vm12, %v1219_v17 }
 0x291   : > { %v1524_v20 = vld [vmem:[#allocation3 + $0x58] sm:$0xff]  ;;  %v1312_v7 = vpop.permute.xlu1 %1311 }
 0x292   : > { %1326 = vst.msk [vmem:[#allocation3 + $0x64] sm:$0xf] %vm1276_vm13, %v1312_v7  ;;  %v1531_v54 = vpack.c.bf16 %v1524_v20, %v1523_v55 }
 0x293   : > { %1419 = vst.msk [vmem:[#allocation3 + $0x64] sm:$0xf] %vm1369_vm14, %v1405_v21 }
 0x294   : > { %3421 = vmatmul.mubr.msk.bf16.gmra.mxu0 %vm4869_vm6, %v1531_v54 }
 0x295   : > { %v1498_v61 = vpop.permute.xlu1 %1497  ;;  %3424 = vmatprep.mubr.msk.bf16.mxu0 %vm3567_vm9, %v3566_v52 }
 0x296   : > { %1512 = vst.msk [vmem:[#allocation3 + $0x64] sm:$0xf] %vm4875_vm15, %v1498_v61 }
 0x29d   : > { %v1525_v56 = vld [vmem:[#allocation3 + $0x60] sm:$0xff] }
 0x29e   : > { %v1532_v22 = vpack.c.bf16 %v1525_v56, %v1525_v56 }
 0x2a0   : > { %3425 = vmatmul.mubr.msk.bf16.gmra.mxu0 %vm4869_vm6, %v1532_v22  ;;  %vm4870_vm6 = vcmask 125952  }
 0x2a1   : > { %3492 = vmatprep.mubr.msk.bf16.mxu0 %vm3567_vm9, %v3566_v52 }
 0x2ad   : > { %v2252_v43 = vpop.trf.xlu0 }
 0x2ae   : > { %2332 = vst.msk [vmem:[#allocation2] sm:$0xff] %vm858_vm0, %v2252_v43 }
 0x2b1   : > { %v2253_v51 = vpop.trf.xlu0 }
 0x2b2   : > { %2333 = vst.msk [vmem:[#allocation2 + $0x8] sm:$0xff] %vm858_vm0, %v2253_v51 }
 0x2b5   : > { %v2254_v6 = vpop.trf.xlu0 }
 0x2b6   : > { %2334 = vst.msk [vmem:[#allocation2 + $0x10] sm:$0xff] %vm858_vm0, %v2254_v6 }
 0x2b9   : > { %v2255_v2 = vpop.trf.xlu0 }
 0x2ba   : > { %2335 = vst.msk [vmem:[#allocation2 + $0x18] sm:$0xff] %vm858_vm0, %v2255_v2 }
 0x2bd   : > { %v2256_v9 = vpop.trf.xlu0 }
 0x2be   : > { %2336 = vst.msk [vmem:[#allocation2 + $0x20] sm:$0xff] %vm858_vm0, %v2256_v9 }
 0x2c1   : > { %v2257_v27 = vpop.trf.xlu0 }
 0x2c2   : > { %2337 = vst.msk [vmem:[#allocation2 + $0x28] sm:$0xff] %vm858_vm0, %v2257_v27 }
 0x2c5   : > { %v2258_v47 = vpop.trf.xlu0 }
 0x2c6   : > { %2338 = vst.msk [vmem:[#allocation2 + $0x30] sm:$0xff] %vm858_vm0, %v2258_v47 }
 0x2c8   : > { %v2284_v8 = vpop.trf.xlu1 }
 0x2c9   : > { %v2259_v12 = vpop.trf.xlu0  ;;  %v2400_v28 = vld [vmem:[#allocation2 + $0x1] ss:$6 sm:$0xff]  ;;  %2348 = vst.msk [vmem:[#allocation2 + $0x80] sm:$0xff] %vm858_vm0, %v2284_v8  ;;  %v2484_v25 = vld [vmem:[#allocation2 + $0x2] ss:$6 sm:$0xff] }
 0x2ca   : > { %2339 = vst.msk [vmem:[#allocation2 + $0x38] sm:$0xff] %vm858_vm0, %v2259_v12  ;;  %2414 = vrot.lane.b32.xlu1 %v2400_v28, %s3560_s14  ;;  %v2372_v44 = vld [vmem:[#allocation2] ss:$6 sm:$0xff]  ;;  %v2386_v18 = vld [vmem:[#allocation2 + $0x3] ss:$6 sm:$0xff] }
 0x2cb   : > { %2379 = vst.msk [vmem:[#allocation3] sm:$0xff] %vm858_vm0, %v2372_v44  ;;  %2393 = vst.msk [vmem:[#allocation3 + $0x34] sm:$0xff] %vm858_vm0, %v2386_v18  ;;  %v2568_v48 = vld [vmem:[#allocation2 + $0x3] ss:$6 sm:$0xff]  ;;  %v2652_v13 = vld [vmem:[#allocation2 + $0x4] ss:$6 sm:$0xff] }
 0x2cc   : > { %v2285_v11 = vpop.trf.xlu1  ;;  %v2736_v40 = vld [vmem:[#allocation2 + $0x5] ss:$6 sm:$0xff] }
 0x2cd   : > { %v2260_v50 = vpop.trf.xlu0  ;;  %2349 = vst.msk [vmem:[#allocation2 + $0x88] sm:$0xff] %vm858_vm0, %v2285_v11  ;;  %v2820_v32 = vld [vmem:[#allocation2 + $0x6] ss:$6 sm:$0xff] }
 0x2ce   : > { %2340 = vst.msk [vmem:[#allocation2 + $0x40] sm:$0xff] %vm858_vm0, %v2260_v50  ;;  %2498 = vrot.lane.b32.xlu1 %v2484_v25, %s3561_s15 }
 0x2d0   : > { %v2286_v19 = vpop.trf.xlu1 }
 0x2d1   : > { %v2261_v59 = vpop.trf.xlu0  ;;  %2350 = vst.msk [vmem:[#allocation2 + $0x90] sm:$0xff] %vm858_vm0, %v2286_v19 }
 0x2d2   : > { %2341 = vst.msk [vmem:[#allocation2 + $0x48] sm:$0xff] %vm858_vm0, %v2261_v59  ;;  %2582 = vrot.lane.b32.xlu1 %v2568_v48, %s3562_s16 }
 0x2d4   : > { %v2287_v57 = vpop.trf.xlu1 }
 0x2d5   : > { %v2262_v37 = vpop.trf.xlu0  ;;  %2351 = vst.msk [vmem:[#allocation2 + $0x98] sm:$0xff] %vm858_vm0, %v2287_v57 }
 0x2d6   : > { %2342 = vst.msk [vmem:[#allocation2 + $0x50] sm:$0xff] %vm858_vm0, %v2262_v37  ;;  %2666 = vrot.lane.b32.xlu1 %v2652_v13, %s3563_s18 }
 0x2d8   : > { %v2288_v24 = vpop.trf.xlu1 }
 0x2d9   : > { %v2263_v38 = vpop.trf.xlu0  ;;  %2352 = vst.msk [vmem:[#allocation2 + $0xa0] sm:$0xff] %vm858_vm0, %v2288_v24 }
 0x2da   : > { %2343 = vst.msk [vmem:[#allocation2 + $0x58] sm:$0xff] %vm858_vm0, %v2263_v38  ;;  %2750 = vrot.lane.b32.xlu1 %v2736_v40, %s3564_s19 }
 0x2dc   : > { %v2289_v0 = vpop.trf.xlu1 }
 0x2dd   : > { %v2264_v45 = vpop.trf.xlu0  ;;  %2353 = vst.msk [vmem:[#allocation2 + $0xa8] sm:$0xff] %vm858_vm0, %v2289_v0 }
 0x2de   : > { %2344 = vst.msk [vmem:[#allocation2 + $0x60] sm:$0xff] %vm858_vm0, %v2264_v45  ;;  %2834 = vrot.lane.b32.xlu1 %v2820_v32, %s3565_s20 }
 0x2e0   : > { %v2290_v29 = vpop.trf.xlu1 }
 0x2e1   : > { %v2265_v14 = vpop.trf.xlu0  ;;  %v2401_v30 = vld [vmem:[#allocation2 + $0x31] ss:$6 sm:$0xff]  ;;  %2354 = vst.msk [vmem:[#allocation2 + $0xb0] sm:$0xff] %vm858_vm0, %v2290_v29  ;;  %v2485_v39 = vld [vmem:[#allocation2 + $0x32] ss:$6 sm:$0xff] }
 0x2e2   : > { %2345 = vst.msk [vmem:[#allocation2 + $0x68] sm:$0xff] %vm858_vm0, %v2265_v14  ;;  %2416 = vrot.lane.b32.xlu0 %v2401_v30, %s3560_s14  ;;  %v2373_v3 = vld [vmem:[#allocation2 + $0x30] ss:$6 sm:$0xff]  ;;  %v2387_v62 = vld [vmem:[#allocation2 + $0x33] ss:$6 sm:$0xff] }
 0x2e3   : > { %2380 = vst.msk [vmem:[#allocation3 + $0x8] sm:$0xff] %vm858_vm0, %v2373_v3  ;;  %2394 = vst.msk [vmem:[#allocation3 + $0x3c] sm:$0xff] %vm858_vm0, %v2387_v62  ;;  %v2569_v41 = vld [vmem:[#allocation2 + $0x33] ss:$6 sm:$0xff]  ;;  %v2653_v31 = vld [vmem:[#allocation2 + $0x34] ss:$6 sm:$0xff] }
 0x2e4   : > { %v2291_v36 = vpop.trf.xlu1  ;;  %v2737_v63 = vld [vmem:[#allocation2 + $0x35] ss:$6 sm:$0xff] }
 0x2e5   : > { %v2266_v46 = vpop.trf.xlu0  ;;  %2355 = vst.msk [vmem:[#allocation2 + $0xb8] sm:$0xff] %vm858_vm0, %v2291_v36  ;;  %v2821_v60 = vld [vmem:[#allocation2 + $0x36] ss:$6 sm:$0xff] }
 0x2e6   : > { %2346 = vst.msk [vmem:[#allocation2 + $0x70] sm:$0xff] %vm858_vm0, %v2266_v46  ;;  %2500 = vrot.lane.b32.xlu0 %v2485_v39, %s3561_s15 }
 0x2e8   : > { %v2292_v10 = vpop.trf.xlu1 }
 0x2e9   : > { %v2267_v15 = vpop.trf.xlu0  ;;  %2356 = vst.msk [vmem:[#allocation2 + $0xc0] sm:$0xff] %vm858_vm0, %v2292_v10 }
 0x2ea   : > { %2347 = vst.msk [vmem:[#allocation2 + $0x78] sm:$0xff] %vm858_vm0, %v2267_v15  ;;  %2584 = vrot.lane.b32.xlu0 %v2569_v41, %s3562_s16  ;;  %v2443_v15 = vld [vmem:[#allocation2 + $0x34] ss:$6 sm:$0xff] }
 0x2ec   : > { %v2293_v53 = vpop.trf.xlu1  ;;  %v2375_v35 = vld [vmem:[#allocation2 + $0x90] ss:$6 sm:$0xff]  ;;  %v2389_v58 = vld [vmem:[#allocation2 + $0x93] ss:$6 sm:$0xff] }
 0x2ed   : > { %2357 = vst.msk [vmem:[#allocation2 + $0xc8] sm:$0xff] %vm858_vm0, %v2293_v53  ;;  %v2316_v5 = vpop.trf.xlu0  ;;  %2382 = vst.msk [vmem:[#allocation3 + $0x18] sm:$0xff] %vm858_vm0, %v2375_v35  ;;  %v2403_v55 = vld [vmem:[#allocation2 + $0x91] ss:$6 sm:$0xff]  ;;  %v2487_v54 = vld [vmem:[#allocation2 + $0x92] ss:$6 sm:$0xff] }
 0x2ee   : > { %2668 = vrot.lane.b32.xlu0 %v2653_v31, %s3563_s18  ;;  %2364 = vst.msk [vmem:[#allocation2 + $0x100] sm:$0xff] %vm858_vm0, %v2316_v5  ;;  %2396 = vst.msk [vmem:[#allocation3 + $0x4c] sm:$0xff] %vm858_vm0, %v2389_v58  ;;  %v2571_v22 = vld [vmem:[#allocation2 + $0x93] ss:$6 sm:$0xff]  ;;  %v2655_v2 = vld [vmem:[#allocation2 + $0x94] ss:$6 sm:$0xff] }
 0x2ef   : > { %v2739_v25 = vld [vmem:[#allocation2 + $0x95] ss:$6 sm:$0xff]  ;;  %v2526_v31 = vld [vmem:[#allocation2 + $0x5] ss:$6 sm:$0xff]  ;;  %v2442_v53 = vld [vmem:[#allocation2 + $0x4] ss:$6 sm:$0xff] }
 0x2f0   : > { %v2294_v23 = vpop.trf.xlu1  ;;  %v2823_v50 = vld [vmem:[#allocation2 + $0x96] ss:$6 sm:$0xff] }
 0x2f1   : > { %v2402_v16 = vld [vmem:[#allocation2 + $0x61] ss:$6 sm:$0xff]  ;;  %2358 = vst.msk [vmem:[#allocation2 + $0xd0] sm:$0xff] %vm858_vm0, %v2294_v23  ;;  %v2317_v49 = vpop.trf.xlu0  ;;  %v2486_v1 = vld [vmem:[#allocation2 + $0x62] ss:$6 sm:$0xff] }
 0x2f2   : > { %2752 = vrot.lane.b32.xlu0 %v2737_v63, %s3564_s19  ;;  %2418 = vrot.lane.b32.xlu1 %v2402_v16, %s3560_s14  ;;  %2365 = vst.msk [vmem:[#allocation2 + $0x108] sm:$0xff] %vm858_vm0, %v2317_v49  ;;  %v2374_v34 = vld [vmem:[#allocation2 + $0x60] ss:$6 sm:$0xff]  ;;  %v2388_v17 = vld [vmem:[#allocation2 + $0x63] ss:$6 sm:$0xff] }
 0x2f3   : > { %2381 = vst.msk [vmem:[#allocation3 + $0x10] sm:$0xff] %vm858_vm0, %v2374_v34  ;;  %v2570_v26 = vld [vmem:[#allocation2 + $0x63] ss:$6 sm:$0xff]  ;;  %2395 = vst.msk [vmem:[#allocation3 + $0x44] sm:$0xff] %vm858_vm0, %v2388_v17  ;;  %v2654_v21 = vld [vmem:[#allocation2 + $0x64] ss:$6 sm:$0xff] }
 0x2f4   : > { %v2295_v42 = vpop.trf.xlu1  ;;  %v2738_v51 = vld [vmem:[#allocation2 + $0x65] ss:$6 sm:$0xff]  ;;  %v2822_v27 = vld [vmem:[#allocation2 + $0x66] ss:$6 sm:$0xff]  ;;  %v2611_v16 = vld [vmem:[#allocation2 + $0x36] ss:$6 sm:$0xff] }
 0x2f5   : > { %2359 = vst.msk [vmem:[#allocation2 + $0xd8] sm:$0xff] %vm858_vm0, %v2295_v42  ;;  %v2318_v33 = vpop.trf.xlu0  ;;  %v2527_v49 = vld [vmem:[#allocation2 + $0x35] ss:$6 sm:$0xff]  ;;  %v2610_v17 = vld [vmem:[#allocation2 + $0x6] ss:$6 sm:$0xff] }
 0x2f6   : > { %2836 = vrot.lane.b32.xlu0 %v2821_v60, %s3565_s20  ;;  %2502 = vrot.lane.b32.xlu1 %v2486_v1, %s3561_s15  ;;  %2366 = vst.msk [vmem:[#allocation2 + $0x110] sm:$0xff] %vm858_vm0, %v2318_v33  ;;  %v4497_v1 = vld [vmem:[%s4863_s6] ss:$0 sm:$0xff]  ;;  %v2694_v33 = vld [vmem:[#allocation2 + $0x7] ss:$6 sm:$0xff] }
 0x2f8   : > { %v2296_v20 = vpop.trf.xlu1 }
 0x2f9   : > { %2360 = vst.msk [vmem:[#allocation2 + $0xe0] sm:$0xff] %vm858_vm0, %v2296_v20  ;;  %v2319_v7 = vpop.trf.xlu0 }
 0x2fa   : > { %2586 = vrot.lane.b32.xlu1 %v2570_v26, %s3562_s16  ;;  %2420 = vrot.lane.b32.xlu0 %v2403_v55, %s3560_s14  ;;  %2367 = vst.msk [vmem:[#allocation2 + $0x118] sm:$0xff] %vm858_vm0, %v2319_v7  ;;  %v4503_v26 = vld [vmem:[%s4864_s7] ss:$0 sm:$0xff] }
 0x2fc   : > { %v2297_v61 = vpop.trf.xlu1 }
 0x2fd   : > { %2361 = vst.msk [vmem:[#allocation2 + $0xe8] sm:$0xff] %vm858_vm0, %v2297_v61  ;;  %v2320_v56 = vpop.trf.xlu0 }
 0x2fe   : > { %2670 = vrot.lane.b32.xlu1 %v2654_v21, %s3563_s18  ;;  %2504 = vrot.lane.b32.xlu0 %v2487_v54, %s3561_s15  ;;  %2368 = vst.msk [vmem:[#allocation2 + $0x120] sm:$0xff] %vm858_vm0, %v2320_v56 }
 0x300   : > { %v2298_v43 = vpop.trf.xlu1 }
 0x301   : > { %2362 = vst.msk [vmem:[#allocation2 + $0xf0] sm:$0xff] %vm858_vm0, %v2298_v43  ;;  %v2321_v6 = vpop.trf.xlu0 }
 0x302   : > { %2754 = vrot.lane.b32.xlu1 %v2738_v51, %s3564_s19  ;;  %2588 = vrot.lane.b32.xlu0 %v2571_v22, %s3562_s16  ;;  %2369 = vst.msk [vmem:[#allocation2 + $0x128] sm:$0xff] %vm858_vm0, %v2321_v6 }
 0x304   : > { %v2299_v9 = vpop.trf.xlu1  ;;  %v2376_v8 = vld [vmem:[#allocation2 + $0xc0] ss:$6 sm:$0xff]  ;;  %v2404_v12 = vld [vmem:[#allocation2 + $0xc1] ss:$6 sm:$0xff] }
 0x305   : > { %2363 = vst.msk [vmem:[#allocation2 + $0xf8] sm:$0xff] %vm858_vm0, %v2299_v9  ;;  %v2322_v47 = vpop.trf.xlu0  ;;  %2383 = vst.msk [vmem:[#allocation3 + $0x20] sm:$0xff] %vm858_vm0, %v2376_v8  ;;  %v2390_v28 = vld [vmem:[#allocation2 + $0xc3] ss:$6 sm:$0xff]  ;;  %v2488_v18 = vld [vmem:[#allocation2 + $0xc2] ss:$6 sm:$0xff] }
 0x306   : > { %2838 = vrot.lane.b32.xlu1 %v2822_v27, %s3565_s20  ;;  %2672 = vrot.lane.b32.xlu0 %v2655_v2, %s3563_s18  ;;  %2370 = vst.msk [vmem:[#allocation2 + $0x130] sm:$0xff] %vm858_vm0, %v2322_v47  ;;  %2397 = vst.msk [vmem:[#allocation3 + $0x54] sm:$0xff] %vm858_vm0, %v2390_v28  ;;  %v2572_v59 = vld [vmem:[#allocation2 + $0xc3] ss:$6 sm:$0xff]  ;;  %v2656_v24 = vld [vmem:[#allocation2 + $0xc4] ss:$6 sm:$0xff] }
 0x307   : > { %v2740_v29 = vld [vmem:[#allocation2 + $0xc5] ss:$6 sm:$0xff] }
 0x308   : > { %v2824_v62 = vld [vmem:[#allocation2 + $0xc6] ss:$6 sm:$0xff]  ;;  %v2695_v28 = vld [vmem:[#allocation2 + $0x37] ss:$6 sm:$0xff] }
 0x309   : > { %v2323_v44 = vpop.trf.xlu0 }
 0x30a   : > { %2756 = vrot.lane.b32.xlu0 %v2739_v25, %s3564_s19  ;;  %2422 = vrot.lane.b32.xlu1 %v2404_v12, %s3560_s14  ;;  %2371 = vst.msk [vmem:[#allocation2 + $0x138] sm:$0xf] %vm898_vm1, %v2323_v44  ;;  %v2779_v12 = vld [vmem:[#allocation2 + $0x38] ss:$6 sm:$0xff] }
 0x30c   : > { %v2377_v19 = vld [vmem:[#allocation2 + $0xf0] ss:$6 sm:$0xff]  ;;  %v2405_v13 = vld [vmem:[#allocation2 + $0xf1] ss:$6 sm:$0xff] }
 0x30d   : > { %v4458_v11 = vpop.f32.mrf.mxu0  ;;  %2384 = vst.msk [vmem:[#allocation3 + $0x28] sm:$0xff] %vm858_vm0, %v2377_v19  ;;  %v2378_v40 = vld [vmem:[#allocation2 + $0x120] ss:$6 sm:$0xf]  ;;  %v2391_v0 = vld [vmem:[#allocation2 + $0xf3] ss:$6 sm:$0xff] }
 0x30e   : > { %2840 = vrot.lane.b32.xlu0 %v2823_v50, %s3565_s20  ;;  %2506 = vrot.lane.b32.xlu1 %v2488_v18, %s3561_s15  ;;  %v2489_v38 = vld [vmem:[#allocation2 + $0xf2] ss:$6 sm:$0xff]  ;;  %2385 = vst.msk [vmem:[#allocation3 + $0x30] sm:$0xf] %vm898_vm1, %v2378_v40  ;;  %v2573_v14 = vld [vmem:[#allocation2 + $0xf3] ss:$6 sm:$0xff]  ;;  %v1664_v54 = vmul.f32 %v4497_v1, %v4458_v11 }
 0x30f   : > { %v3402_v48 = vpop.f32.mrf.mxu0  ;;  %2398 = vst.msk [vmem:[#allocation3 + $0x5c] sm:$0xff] %vm858_vm0, %v2391_v0  ;;  %v2392_v39 = vld [vmem:[#allocation2 + $0x123] ss:$6 sm:$0xf]  ;;  %v2657_v36 = vld [vmem:[#allocation2 + $0xf4] ss:$6 sm:$0xff] }
 0x310   : > { %2399 = vst.msk [vmem:[#allocation3 + $0x64] sm:$0xf] %vm898_vm1, %v2392_v39  ;;  %v2406_v46 = vld [vmem:[#allocation2 + $0x121] ss:$6 sm:$0xf]  ;;  %v1683_v6 = vadd.f32 %v4503_v26, %v1664_v54  ;;  %vm4872_vm0 = vcmask 1043456  }
 0x311   : > { %v4463_v57 = vpop.f32.mrf.mxu0  ;;  %v2741_v41 = vld [vmem:[#allocation2 + $0xf5] ss:$6 sm:$0xff]  ;;  %v2825_v10 = vld [vmem:[#allocation2 + $0xf6] ss:$6 sm:$0xff]  ;;  %vm4871_vm1 = vcmask 130048  }
 0x312   : > { %2590 = vrot.lane.b32.xlu1 %v2572_v59, %s3562_s16  ;;  %2424 = vrot.lane.b32.xlu0 %v2405_v13, %s3560_s14  ;;  %v2574_v5 = vld [vmem:[#allocation2 + $0x123] ss:$6 sm:$0xf]  ;;  %v2490_v35 = vld [vmem:[#allocation2 + $0x122] ss:$6 sm:$0xf]  ;;  %v1665_v2 = vmul.f32 %v4497_v1, %v4463_v57 }
 0x313   : > { %v3403_v37 = vpop.f32.mrf.mxu0  ;;  %v2742_v7 = vld [vmem:[#allocation2 + $0x125] ss:$6 sm:$0xf]  ;;  %v2658_v21 = vld [vmem:[#allocation2 + $0x124] ss:$6 sm:$0xf] }
 0x314   : > { %v1696_v50 = vmax.f32 %v1683_v6, 0.0  ;;  %v1684_v48 = vadd.f32 %v4503_v26, %v1665_v2 }
 0x315   : > { %v4468_v32 = vpop.f32.mrf.mxu0 }
 0x316   : > { %2674 = vrot.lane.b32.xlu1 %v2656_v24, %s3563_s18  ;;  %2508 = vrot.lane.b32.xlu0 %v2489_v38, %s3561_s15  ;;  %v1666_v19 = vmul.f32 %v4497_v1, %v4468_v32  ;;  %v2862_v24 = vld [vmem:[#allocation2 + $0x9] ss:$6 sm:$0xff]  ;;  %v2778_v38 = vld [vmem:[#allocation2 + $0x8] ss:$6 sm:$0xff] }
 0x317   : > { %v3406_v45 = vpop.f32.mrf.mxu0 }
 0x318   : > { %v1685_v39 = vadd.f32 %v4503_v26, %v1666_v19 }
 0x319   : > { %v4473_v30 = vpop.f32.mrf.mxu0 }
 0x31a   : > { %2758 = vrot.lane.b32.xlu1 %v2740_v29, %s3564_s19  ;;  %2592 = vrot.lane.b32.xlu0 %v2573_v14, %s3562_s16  ;;  %v1697_v14 = vmax.f32 %v1684_v48, 0.0 }
 0x31b   : > { %v3407_v3 = vpop.f32.mrf.mxu0 }
 0x31e   : > { %2842 = vrot.lane.b32.xlu1 %v2824_v62, %s3565_s20  ;;  %2676 = vrot.lane.b32.xlu0 %v2657_v36, %s3563_s18 }
 0x322   : > { %2426 = vrot.lane.b32.xlu1 %v2406_v46, %s3560_s14  ;;  %2760 = vrot.lane.b32.xlu0 %v2741_v41, %s3564_s19  ;;  %v2444_v46 = vld [vmem:[#allocation2 + $0x64] ss:$6 sm:$0xff]  ;;  %v2826_v41 = vld [vmem:[#allocation2 + $0x126] ss:$6 sm:$0xf] }
 0x326   : > { %2458 = vrot.lane.b32.xlu1 %v2443_v15, %s3560_s14  ;;  %2844 = vrot.lane.b32.xlu0 %v2825_v10, %s3565_s20 }
 0x32a   : > { %2540 = vrot.lane.b32.xlu1 %v2526_v31, %s3561_s15  ;;  %2456 = vrot.lane.b32.xlu0 %v2442_v53, %s3560_s14  ;;  %v1698_v31 = vmax.f32 %v1685_v39, 0.0 }
 0x32c   : > { %v4486_v63 = vpop.f32.mrf.mxu0 }
 0x32d   : > { %v1668_v54 = vmul.f32 %v4497_v1, %v4486_v63 }
 0x32e   : > { %v3410_v58 = vpop.f32.mrf.mxu0  ;;  %2594 = vrot.lane.b32.xlu1 %v2574_v5, %s3562_s16  ;;  %2510 = vrot.lane.b32.xlu0 %v2490_v35, %s3561_s15  ;;  %v2863_v35 = vld [vmem:[#allocation2 + $0x39] ss:$6 sm:$0xff] }
 0x330   : > { %v4490_v23 = vpop.f32.mrf.mxu0 }
 0x332   : > { %v3411_v60 = vpop.f32.mrf.mxu0  ;;  %2626 = vrot.lane.b32.xlu1 %v2611_v16, %s3562_s16  ;;  %2542 = vrot.lane.b32.xlu0 %v2527_v49, %s3561_s15  ;;  %v2445_v49 = vld [vmem:[#allocation2 + $0x94] ss:$6 sm:$0xff] }
 0x334   : > { %v1628_v34 = vpop.f32.mrf.mxu0 }
 0x335   : > { %v1670_v42 = vmul.f32 %v4497_v1, %v1628_v34  ;;  %v1667_v34 = vmul.f32 %v4497_v1, %v4473_v30 }
 0x336   : > { %v3414_v55 = vpop.f32.mrf.mxu0  ;;  %2708 = vrot.lane.b32.xlu1 %v2694_v33, %s3563_s18  ;;  %2624 = vrot.lane.b32.xlu0 %v2610_v17, %s3562_s16 }
 0x337   : > { %v4508_v20 = vadd.f32 %v4503_v26, %v1670_v42 }
 0x338   : > { %v1631_v61 = vpop.f32.mrf.mxu0 }
 0x339   : > { %v1671_v56 = vmul.f32 %v4497_v1, %v1631_v61  ;;  %v1702_v43 = vmax.f32 %v4508_v20, 0.0 }
 0x33a   : > { %v3415_v22 = vpop.f32.mrf.mxu0  ;;  %2762 = vrot.lane.b32.xlu1 %v2742_v7, %s3564_s19  ;;  %2678 = vrot.lane.b32.xlu0 %v2658_v21, %s3563_s18  ;;  %v1686_v21 = vadd.f32 %v4503_v26, %v1667_v34 }
 0x33b   : > { %v1690_v51 = vadd.f32 %v4503_v26, %v1671_v56  ;;  %v1717_v44 = vrot.slane %v1702_v43, 4 }
 0x33c   : > { %v2415_v27 = vpop.permute.xlu1 %2414 }
 0x33d   : > { %v1636_v9 = vpop.f32.mrf.mxu0  ;;  %v1703_v47 = vmax.f32 %v1690_v51, 0.0  ;;  %2435 = vst.msk [vmem:[#allocation3] sm:$0xff] %vm983_vm2, %v2415_v27  ;;  %v1687_v27 = vadd.f32 %v4503_v26, %v1668_v54 }
 0x33e   : > { %v1672_v8 = vmul.f32 %v4497_v1, %v1636_v9  ;;  %2794 = vrot.lane.b32.xlu1 %v2779_v12, %s3564_s19  ;;  %2710 = vrot.lane.b32.xlu0 %v2695_v28, %s3563_s18  ;;  %v1699_v9 = vmax.f32 %v1686_v21, 0.0  ;;  %v2529_v21 = vld [vmem:[#allocation2 + $0x95] ss:$6 sm:$0xff] }
 0x33f   : > { %v3418_v25 = vpop.f32.mrf.mxu0  ;;  %v1718_v18 = vrot.slane %v1703_v47, 4 }
 0x340   : > { %v1691_v11 = vadd.f32 %v4503_v26, %v1672_v8  ;;  %v2499_v13 = vpop.permute.xlu1 %2498  ;;  %v1700_v25 = vmax.f32 %v1687_v27, 0.0  ;;  %v2697_v27 = vld [vmem:[#allocation2 + $0x97] ss:$6 sm:$0xff] }
 0x341   : > { %v1639_v59 = vpop.f32.mrf.mxu0  ;;  %v1719_v57 = vsel %vm4872_vm0, %v1717_v44, %v1718_v18  ;;  %2519 = vst.msk [vmem:[#allocation3] sm:$0xff] %vm1083_vm3, %v2499_v13  ;;  %v1669_v44 = vmul.f32 %v4497_v1, %v4490_v23 }
 0x342   : > { %v1704_v37 = vmax.f32 %v1691_v11, 0.0  ;;  %v1673_v40 = vmul.f32 %v4497_v1, %v1639_v59  ;;  %v1737_v0 = vmax.f32 %v1696_v50, %v1719_v57  ;;  %2876 = vrot.lane.b32.xlu1 %v2862_v24, %s3565_s20  ;;  %2792 = vrot.lane.b32.xlu0 %v2778_v38, %s3564_s19 }
 0x343   : > { %v3419_v45 = vpop.f32.mrf.mxu0  ;;  %v1688_v57 = vadd.f32 %v4503_v26, %v1669_v44 }
 0x344   : > { %v1720_v29 = vrot.slane %v1704_v37, 4  ;;  %v1692_v32 = vadd.f32 %v4503_v26, %v1673_v40  ;;  %1745 = vst.msk [vmem:[#allocation4] sm:$0xff] %vm4871_vm1, %v1737_v0  ;;  %v2583_v3 = vpop.permute.xlu1 %2582 }
 0x345   : > { %2603 = vst.msk [vmem:[#allocation3] sm:$0xff] %vm1176_vm4, %v2583_v3  ;;  %v1701_v45 = vmax.f32 %v1688_v57, 0.0 }
 0x346   : > { %v1721_v62 = vsel %vm4872_vm0, %v1718_v18, %v1720_v29  ;;  %v1705_v36 = vmax.f32 %v1692_v32, 0.0  ;;  %2460 = vrot.lane.b32.xlu1 %v2444_v46, %s3560_s14  ;;  %2846 = vrot.lane.b32.xlu0 %v2826_v41, %s3565_s20 }
 0x347   : > { %v1738_v10 = vmax.f32 %v1697_v14, %v1721_v62 }
 0x348   : > { %v1722_v15 = vrot.slane %v1705_v36, 4  ;;  %v2667_v53 = vpop.permute.xlu1 %2666 }
 0x349   : > { %1746 = vst.msk [vmem:[#allocation4 + $0x8] sm:$0xff] %vm4871_vm1, %v1738_v10 }
 0x34a   : > { %v1723_v5 = vsel %vm4872_vm0, %v1720_v29, %v1722_v15  ;;  %2687 = vst.msk [vmem:[#allocation3] sm:$0xff] %vm1269_vm5, %v2667_v53  ;;  %2878 = vrot.lane.b32.xlu0 %v2863_v35, %s3565_s20 }
 0x34b   : > { %v1739_v58 = vmax.f32 %v1698_v31, %v1723_v5 }
 0x34c   : > { %v2751_v16 = vpop.permute.xlu1 %2750 }
 0x34d   : > { %1747 = vst.msk [vmem:[#allocation4 + $0x10] sm:$0xff] %vm4871_vm1, %v1739_v58  ;;  %v3535_v58 = vld [vmem:[%s4865_s8 + $0x30] sm:$0xff]  }
 0x34e   : > { %2771 = vst.msk [vmem:[#allocation3] sm:$0xff] %vm1362_vm7, %v2751_v16  ;;  %2462 = vrot.lane.b32.xlu0 %v2445_v49, %s3560_s14  ;;  %3429 = vmatpush3.bf16.msra.mxu1 %v3535_v58 }
 0x34f   : > { %3479 = vmatpush3.bf16.msra.mxu0 %v3535_v58  ;;  %3430 = vmatprep.subr.bf16.mxu1 %v3566_v52 }
 0x350   : > { %v2835_v60 = vpop.permute.xlu1 %2834  ;;  %3480 = vmatprep.subr.bf16.mxu0 %v3566_v52 }
 0x351   : > { %2855 = vst.msk [vmem:[#allocation3] sm:$0xff] %vm1455_vm8, %v2835_v60  ;;  %v3536_v60 = vld [vmem:[%s4865_s8 + $0x28] sm:$0xff]  }
 0x352   : > { %3431 = vmatpush3.bf16.msra.mxu1 %v3536_v60 }
 0x353   : > { %3481 = vmatpush3.bf16.msra.mxu0 %v3536_v60  ;;  %3432 = vmatprep.subr.bf16.mxu1 %v3566_v52 }
 0x354   : > { %v2417_v42 = vpop.permute.xlu0 %2416  ;;  %v1644_v33 = vpop.f32.mrf.mxu0  ;;  %3482 = vmatprep.subr.bf16.mxu0 %v3566_v52 }
 0x355   : > { %2436 = vst.msk [vmem:[#allocation3 + $0x8] sm:$0xff] %vm983_vm2, %v2417_v42  ;;  %v1674_v17 = vmul.f32 %v4497_v1, %v1644_v33 }
 0x356   : > { %v3422_v55 = vpop.f32.mrf.mxu0 }
 0x357   : > { %v1693_v7 = vadd.f32 %v4503_v26, %v1674_v17  ;;  %v3537_v55 = vld [vmem:[%s4865_s8 + $0x20] sm:$0xff]  }
 0x358   : > { %v2501_v61 = vpop.permute.xlu0 %2500  ;;  %v1647_v56 = vpop.f32.mrf.mxu0  ;;  %3433 = vmatpush3.bf16.msra.mxu1 %v3537_v55  ;;  %3483 = vmatpush3.bf16.msra.mxu0 %v3537_v55 }
 0x359   : > { %v1706_v22 = vmax.f32 %v1693_v7, 0.0  ;;  %2520 = vst.msk [vmem:[#allocation3 + $0x8] sm:$0xff] %vm1083_vm3, %v2501_v61  ;;  %v1675_v30 = vmul.f32 %v4497_v1, %v1647_v56  ;;  %v3538_v56 = vld [vmem:[%s4865_s8 + $0x18] sm:$0xff]   ;;  %3434 = vmatprep.subr.bf16.mxu1 %v3566_v52  ;;  %3484 = vmatprep.subr.bf16.mxu0 %v3566_v52 }
 0x35a   : > { %v3423_v51 = vpop.f32.mrf.mxu0 }
 0x35b   : > { %v1724_v6 = vrot.slane %v1706_v22, 4  ;;  %v1694_v2 = vadd.f32 %v4503_v26, %v1675_v30  ;;  %v2613_v30 = vld [vmem:[#allocation2 + $0x96] ss:$6 sm:$0xff] }
 0x35c   : > { %v2585_v47 = vpop.permute.xlu0 %2584  ;;  %3435 = vmatpush3.bf16.msra.mxu1 %v3538_v56  ;;  %3485 = vmatpush3.bf16.msra.mxu0 %v3538_v56 }
 0x35d   : > { %v1725_v8 = vsel %vm4872_vm0, %v1722_v15, %v1724_v6  ;;  %v1707_v12 = vmax.f32 %v1694_v2, 0.0  ;;  %2604 = vst.msk [vmem:[#allocation3 + $0x8] sm:$0xff] %vm1176_vm4, %v2585_v47  ;;  %v3539_v2 = vld [vmem:[%s4865_s8 + $0x10] sm:$0xff]   ;;  %3436 = vmatprep.subr.bf16.mxu1 %v3566_v52  ;;  %3486 = vmatprep.subr.bf16.mxu0 %v3566_v52 }
 0x35e   : > { %v1740_v63 = vmax.f32 %v1699_v9, %v1725_v8 }
 0x35f   : > { %v1726_v28 = vrot.slane %v1707_v12, 4  ;;  %v3540_v12 = vld [vmem:[%s4865_s8 + $0x8] sm:$0xff]  }
 0x360   : > { %1748 = vst.msk [vmem:[#allocation4 + $0x18] sm:$0xff] %vm4871_vm1, %v1740_v63  ;;  %v2669_v18 = vpop.permute.xlu0 %2668  ;;  %v1652_v11 = vpop.f32.mrf.mxu0  ;;  %3437 = vmatpush3.bf16.msra.mxu1 %v3539_v2  ;;  %3487 = vmatpush3.bf16.msra.mxu0 %v3539_v2  ;;  %v2784_v2 = vld [vmem:[#allocation2 + $0x128] ss:$6 sm:$0xf] }
 0x361   : > { %v1727_v50 = vsel %vm4872_vm0, %v1724_v6, %v1726_v28  ;;  %2688 = vst.msk [vmem:[#allocation3 + $0x8] sm:$0xff] %vm1269_vm5, %v2669_v18  ;;  %v1676_v48 = vmul.f32 %v4497_v1, %v1652_v11  ;;  %3438 = vmatprep.subr.bf16.mxu1 %v3566_v52  ;;  %3488 = vmatprep.subr.bf16.mxu0 %v3566_v52  ;;  %v3541_v18 = vld [vmem:[%s4865_s8] sm:$0xff]  }
 0x362   : > { %v1741_v19 = vmax.f32 %v1700_v25, %v1727_v50  ;;  %v3426_v59 = vpop.f32.mrf.mxu0  ;;  %v2865_v50 = vld [vmem:[#allocation2 + $0x99] ss:$6 sm:$0xff] }
 0x363   : > { %v1695_v13 = vadd.f32 %v4503_v26, %v1676_v48 }
 0x364   : > { %1749 = vst.msk [vmem:[#allocation4 + $0x20] sm:$0xff] %vm4871_vm1, %v1741_v19  ;;  %v2753_v37 = vpop.permute.xlu0 %2752  ;;  %v1655_v23 = vpop.f32.mrf.mxu0  ;;  %3439 = vmatpush3.bf16.msra.mxu1 %v3540_v12  ;;  %3489 = vmatpush3.bf16.msra.mxu0 %v3540_v12 }
 0x365   : > { %v1708_v40 = vmax.f32 %v1695_v13, 0.0  ;;  %2772 = vst.msk [vmem:[#allocation3 + $0x8] sm:$0xff] %vm1362_vm7, %v2753_v37  ;;  %v2419_v24 = vpop.permute.xlu1 %2418  ;;  %3440 = vmatprep.subr.bf16.mxu1 %v3566_v52  ;;  %3490 = vmatprep.subr.bf16.mxu0 %v3566_v52  ;;  %v2447_v13 = vld [vmem:[#allocation2 + $0xf4] ss:$6 sm:$0xff]  ;;  %v2528_v23 = vld [vmem:[#allocation2 + $0x65] ss:$6 sm:$0xff] }
 0x366   : > { %2437 = vst.msk [vmem:[#allocation3 + $0x10] sm:$0xff] %vm983_vm2, %v2419_v24  ;;  %v3427_v38 = vpop.f32.mrf.mxu0 }
 0x367   : > { %v1728_v0 = vrot.slane %v1708_v40, 4  ;;  %v2531_v40 = vld [vmem:[#allocation2 + $0xf5] ss:$6 sm:$0xff] }
 0x368   : > { %v2837_v29 = vpop.permute.xlu0 %2836  ;;  %3441 = vmatpush3.bf16.msra.mxu1 %v3541_v18  ;;  %3491 = vmatpush3.bf16.msra.mxu0 %v3541_v18 }
 0x369   : > { %v1729_v32 = vsel %vm4872_vm0, %v1726_v28, %v1728_v0  ;;  %v1743_v14 = vmax.f32 %v1702_v43, %v1728_v0  ;;  %2856 = vst.msk [vmem:[#allocation3 + $0x8] sm:$0xff] %vm1455_vm8, %v2837_v29  ;;  %v2503_v39 = vpop.permute.xlu1 %2502  ;;  %v2781_v28 = vld [vmem:[#allocation2 + $0x98] ss:$6 sm:$0xff]  ;;  %3446 = vmatprep.subr.bf16.mxu1 %v3566_v52  ;;  %vm1793_vm0 = vcmask 523648  }
 0x36a   : > { %v1742_v3 = vmax.f32 %v1701_v45, %v1729_v32  ;;  %2521 = vst.msk [vmem:[#allocation3 + $0x10] sm:$0xff] %vm1083_vm3, %v2503_v39  ;;  %v2612_v0 = vld [vmem:[#allocation2 + $0x66] ss:$6 sm:$0xff]  ;;  %v2615_v45 = vld [vmem:[#allocation2 + $0xf6] ss:$6 sm:$0xff] }
 0x36b   : > { %1752 = vst.msk [vmem:[#allocation4 + $0x30] sm:$0xf] %vm4870_vm6, %v1743_v14  ;;  %v2696_v14 = vld [vmem:[#allocation2 + $0x67] ss:$6 sm:$0xff]  ;;  %v2699_v39 = vld [vmem:[#allocation2 + $0xf7] ss:$6 sm:$0xff] }
 0x36c   : > { %1750 = vst.msk [vmem:[#allocation4 + $0x28] sm:$0xff] %vm4871_vm1, %v1742_v3  ;;  %v2421_v62 = vpop.permute.xlu0 %2420  ;;  %vm4873_vm6 = vcmask 261248  }
 0x36d   : > { %2438 = vst.msk [vmem:[#allocation3 + $0x18] sm:$0xff] %vm983_vm2, %v2421_v62  ;;  %v2587_v36 = vpop.permute.xlu1 %2586 }
 0x36e   : > { %2605 = vst.msk [vmem:[#allocation3 + $0x10] sm:$0xff] %vm1176_vm4, %v2587_v36  ;;  %v2780_v36 = vld [vmem:[#allocation2 + $0x68] ss:$6 sm:$0xff] }
 0x370   : > { %v2505_v46 = vpop.permute.xlu0 %2504 }
 0x371   : > { %2522 = vst.msk [vmem:[#allocation3 + $0x18] sm:$0xff] %vm1083_vm3, %v2505_v46  ;;  %v2671_v20 = vpop.permute.xlu1 %2670  ;;  %v2783_v46 = vld [vmem:[#allocation2 + $0xf8] ss:$6 sm:$0xff] }
 0x372   : > { %2689 = vst.msk [vmem:[#allocation3 + $0x10] sm:$0xff] %vm1269_vm5, %v2671_v20 }
 0x373   : > { %v1759_v43 = vld [vmem:[#allocation4 + $0x1] ss:$6 sm:$0xff]  ;;  %v1767_v41 = vld [vmem:[#allocation4 + $0x4] ss:$6 sm:$0xff] }
 0x374   : > { %v2589_v10 = vpop.permute.xlu0 %2588  ;;  %1761 = vrot.lane.b32.xlu1 %v1759_v43, %s3563_s18  ;;  %1769 = vrot.lane.b32.xlu0 %v1767_v41, %s3563_s18  ;;  %v1774_v31 = vld [vmem:[#allocation4 + $0x2] ss:$6 sm:$0xff]  ;;  %v1756_v5 = vld [vmem:[#allocation4 + $0x3] ss:$6 sm:$0xff] }
 0x375   : > { %2606 = vst.msk [vmem:[#allocation3 + $0x18] sm:$0xff] %vm1176_vm4, %v2589_v10  ;;  %v2755_v15 = vpop.permute.xlu1 %2754  ;;  %v1824_v53 = vld [vmem:[#allocation4 + $0x8] ss:$6 sm:$0xff]  ;;  %v1782_v34 = vld [vmem:[#allocation4 + $0x5] ss:$6 sm:$0xff] }
 0x376   : > { %2773 = vst.msk [vmem:[#allocation3 + $0x10] sm:$0xff] %vm1362_vm7, %v2755_v15  ;;  %v1753_v35 = vld [vmem:[#allocation4] ss:$6 sm:$0xff]  ;;  %v1838_v42 = vld [vmem:[#allocation4 + $0x9] ss:$6 sm:$0xff] }
 0x377   : > { %1757 = vst.msk [vmem:[#allocation5 + $0x8] sm:$0xff] %vm4871_vm1, %v1756_v5  ;;  %1754 = vst.msk [vmem:[#allocation5] sm:$0xff] %vm4871_vm1, %v1753_v35  ;;  %v1788_v7 = vld [vmem:[#allocation4 + $0x3] ss:$6 sm:$0xff]  ;;  %v1796_v22 = vld [vmem:[#allocation4 + $0x6] ss:$6 sm:$0xff] }
 0x378   : > { %v2673_v16 = vpop.permute.xlu0 %2672  ;;  %1776 = vrot.lane.b32.xlu1 %v1774_v31, %s3568_s13  ;;  %1826 = vrot.lane.b32.xlu0 %v1824_v53, %s3569_s22  ;;  %v1802_v9 = vld [vmem:[#allocation4 + $0x4] ss:$6 sm:$0xff]  ;;  %v1810_v63 = vld [vmem:[#allocation4 + $0x7] ss:$6 sm:$0xff]  ;;  %vm4874_vm1 = vcmask 392448  }
 0x379   : > { %2690 = vst.msk [vmem:[#allocation3 + $0x18] sm:$0xff] %vm1269_vm5, %v2673_v16  ;;  %v2839_v49 = vpop.permute.xlu1 %2838  ;;  %v1816_v11 = vld [vmem:[#allocation4 + $0x5] ss:$6 sm:$0xff]  ;;  %v1830_v59 = vld [vmem:[#allocation4 + $0x6] ss:$6 sm:$0xff] }
 0x37a   : > { %2857 = vst.msk [vmem:[#allocation3 + $0x10] sm:$0xff] %vm1455_vm8, %v2839_v49  ;;  %v2864_v41 = vld [vmem:[#allocation2 + $0x69] ss:$6 sm:$0xff]  ;;  %v2867_v10 = vld [vmem:[#allocation2 + $0xf9] ss:$6 sm:$0xff] }
 0x37b   : > { %v2446_v53 = vld [vmem:[#allocation2 + $0xc4] ss:$6 sm:$0xff]  ;;  %v2532_v5 = vld [vmem:[#allocation2 + $0x125] ss:$6 sm:$0xf] }
 0x37c   : > { %v2757_v33 = vpop.permute.xlu0 %2756  ;;  %1784 = vrot.lane.b32.xlu1 %v1782_v34, %s3568_s13  ;;  %1840 = vrot.lane.b32.xlu0 %v1838_v42, %s3570_s25  ;;  %v2530_v16 = vld [vmem:[#allocation2 + $0xc5] ss:$6 sm:$0xff]  ;;  %v2700_v49 = vld [vmem:[#allocation2 + $0x127] ss:$6 sm:$0xf] }
 0x37d   : > { %2774 = vst.msk [vmem:[#allocation3 + $0x18] sm:$0xff] %vm1362_vm7, %v2757_v33  ;;  %v2423_v17 = vpop.permute.xlu1 %2422  ;;  %v2614_v42 = vld [vmem:[#allocation2 + $0xc6] ss:$6 sm:$0xff]  ;;  %v2868_v33 = vld [vmem:[#allocation2 + $0x129] ss:$6 sm:$0xf] }
 0x37e   : > { %2439 = vst.msk [vmem:[#allocation3 + $0x20] sm:$0xff] %vm983_vm2, %v2423_v17 }
 0x380   : > { %v2841_v54 = vpop.permute.xlu0 %2840  ;;  %1790 = vrot.lane.b32.xlu1 %v1788_v7, %s3571_s28  ;;  %2546 = vrot.lane.b32.xlu0 %v2529_v21, %s3561_s15  ;;  %v2698_v7 = vld [vmem:[#allocation2 + $0xc7] ss:$6 sm:$0xff] }
 0x381   : > { %2858 = vst.msk [vmem:[#allocation3 + $0x18] sm:$0xff] %vm1455_vm8, %v2841_v54  ;;  %v2507_v61 = vpop.permute.xlu1 %2506 }
 0x382   : > { %2523 = vst.msk [vmem:[#allocation3 + $0x20] sm:$0xff] %vm1083_vm3, %v2507_v61  ;;  %v2782_v61 = vld [vmem:[#allocation2 + $0xc8] ss:$6 sm:$0xff] }
 0x384   : > { %1798 = vrot.lane.b32.xlu1 %v1796_v22, %s3571_s28  ;;  %2630 = vrot.lane.b32.xlu0 %v2613_v30, %s3562_s16  ;;  %v2425_v51 = vpop.permute.xlu0 %2424  ;;  %v2866_v22 = vld [vmem:[#allocation2 + $0xc9] ss:$6 sm:$0xff] }
 0x385   : > { %2440 = vst.msk [vmem:[#allocation3 + $0x28] sm:$0xff] %vm983_vm2, %v2425_v51  ;;  %v2591_v6 = vpop.permute.xlu1 %2590  ;;  %v2448_v51 = vld [vmem:[#allocation2 + $0x124] ss:$6 sm:$0xf] }
 0x386   : > { %2607 = vst.msk [vmem:[#allocation3 + $0x20] sm:$0xff] %vm1176_vm4, %v2591_v6  ;;  %v2616_v6 = vld [vmem:[#allocation2 + $0x126] ss:$6 sm:$0xf] }
 0x388   : > { %1804 = vrot.lane.b32.xlu1 %v1802_v9, %s3572_s24  ;;  %2714 = vrot.lane.b32.xlu0 %v2697_v27, %s3563_s18  ;;  %v2509_v47 = vpop.permute.xlu0 %2508 }
 0x389   : > { %2524 = vst.msk [vmem:[#allocation3 + $0x28] sm:$0xff] %vm1083_vm3, %v2509_v47  ;;  %v2675_v8 = vpop.permute.xlu1 %2674 }
 0x38a   : > { %2691 = vst.msk [vmem:[#allocation3 + $0x20] sm:$0xff] %vm1269_vm5, %v2675_v8 }
 0x38c   : > { %1812 = vrot.lane.b32.xlu1 %v1810_v63, %s3572_s24  ;;  %2798 = vrot.lane.b32.xlu0 %v2781_v28, %s3564_s19  ;;  %v2593_v25 = vpop.permute.xlu0 %2592 }
 0x38d   : > { %2608 = vst.msk [vmem:[#allocation3 + $0x28] sm:$0xff] %vm1176_vm4, %v2593_v25  ;;  %v2759_v44 = vpop.permute.xlu1 %2758 }
 0x38e   : > { %2775 = vst.msk [vmem:[#allocation3 + $0x20] sm:$0xff] %vm1362_vm7, %v2759_v44 }
 0x390   : > { %1818 = vrot.lane.b32.xlu1 %v1816_v11, %s3569_s22  ;;  %2882 = vrot.lane.b32.xlu0 %v2865_v50, %s3565_s20  ;;  %v2677_v48 = vpop.permute.xlu0 %2676 }
 0x391   : > { %2692 = vst.msk [vmem:[#allocation3 + $0x28] sm:$0xff] %vm1269_vm5, %v2677_v48  ;;  %v2843_v19 = vpop.permute.xlu1 %2842 }
 0x392   : > { %2859 = vst.msk [vmem:[#allocation3 + $0x20] sm:$0xff] %vm1455_vm8, %v2843_v19 }
 0x394   : > { %1832 = vrot.lane.b32.xlu1 %v1830_v59, %s3570_s25  ;;  %2466 = vrot.lane.b32.xlu0 %v2447_v13, %s3560_s14  ;;  %v2761_v57 = vpop.permute.xlu0 %2760 }
 0x395   : > { %2776 = vst.msk [vmem:[#allocation3 + $0x28] sm:$0xff] %vm1362_vm7, %v2761_v57  ;;  %v2427_v37 = vpop.permute.xlu1 %2426 }
 0x396   : > { %2441 = vst.msk [vmem:[#allocation3 + $0x30] sm:$0xf] %vm990_vm10, %v2427_v37 }
 0x398   : > { %2544 = vrot.lane.b32.xlu1 %v2528_v23, %s3561_s15  ;;  %2550 = vrot.lane.b32.xlu0 %v2531_v40, %s3561_s15  ;;  %v2845_v24 = vpop.permute.xlu0 %2844 }
 0x399   : > { %2860 = vst.msk [vmem:[#allocation3 + $0x28] sm:$0xff] %vm1455_vm8, %v2845_v24  ;;  %v2459_v38 = vpop.permute.xlu1 %2458 }
 0x39a   : > { %2478 = vst.msk [vmem:[#allocation3 + $0x3c] sm:$0xff] %vm983_vm2, %v2459_v38 }
 0x39c   : > { %2628 = vrot.lane.b32.xlu1 %v2612_v0, %s3562_s16  ;;  %2634 = vrot.lane.b32.xlu0 %v2615_v45, %s3562_s16  ;;  %v2457_v29 = vpop.permute.xlu0 %2456 }
 0x39d   : > { %2477 = vst.msk [vmem:[#allocation3 + $0x34] sm:$0xff] %vm983_vm2, %v2457_v29  ;;  %v2541_v32 = vpop.permute.xlu1 %2540 }
 0x39e   : > { %2561 = vst.msk [vmem:[#allocation3 + $0x34] sm:$0xff] %vm1083_vm3, %v2541_v32 }
 0x3a0   : > { %2712 = vrot.lane.b32.xlu1 %v2696_v14, %s3563_s18  ;;  %2718 = vrot.lane.b32.xlu0 %v2699_v39, %s3563_s18  ;;  %v2511_v3 = vpop.permute.xlu0 %2510  ;;  %v2905_v39 = vld [vmem:[#allocation3 + $0x8] sm:$0xff] }
 0x3a1   : > { %2525 = vst.msk [vmem:[#allocation3 + $0x30] sm:$0xf] %vm1090_vm11, %v2511_v3  ;;  %v2595_v62 = vpop.permute.xlu1 %2594 }
 0x3a2   : > { %2609 = vst.msk [vmem:[#allocation3 + $0x30] sm:$0xf] %vm1183_vm12, %v2595_v62  ;;  %v3542_v62 = vld [vmem:[%s4862_s5] sm:$0xff]  }
 0x3a4   : > { %2796 = vrot.lane.b32.xlu1 %v2780_v36, %s3564_s19  ;;  %2802 = vrot.lane.b32.xlu0 %v2783_v46, %s3564_s19  ;;  %v2543_v20 = vpop.permute.xlu0 %2542  ;;  %v2904_v46 = vld [vmem:[#allocation3] sm:$0xff] }
 0x3a5   : > { %2562 = vst.msk [vmem:[#allocation3 + $0x3c] sm:$0xff] %vm1083_vm3, %v2543_v20  ;;  %v2627_v43 = vpop.permute.xlu1 %2626 }
 0x3a6   : > { %2646 = vst.msk [vmem:[#allocation3 + $0x3c] sm:$0xff] %vm1176_vm4, %v2627_v43 }
 0x3a8   : > { %2880 = vrot.lane.b32.xlu1 %v2864_v41, %s3565_s20  ;;  %2886 = vrot.lane.b32.xlu0 %v2867_v10, %s3565_s20  ;;  %v2625_v15 = vpop.permute.xlu0 %2624  ;;  %v2907_v41 = vld [vmem:[#allocation3 + $0x18] sm:$0xff] }
 0x3a9   : > { %2645 = vst.msk [vmem:[#allocation3 + $0x34] sm:$0xff] %vm1176_vm4, %v2625_v15  ;;  %v2709_v31 = vpop.permute.xlu1 %2708  ;;  %v2906_v15 = vld [vmem:[#allocation3 + $0x10] sm:$0xff] }
 0x3aa   : > { %2729 = vst.msk [vmem:[#allocation3 + $0x34] sm:$0xff] %vm1269_vm5, %v2709_v31  ;;  %v2918_v31 = vpack.c.bf16 %v2907_v41, %v2906_v15 }
 0x3ac   : > { %2464 = vrot.lane.b32.xlu1 %v2446_v53, %s3560_s14  ;;  %2552 = vrot.lane.b32.xlu0 %v2532_v5, %s3561_s15  ;;  %v2679_v35 = vpop.permute.xlu0 %2678  ;;  %v2909_v5 = vld [vmem:[#allocation3 + $0x28] sm:$0xff] }
 0x3ad   : > { %2693 = vst.msk [vmem:[#allocation3 + $0x30] sm:$0xf] %vm1276_vm13, %v2679_v35  ;;  %v2763_v58 = vpop.permute.xlu1 %2762 }
 0x3ae   : > { %2777 = vst.msk [vmem:[#allocation3 + $0x30] sm:$0xf] %vm1369_vm14, %v2763_v58  ;;  %v2908_v58 = vld [vmem:[#allocation3 + $0x20] sm:$0xff] }
 0x3b0   : > { %2548 = vrot.lane.b32.xlu1 %v2530_v16, %s3561_s15  ;;  %2720 = vrot.lane.b32.xlu0 %v2700_v49, %s3563_s18  ;;  %v2711_v60 = vpop.permute.xlu0 %2710  ;;  %v2919_v16 = vpack.c.bf16 %v2909_v5, %v2908_v58 }
 0x3b1   : > { %2730 = vst.msk [vmem:[#allocation3 + $0x3c] sm:$0xff] %vm1269_vm5, %v2711_v60  ;;  %v2795_v34 = vpop.permute.xlu1 %2794 }
 0x3b2   : > { %2814 = vst.msk [vmem:[#allocation3 + $0x3c] sm:$0xff] %vm1362_vm7, %v2795_v34 }
 0x3b4   : > { %2632 = vrot.lane.b32.xlu1 %v2614_v42, %s3562_s16  ;;  %2888 = vrot.lane.b32.xlu0 %v2868_v33, %s3565_s20  ;;  %v2793_v17 = vpop.permute.xlu0 %2792 }
 0x3b5   : > { %2813 = vst.msk [vmem:[#allocation3 + $0x34] sm:$0xff] %vm1362_vm7, %v2793_v17  ;;  %v2877_v55 = vpop.permute.xlu1 %2876 }
 0x3b6   : > { %2897 = vst.msk [vmem:[#allocation3 + $0x34] sm:$0xff] %vm1455_vm8, %v2877_v55 }
 0x3b8   : > { %2716 = vrot.lane.b32.xlu1 %v2698_v7, %s3563_s18  ;;  %v2847_v21 = vpop.permute.xlu0 %2846 }
 0x3b9   : > { %2861 = vst.msk [vmem:[#allocation3 + $0x30] sm:$0xf] %vm4875_vm15, %v2847_v21  ;;  %v2461_v54 = vpop.permute.xlu1 %2460  ;;  %vm4878_vm15 = vcmask 917248  }
 0x3ba   : > { %2479 = vst.msk [vmem:[#allocation3 + $0x44] sm:$0xff] %vm983_vm2, %v2461_v54 }
 0x3bc   : > { %2800 = vrot.lane.b32.xlu1 %v2782_v61, %s3564_s19  ;;  %v2879_v56 = vpop.permute.xlu0 %2878 }
 0x3bd   : > { %2898 = vst.msk [vmem:[#allocation3 + $0x3c] sm:$0xff] %vm1455_vm8, %v2879_v56 }
 0x3c0   : > { %2884 = vrot.lane.b32.xlu1 %v2866_v22, %s3565_s20  ;;  %v2463_v30 = vpop.permute.xlu0 %2462  ;;  %v2910_v42 = vld [vmem:[#allocation3 + $0x30] sm:$0xff] }
 0x3c1   : > { %2480 = vst.msk [vmem:[#allocation3 + $0x4c] sm:$0xff] %vm983_vm2, %v2463_v30 }
 0x3c4   : > { %2468 = vrot.lane.b32.xlu1 %v2448_v51, %s3560_s14  ;;  %v2911_v60 = vld [vmem:[#allocation3 + $0x38] sm:$0xff] }
 0x3c5   : > { %v2920_v33 = vpack.c.bf16 %v2911_v60, %v2910_v42  ;;  %v3544_v60 = vld [vmem:[%s4864_s7] ss:$0 sm:$0xff] }
 0x3c8   : > { %2636 = vrot.lane.b32.xlu1 %v2616_v6, %s3562_s16 }
 0x3cc   : > { %2804 = vrot.lane.b32.xlu1 %v2784_v2, %s3564_s19 }
 0x3e6   : > { %v1770_v9 = vpop.permute.xlu0 %1769  ;;  %v1762_v27 = vpop.permute.xlu1 %1761 }
 0x3e7   : > { %1772 = vst.msk [vmem:[#allocation5 + $0x8] sm:$0xff] %vm4873_vm6, %v1770_v9  ;;  %1765 = vst.msk [vmem:[#allocation5] sm:$0xff] %vm4873_vm6, %v1762_v27  ;;  %vm4876_vm6 = vcmask 654848  }
 0x3ea   : > { %v1827_v47 = vpop.permute.xlu0 %1826  ;;  %v1777_v8 = vpop.permute.xlu1 %1776 }
 0x3eb   : > { %1780 = vst.msk [vmem:[#allocation5] sm:$0xff] %vm4874_vm1, %v1777_v8  ;;  %v4770_v8 = vld [vmem:[%s4866_s9] ss:$0 sm:$0xff] }
 0x3ee   : > { %v1841_v12 = vpop.permute.xlu0 %1840  ;;  %v1785_v63 = vpop.permute.xlu1 %1784 }
 0x3ef   : > { %1787 = vst.msk [vmem:[#allocation5 + $0x8] sm:$0xff] %vm4874_vm1, %v1785_v63  ;;  %vm1821_vm1 = vcmask 786048  }
 0x3f2   : > { %v2547_v28 = vpop.permute.xlu0 %2546  ;;  %v1791_v25 = vpop.permute.xlu1 %1790 }
 0x3f3   : > { %2564 = vst.msk [vmem:[#allocation3 + $0x4c] sm:$0xff] %vm1083_vm3, %v2547_v28  ;;  %v4776_v28 = vld [vmem:[%s4867_s10] ss:$0 sm:$0xff] }
 0x3f4   : > { %1794 = vst.msk [vmem:[#allocation5] sm:$0xff] %vm1793_vm0, %v1791_v25 }
 0x3f6   : > { %v2631_v44 = vpop.permute.xlu0 %2630  ;;  %v1799_v18 = vpop.permute.xlu1 %1798 }
 0x3f7   : > { %2648 = vst.msk [vmem:[#allocation3 + $0x4c] sm:$0xff] %vm1176_vm4, %v2631_v44 }
 0x3f8   : > { %1801 = vst.msk [vmem:[#allocation5 + $0x8] sm:$0xff] %vm1793_vm0, %v1799_v18 }
 0x3fa   : > { %v2715_v11 = vpop.permute.xlu0 %2714  ;;  %v1805_v50 = vpop.permute.xlu1 %1804 }
 0x3fb   : > { %2732 = vst.msk [vmem:[#allocation3 + $0x4c] sm:$0xff] %vm1269_vm5, %v2715_v11 }
 0x3fc   : > { %1808 = vst.msk [vmem:[#allocation5] sm:$0xff] %vm4876_vm6, %v1805_v50 }
 0x3fe   : > { %v2799_v48 = vpop.permute.xlu0 %2798  ;;  %v1813_v19 = vpop.permute.xlu1 %1812 }
 0x3ff   : > { %2816 = vst.msk [vmem:[#allocation3 + $0x4c] sm:$0xff] %vm1362_vm7, %v2799_v48 }
 0x400   : > { %1815 = vst.msk [vmem:[#allocation5 + $0x8] sm:$0xff] %vm4876_vm6, %v1813_v19  ;;  %vm4877_vm6 = vcmask 916480  }
 0x401   : > { %1829 = vst.msk [vmem:[#allocation5 + $0x8] sm:$0xff] %vm1821_vm1, %v1827_v47 }
 0x402   : > { %1843 = vst.msk [vmem:[#allocation5 + $0x8] sm:$0xff] %vm4878_vm15, %v1841_v12  ;;  %v2883_v59 = vpop.permute.xlu0 %2882  ;;  %v1819_v13 = vpop.permute.xlu1 %1818 }
 0x403   : > { %2900 = vst.msk [vmem:[#allocation3 + $0x4c] sm:$0xff] %vm1455_vm8, %v2883_v59 }
 0x404   : > { %1822 = vst.msk [vmem:[#allocation5] sm:$0xff] %vm1821_vm1, %v1819_v13 }
 0x406   : > { %v2467_v57 = vpop.permute.xlu0 %2466  ;;  %v1833_v37 = vpop.permute.xlu1 %1832 }
 0x407   : > { %2482 = vst.msk [vmem:[#allocation3 + $0x5c] sm:$0xff] %vm983_vm2, %v2467_v57 }
 0x408   : > { %1836 = vst.msk [vmem:[#allocation5] sm:$0xff] %vm4878_vm15, %v1833_v37 }
 0x409   : > { %v1845_v45 = vld [vmem:[#allocation5 + $0x8] sm:$0xff] }
 0x40a   : > { %v2551_v23 = vpop.permute.xlu0 %2550  ;;  %v2545_v40 = vpop.permute.xlu1 %2544 }
 0x40b   : > { %2566 = vst.msk [vmem:[#allocation3 + $0x5c] sm:$0xff] %vm1083_vm3, %v2551_v23  ;;  %2563 = vst.msk [vmem:[#allocation3 + $0x44] sm:$0xff] %vm1083_vm3, %v2545_v40 }
 0x40e   : > { %v2635_v24 = vpop.permute.xlu0 %2634  ;;  %v2629_v38 = vpop.permute.xlu1 %2628 }
 0x40f   : > { %v1844_v0 = vld [vmem:[#allocation5] sm:$0xff]  ;;  %2650 = vst.msk [vmem:[#allocation3 + $0x5c] sm:$0xff] %vm1176_vm4, %v2635_v24  ;;  %2647 = vst.msk [vmem:[#allocation3 + $0x44] sm:$0xff] %vm1176_vm4, %v2629_v38 }
 0x410   : > { %v1846_v29 = vpack.c.bf16 %v1845_v45, %v1844_v0 }
 0x412   : > { %3443 = vmatmul.mubr.msk.bf16.vlgmr.msra.gmra.mxu1 %vm4877_vm6, %v1846_v29  ;;  %v2719_v32 = vpop.permute.xlu0 %2718  ;;  %v2713_v14 = vpop.permute.xlu1 %2712  ;;  %vm4918_vm6 = vcmask 228352  }
 0x413   : > { %3447 = vmatpush3.bf16.msra.mxu1 %v4223_v4  ;;  %3450 = vmatprep.mubr.msk.bf16.mxu1 %vm3567_vm9, %v3566_v52  ;;  %2734 = vst.msk [vmem:[#allocation3 + $0x5c] sm:$0xff] %vm1269_vm5, %v2719_v32  ;;  %2731 = vst.msk [vmem:[#allocation3 + $0x44] sm:$0xff] %vm1269_vm5, %v2713_v14  ;;  %v2917_v4 = vpack.c.bf16 %v2905_v39, %v2904_v46 }
 0x414   : > { %3448 = vmatprep.subr.bf16.mxu1 %v3566_v52  ;;  %vm4919_vm15 = vmmov %vm4918_vm6 }
 0x416   : > { %v2803_v3 = vpop.permute.xlu0 %2802  ;;  %v2797_v36 = vpop.permute.xlu1 %2796 }
 0x417   : > { %3449 = vmatpush3.bf16.msra.mxu1 %v3542_v62  ;;  %2818 = vst.msk [vmem:[#allocation3 + $0x5c] sm:$0xff] %vm1362_vm7, %v2803_v3  ;;  %2815 = vst.msk [vmem:[#allocation3 + $0x44] sm:$0xff] %vm1362_vm7, %v2797_v36 }
 0x41a   : > { %3451 = vmatmul.mubr.msk.bf16.vlgmr.msra.gmra.mxu1 %vm4918_vm6, %v2917_v4  ;;  %v2887_v20 = vpop.permute.xlu0 %2886  ;;  %v2881_v43 = vpop.permute.xlu1 %2880 }
 0x41b   : > { %3454 = vmatprep.mubr.msk.bf16.mxu1 %vm3567_vm9, %v3566_v52  ;;  %2902 = vst.msk [vmem:[#allocation3 + $0x5c] sm:$0xff] %vm1455_vm8, %v2887_v20  ;;  %2899 = vst.msk [vmem:[#allocation3 + $0x44] sm:$0xff] %vm1455_vm8, %v2881_v43 }
 0x41e   : > { %v2465_v10 = vpop.permute.xlu1 %2464  ;;  %v2553_v55 = vpop.permute.xlu0 %2552 }
 0x41f   : > { %2481 = vst.msk [vmem:[#allocation3 + $0x54] sm:$0xff] %vm983_vm2, %v2465_v10  ;;  %vm4920_vm2 = vmmov %vm4918_vm6 }
 0x422   : > { %3455 = vmatmul.mubr.msk.bf16.gmra.mxu1 %vm4919_vm15, %v2918_v31  ;;  %v2549_v53 = vpop.permute.xlu1 %2548  ;;  %v2912_v7 = vld [vmem:[#allocation3 + $0x40] sm:$0xff]  ;;  %v2913_v21 = vld [vmem:[#allocation3 + $0x48] sm:$0xff]  ;;  %v2721_v56 = vpop.permute.xlu0 %2720 }
 0x423   : > { %3458 = vmatprep.mubr.msk.bf16.mxu1 %vm3567_vm9, %v3566_v52  ;;  %2565 = vst.msk [vmem:[#allocation3 + $0x54] sm:$0xff] %vm1083_vm3, %v2549_v53  ;;  %v2921_v61 = vpack.c.bf16 %v2913_v21, %v2912_v7  ;;  %vm4921_vm3 = vmmov %vm4920_vm2  ;;  %v3543_v31 = vld [vmem:[%s4863_s6] ss:$0 sm:$0xff] }
 0x426   : > { %v2633_v35 = vpop.permute.xlu1 %2632  ;;  %v2889_v2 = vpop.permute.xlu0 %2888 }
 0x427   : > { %2649 = vst.msk [vmem:[#allocation3 + $0x54] sm:$0xff] %vm1176_vm4, %v2633_v35  ;;  %vm4922_vm4 = vcmask 224448  }
 0x42a   : > { %3459 = vmatmul.mubr.msk.bf16.gmra.mxu1 %vm4918_vm6, %v2919_v16  ;;  %v2717_v49 = vpop.permute.xlu1 %2716 }
 0x42b   : > { %3462 = vmatprep.mubr.msk.bf16.mxu1 %vm3567_vm9, %v3566_v52  ;;  %2733 = vst.msk [vmem:[#allocation3 + $0x54] sm:$0xff] %vm1269_vm5, %v2717_v49  ;;  %vm4923_vm5 = vmmov %vm4920_vm2 }
 0x42e   : > { %v2801_v34 = vpop.permute.xlu1 %2800 }
 0x42f   : > { %2817 = vst.msk [vmem:[#allocation3 + $0x54] sm:$0xff] %vm1362_vm7, %v2801_v34  ;;  %vm4924_vm7 = vmmov %vm4920_vm2 }
 0x432   : > { %3463 = vmatmul.mubr.msk.bf16.gmra.mxu1 %vm4920_vm2, %v2920_v33  ;;  %v2885_v17 = vpop.permute.xlu1 %2884 }
 0x433   : > { %3466 = vmatprep.mubr.msk.bf16.mxu1 %vm3567_vm9, %v3566_v52  ;;  %2901 = vst.msk [vmem:[#allocation3 + $0x54] sm:$0xff] %vm1455_vm8, %v2885_v17  ;;  %vm1953_vm8 = vcmask 523264  }
 0x436   : > { %v2469_v54 = vpop.permute.xlu1 %2468 }
 0x437   : > { %2483 = vst.msk [vmem:[#allocation3 + $0x64] sm:$0xf] %vm990_vm10, %v2469_v54  ;;  %vm4926_vm10 = vcmask 130048  }
 0x438   : > { %2567 = vst.msk [vmem:[#allocation3 + $0x64] sm:$0xf] %vm1090_vm11, %v2553_v55  ;;  %vm4932_vm6 = vmmov %vm4926_vm10 }
 0x43a   : > { %3467 = vmatmul.mubr.msk.bf16.gmra.mxu1 %vm4921_vm3, %v2921_v61  ;;  %v2637_v22 = vpop.permute.xlu1 %2636  ;;  %v2914_v30 = vld [vmem:[#allocation3 + $0x50] sm:$0xff]  ;;  %v2915_v51 = vld [vmem:[#allocation3 + $0x58] sm:$0xff]  ;;  %vm4934_vm3 = vmmov %vm4932_vm6 }
 0x43b   : > { %3470 = vmatprep.mubr.msk.bf16.mxu1 %vm3567_vm9, %v3566_v52  ;;  %2651 = vst.msk [vmem:[#allocation3 + $0x64] sm:$0xf] %vm1183_vm12, %v2637_v22  ;;  %v2922_v9 = vpack.c.bf16 %v2915_v51, %v2914_v30  ;;  %vm4928_vm12 = vmmov %vm4926_vm10 }
 0x43c   : > { %2735 = vst.msk [vmem:[#allocation3 + $0x64] sm:$0xf] %vm1276_vm13, %v2721_v56 }
 0x43e   : > { %v2805_v6 = vpop.permute.xlu1 %2804 }
 0x43f   : > { %2819 = vst.msk [vmem:[#allocation3 + $0x64] sm:$0xf] %vm1369_vm14, %v2805_v6  ;;  %vm4930_vm14 = vmmov %vm4926_vm10 }
 0x440   : > { %2903 = vst.msk [vmem:[#allocation3 + $0x64] sm:$0xf] %vm4922_vm4, %v2889_v2 }
 0x442   : > { %3471 = vmatmul.mubr.msk.bf16.gmra.mxu1 %vm4923_vm5, %v2922_v9  ;;  %vm4936_vm5 = vcmask 125952  }
 0x443   : > { %3474 = vmatprep.mubr.msk.bf16.mxu1 %vm3567_vm9, %v3566_v52  ;;  %vm4925_vm9 = vcmask 1043456  }
 0x444   : > { %vm4927_vm11 = vmmov %vm4925_vm9 }
 0x445   : > { %vm4929_vm13 = vmmov %vm4925_vm9 }
 0x446   : > { %vm4931_vm15 = vmmov %vm4925_vm9 }
 0x447   : > { %v2916_v27 = vld [vmem:[#allocation3 + $0x60] sm:$0xff]  ;;  %vm4933_vm2 = vmmov %vm4925_vm9 }
 0x448   : > { %v2923_v47 = vpack.c.bf16 %v2916_v27, %v2916_v27  ;;  %vm4935_vm4 = vmmov %vm4933_vm2 }
 0x44a   : > { %3475 = vmatmul.mubr.msk.bf16.gmra.mxu1 %vm4924_vm7, %v2923_v47  ;;  %vm4937_vm7 = vmmov %vm4934_vm3 }
 0x4d2   : > { %v1927_v12 = vpop.f32.mrf.mxu1 }
 0x4d3   : > { %v1940_v63 = vmul.f32 %v4770_v8, %v1927_v12 }
 0x4d4   : > { %v3444_v25 = vpop.f32.mrf.mxu1 }
 0x4d5   : > { %v1948_v52 = vadd.f32 %v4776_v28, %v1940_v63 }
 0x4d6   : > { %v1930_v44 = vpop.f32.mrf.mxu1 }
 0x4d7   : > { %v1941_v18 = vmul.f32 %v4770_v8, %v1930_v44  ;;  %v1950_v19 = vmax.f32 %v1948_v52, 0.0 }
 0x4d8   : > { %v3445_v11 = vpop.f32.mrf.mxu1 }
 0x4d9   : > { %v1949_v50 = vadd.f32 %v4776_v28, %v1941_v18 }
 0x4da   : > { %v2979_v48 = vpop.f32.mrf.mxu1 }
 0x4db   : > { %v1951_v59 = vmax.f32 %v1949_v50, 0.0  ;;  %v3033_v46 = vmul.f32 %v4497_v1, %v2979_v48 }
 0x4dc   : > { %v3452_v13 = vpop.f32.mrf.mxu1 }
 0x4dd   : > { %v1952_v57 = vmax.f32 %v1950_v19, %v1951_v59  ;;  %v3046_v15 = vadd.f32 %v4503_v26, %v3033_v46 }
 0x4de   : > { %v2982_v37 = vpop.f32.mrf.mxu1 }
 0x4df   : > { %1954 = vst.msk [vmem:[%s4785_s29] sm:$0xff] %vm1953_vm8, %v1952_v57  ;;  %v3034_v53 = vmul.f32 %v3543_v31, %v2982_v37  ;;  %v3059_v42 = vmax.f32 %v3046_v15, 0.0 }
 0x4e0   : > { %v3453_v23 = vpop.f32.mrf.mxu1 }
 0x4e2   : > { %v2987_v40 = vpop.f32.mrf.mxu1 }
 0x4e3   : > { %v3035_v33 = vmul.f32 %v3543_v31, %v2987_v40 }
 0x4e4   : > { %v3456_v24 = vpop.f32.mrf.mxu1 }
 0x4e5   : > { %v3048_v51 = vadd.f32 %v3544_v60, %v3035_v33 }
 0x4e6   : > { %v2990_v38 = vpop.f32.mrf.mxu1 }
 0x4e7   : > { %v3036_v6 = vmul.f32 %v3543_v31, %v2990_v38  ;;  %v3061_v52 = vmax.f32 %v3048_v51, 0.0 }
 0x4e8   : > { %v3457_v0 = vpop.f32.mrf.mxu1 }
 0x4e9   : > { %v3049_v18 = vadd.f32 %v3544_v60, %v3036_v6 }
 0x4ea   : > { %v2995_v45 = vpop.f32.mrf.mxu1 }
 0x4eb   : > { %v3037_v11 = vmul.f32 %v3543_v31, %v2995_v45  ;;  %v3062_v40 = vmax.f32 %v3049_v18, 0.0 }
 0x4ec   : > { %v3460_v29 = vpop.f32.mrf.mxu1 }
 0x4ed   : > { %v3050_v24 = vadd.f32 %v3544_v60, %v3037_v11 }
 0x4ee   : > { %v2998_v32 = vpop.f32.mrf.mxu1 }
 0x4ef   : > { %v3038_v38 = vmul.f32 %v3543_v31, %v2998_v32  ;;  %v3063_v46 = vmax.f32 %v3050_v24, 0.0 }
 0x4f0   : > { %v3461_v14 = vpop.f32.mrf.mxu1 }
 0x4f2   : > { %v3003_v39 = vpop.f32.mrf.mxu1 }
 0x4f3   : > { %v3039_v3 = vmul.f32 %v4497_v1, %v3003_v39 }
 0x4f4   : > { %v3464_v62 = vpop.f32.mrf.mxu1 }
 0x4f5   : > { %v4791_v36 = vadd.f32 %v4503_v26, %v3039_v3 }
 0x4f6   : > { %v3006_v4 = vpop.f32.mrf.mxu1 }
 0x4f7   : > { %v3040_v20 = vmul.f32 %v4497_v1, %v3006_v4  ;;  %v3065_v41 = vmax.f32 %v4791_v36, 0.0 }
 0x4f8   : > { %v3465_v43 = vpop.f32.mrf.mxu1 }
 0x4f9   : > { %v3053_v10 = vadd.f32 %v4503_v26, %v3040_v20  ;;  %v3079_v49 = vrot.slane %v3065_v41, 4  ;;  %v3047_v26 = vadd.f32 %v3544_v60, %v3034_v53  ;;  %v3051_v20 = vadd.f32 %v3544_v60, %v3038_v38 }
 0x4fa   : > { %v3011_v5 = vpop.f32.mrf.mxu1 }
 0x4fb   : > { %v3066_v35 = vmax.f32 %v3053_v10, 0.0  ;;  %v3041_v58 = vmul.f32 %v3543_v31, %v3011_v5  ;;  %v3060_v30 = vmax.f32 %v3047_v26, 0.0 }
 0x4fc   : > { %v3468_v16 = vpop.f32.mrf.mxu1 }
 0x4fd   : > { %v3080_v1 = vrot.slane %v3066_v35, 4  ;;  %v3054_v34 = vadd.f32 %v3544_v60, %v3041_v58  ;;  %v3064_v35 = vmax.f32 %v3051_v20, 0.0 }
 0x4fe   : > { %v3014_v17 = vpop.f32.mrf.mxu1 }
 0x4ff   : > { %v3081_v55 = vsel %vm4925_vm9, %v3079_v49, %v3080_v1  ;;  %v3067_v7 = vmax.f32 %v3054_v34, 0.0  ;;  %v3042_v21 = vmul.f32 %v3543_v31, %v3014_v17  ;;  %vm4938_vm9 = vmmov %vm4934_vm3 }
 0x500   : > { %v3099_v54 = vmax.f32 %v3059_v42, %v3081_v55  ;;  %v3469_v61 = vpop.f32.mrf.mxu1 }
 0x501   : > { %v3082_v56 = vrot.slane %v3067_v7, 4  ;;  %v3055_v22 = vadd.f32 %v3544_v60, %v3042_v21 }
 0x502   : > { %3106 = vst.msk [vmem:[#allocation4] sm:$0xff] %vm4926_vm10, %v3099_v54  ;;  %v3019_v2 = vpop.f32.mrf.mxu1  ;;  %vm4939_vm10 = vmmov %vm4934_vm3 }
 0x503   : > { %v3083_v9 = vsel %vm4927_vm11, %v3080_v1, %v3082_v56  ;;  %v3068_v27 = vmax.f32 %v3055_v22, 0.0  ;;  %v3043_v47 = vmul.f32 %v3543_v31, %v3019_v2  ;;  %vm4940_vm11 = vcmask 261248  }
 0x504   : > { %v3100_v12 = vmax.f32 %v3060_v30, %v3083_v9  ;;  %v3472_v63 = vpop.f32.mrf.mxu1 }
 0x505   : > { %v3084_v25 = vrot.slane %v3068_v27, 4  ;;  %v3056_v44 = vadd.f32 %v3544_v60, %v3043_v47 }
 0x506   : > { %3107 = vst.msk [vmem:[#allocation4 + $0x8] sm:$0xff] %vm4928_vm12, %v3100_v12  ;;  %v3022_v50 = vpop.f32.mrf.mxu1  ;;  %vm4941_vm12 = vmmov %vm4940_vm11 }
 0x507   : > { %v3085_v48 = vsel %vm4929_vm13, %v3082_v56, %v3084_v25  ;;  %v3069_v19 = vmax.f32 %v3056_v44, 0.0  ;;  %v3044_v59 = vmul.f32 %v3543_v31, %v3022_v50  ;;  %vm4942_vm13 = vcmask 392448  }
 0x508   : > { %v3101_v13 = vmax.f32 %v3061_v52, %v3085_v48  ;;  %v3473_v57 = vpop.f32.mrf.mxu1 }
 0x509   : > { %v3086_v37 = vrot.slane %v3069_v19, 4  ;;  %v3057_v23 = vadd.f32 %v3544_v60, %v3044_v59 }
 0x50a   : > { %3108 = vst.msk [vmem:[#allocation4 + $0x10] sm:$0xff] %vm4930_vm14, %v3101_v13  ;;  %v3027_v45 = vpop.f32.mrf.mxu1  ;;  %vm4943_vm14 = vmmov %vm4942_vm13 }
 0x50b   : > { %v3087_v0 = vsel %vm4931_vm15, %v3084_v25, %v3086_v37  ;;  %v3070_v29 = vmax.f32 %v3057_v23, 0.0  ;;  %v3045_v39 = vmul.f32 %v3543_v31, %v3027_v45  ;;  %vm4944_vm15 = vcmask 654848  }
 0x50c   : > { %v3102_v14 = vmax.f32 %v3062_v40, %v3087_v0  ;;  %v3476_v62 = vpop.f32.mrf.mxu1 }
 0x50d   : > { %v3088_v3 = vrot.slane %v3070_v29, 4  ;;  %v3058_v4 = vadd.f32 %v3544_v60, %v3045_v39 }
 0x50e   : > { %3109 = vst.msk [vmem:[#allocation4 + $0x18] sm:$0xff] %vm4932_vm6, %v3102_v14  ;;  %v3030_v10 = vpop.f32.mrf.mxu1  ;;  %vm4945_vm6 = vmmov %vm4944_vm15 }
 0x50f   : > { %v3089_v43 = vsel %vm4933_vm2, %v3086_v37, %v3088_v3  ;;  %v3071_v53 = vmax.f32 %v3058_v4, 0.0  ;;  %vm4946_vm2 = vcmask 917248  }
 0x510   : > { %v3103_v15 = vmax.f32 %v3063_v46, %v3089_v43  ;;  %v3477_v5 = vpop.f32.mrf.mxu1 }
 0x511   : > { %v3090_v32 = vrot.slane %v3071_v53, 4 }
 0x512   : > { %3110 = vst.msk [vmem:[#allocation4 + $0x20] sm:$0xff] %vm4934_vm3, %v3103_v15  ;;  %vm4947_vm3 = vmmov %vm4946_vm2 }
 0x513   : > { %v3091_v58 = vsel %vm4935_vm4, %v3088_v3, %v3090_v32  ;;  %v3105_v31 = vmax.f32 %v3065_v41, %v3090_v32 }
 0x514   : > { %v3104_v16 = vmax.f32 %v3064_v35, %v3091_v58 }
 0x515   : > { %3112 = vst.msk [vmem:[#allocation4 + $0x30] sm:$0xf] %vm4936_vm5, %v3105_v31 }
 0x516   : > { %3111 = vst.msk [vmem:[#allocation4 + $0x28] sm:$0xff] %vm4937_vm7, %v3104_v16 }
 0x51d   : > { %v3123_v49 = vld [vmem:[#allocation4 + $0x4] ss:$6 sm:$0xff]  ;;  %v3117_v1 = vld [vmem:[#allocation4 + $0x1] ss:$6 sm:$0xff] }
 0x51e   : > { %3125 = vrot.lane.b32.xlu0 %v3123_v49, %s3563_s18  ;;  %3119 = vrot.lane.b32.xlu1 %v3117_v1, %s3563_s18  ;;  %v3135_v60 = vld [vmem:[#allocation4 + $0x5] ss:$6 sm:$0xff]  ;;  %v3129_v34 = vld [vmem:[#allocation4 + $0x2] ss:$6 sm:$0xff] }
 0x51f   : > { %v3115_v42 = vld [vmem:[#allocation4 + $0x3] ss:$6 sm:$0xff]  ;;  %v3113_v26 = vld [vmem:[#allocation4] ss:$6 sm:$0xff] }
 0x520   : > { %3116 = vst.msk [vmem:[#allocation5 + $0x8] sm:$0xff] %vm4938_vm9, %v3115_v42  ;;  %v3147_v36 = vld [vmem:[#allocation4 + $0x6] ss:$6 sm:$0xff]  ;;  %v3141_v41 = vld [vmem:[#allocation4 + $0x3] ss:$6 sm:$0xff] }
 0x521   : > { %3114 = vst.msk [vmem:[#allocation5] sm:$0xff] %vm4939_vm10, %v3113_v26  ;;  %v3159_v33 = vld [vmem:[#allocation4 + $0x7] ss:$6 sm:$0xff]  ;;  %v3153_v17 = vld [vmem:[#allocation4 + $0x4] ss:$6 sm:$0xff] }
 0x522   : > { %3137 = vrot.lane.b32.xlu0 %v3135_v60, %s3568_s13  ;;  %3131 = vrot.lane.b32.xlu1 %v3129_v34, %s3568_s13  ;;  %v3171_v55 = vld [vmem:[#allocation4 + $0x8] ss:$6 sm:$0xff]  ;;  %v3165_v7 = vld [vmem:[#allocation4 + $0x5] ss:$6 sm:$0xff] }
 0x523   : > { %v3183_v21 = vld [vmem:[#allocation4 + $0x9] ss:$6 sm:$0xff]  ;;  %v3177_v54 = vld [vmem:[#allocation4 + $0x6] ss:$6 sm:$0xff] }
 0x526   : > { %3149 = vrot.lane.b32.xlu0 %v3147_v36, %s3571_s28  ;;  %3143 = vrot.lane.b32.xlu1 %v3141_v41, %s3571_s28 }
 0x52a   : > { %3161 = vrot.lane.b32.xlu0 %v3159_v33, %s3572_s24  ;;  %3155 = vrot.lane.b32.xlu1 %v3153_v17, %s3572_s24 }
 0x52e   : > { %3173 = vrot.lane.b32.xlu0 %v3171_v55, %s3569_s22  ;;  %3167 = vrot.lane.b32.xlu1 %v3165_v7, %s3569_s22 }
 0x532   : > { %3185 = vrot.lane.b32.xlu0 %v3183_v21, %s3570_s25  ;;  %3179 = vrot.lane.b32.xlu1 %v3177_v54, %s3570_s25 }
 0x590   : > { %v3126_v61 = vpop.permute.xlu0 %3125  ;;  %v3120_v56 = vpop.permute.xlu1 %3119 }
 0x591   : > { %3128 = vst.msk [vmem:[#allocation5 + $0x8] sm:$0xff] %vm4940_vm11, %v3126_v61 }
 0x592   : > { %3122 = vst.msk [vmem:[#allocation5] sm:$0xff] %vm4941_vm12, %v3120_v56 }
 0x594   : > { %v3138_v22 = vpop.permute.xlu0 %3137  ;;  %v3132_v30 = vpop.permute.xlu1 %3131 }
 0x595   : > { %3140 = vst.msk [vmem:[#allocation5 + $0x8] sm:$0xff] %vm4942_vm13, %v3138_v22 }
 0x596   : > { %3134 = vst.msk [vmem:[#allocation5] sm:$0xff] %vm4943_vm14, %v3132_v30 }
 0x598   : > { %v3150_v51 = vpop.permute.xlu0 %3149  ;;  %v3144_v6 = vpop.permute.xlu1 %3143 }
 0x599   : > { %3152 = vst.msk [vmem:[#allocation5 + $0x8] sm:$0xff] %vm1793_vm0, %v3150_v51  ;;  %3146 = vst.msk [vmem:[#allocation5] sm:$0xff] %vm1793_vm0, %v3144_v6  ;;  %vm4948_vm0 = vcmask 916480  }
 0x59c   : > { %v3162_v2 = vpop.permute.xlu0 %3161  ;;  %v3156_v9 = vpop.permute.xlu1 %3155 }
 0x59d   : > { %3164 = vst.msk [vmem:[#allocation5 + $0x8] sm:$0xff] %vm4944_vm15, %v3162_v2 }
 0x59e   : > { %3158 = vst.msk [vmem:[#allocation5] sm:$0xff] %vm4945_vm6, %v3156_v9 }
 0x5a0   : > { %v3174_v27 = vpop.permute.xlu0 %3173  ;;  %v3168_v47 = vpop.permute.xlu1 %3167 }
 0x5a1   : > { %3176 = vst.msk [vmem:[#allocation5 + $0x8] sm:$0xff] %vm1821_vm1, %v3174_v27  ;;  %3170 = vst.msk [vmem:[#allocation5] sm:$0xff] %vm1821_vm1, %v3168_v47 }
 0x5a4   : > { %v3186_v12 = vpop.permute.xlu0 %3185  ;;  %v3180_v63 = vpop.permute.xlu1 %3179 }
 0x5a5   : > { %3188 = vst.msk [vmem:[#allocation5 + $0x8] sm:$0xff] %vm4946_vm2, %v3186_v12 }
 0x5a6   : > { %3182 = vst.msk [vmem:[#allocation5] sm:$0xff] %vm4947_vm3, %v3180_v63 }
 0x5ac   : > { %v3190_v44 = vld [vmem:[#allocation5 + $0x8] sm:$0xff] }
 0x5ad   : > { %v3189_v25 = vld [vmem:[#allocation5] sm:$0xff] }
 0x5ae   : > { %v3191_v52 = vpack.c.bf16 %v3190_v44, %v3189_v25 }
 0x5b0   : > { %3493 = vmatmul.mubr.msk.bf16.vlgmr.msra.gmra.mxu0 %vm4948_vm0, %v3191_v52 }
 0x670   : > { %v3229_v18 = vpop.f32.mrf.mxu0 }
 0x671   : > { %v3236_v11 = vmul.f32 %v4770_v8, %v3229_v18 }
 0x672   : > { %v3494_v50 = vpop.f32.mrf.mxu0 }
 0x673   : > { %v3238_v19 = vadd.f32 %v4776_v28, %v3236_v11 }
 0x674   : > { %v3232_v48 = vpop.f32.mrf.mxu0 }
 0x675   : > { %v3237_v59 = vmul.f32 %v4770_v8, %v3232_v48  ;;  %v3240_v37 = vmax.f32 %v3238_v19, 0.0 }
 0x676   : > { %v3495_v13 = vpop.f32.mrf.mxu0 }
 0x677   : > { %v3239_v57 = vadd.f32 %v4776_v28, %v3237_v59 }
 0x679   : > { %v3241_v23 = vmax.f32 %v3239_v57, 0.0 }
 0x67b   : > { %v3242_v40 = vmax.f32 %v3240_v37, %v3241_v23 }
 0x67d   : > { %3359 = vst.msk [vmem:[%s4785_s29 + $0x8] sm:$0xff] %vm1953_vm8, %v3242_v40 }
 0x67e PF: > { %s21_s17 = sadd.s32 1, %s3551_s17  }
 0x67f   : > { %p18_p4 = scmp.ge.s32.totalorder %s21_s17, 4  }
 0x681   :  { %20 = sbr.rel (!%p18_p4) target bundleno = 1 (0x1), region = 178 }

</bundles_post_ra>
